<compile_context>
chip_gen: v5e
topology: v5e:2x2
jax: 0.10.0
libtpu: 0.0.40
codegen_flags: <defaults>
</compile_context>

<pallas_src>
import jax
import jax.numpy as jnp
from jax.experimental import pallas as pl
from jax.experimental.pallas import tpu as pltpu


def _round_up(x: int, m: int) -> int:
    return ((x + m - 1) // m) * m


# -----------------------------------------------------------------------------
# Kernel: the whole 5-layer MLP fused into one VMEM-resident kernel.
# -----------------------------------------------------------------------------
def _critic_mlp_kernel(x_ref,
                       w1_ref, b1_ref,
                       w2_ref, b2_ref,
                       w3_ref, b3_ref,
                       w4_ref, b4_ref,
                       w5_ref, b5_ref,
                       o_ref):
    def dense_relu(h, w_ref, b_ref):
        # bf16 x bf16 on the MXU, f32 accumulation; f32 bias + ReLU on the VPU.
        y = jnp.dot(h.astype(w_ref.dtype), w_ref[...],
                    preferred_element_type=jnp.float32)
        return jnp.maximum(y + b_ref[...], 0.0)

    # Note: rows of the partial edge tile beyond the real batch contain stale
    # VMEM data.  Every output row depends only on its own input row and those
    # rows are never written back (output DMA is clamped to B), so this is
    # safe; do NOT add any cross-row (tile-level) reductions here.
    h = dense_relu(x_ref[...], w1_ref, b1_ref)   # (TB, 640)
    h = dense_relu(h, w2_ref, b2_ref)            # (TB, 640)
    h = dense_relu(h, w3_ref, b3_ref)            # (TB, 384)
    h = dense_relu(h, w4_ref, b4_ref)            # (TB, 256)

    # Final 256 -> 1 layer: only one real output column, so skip the 128x
    # padded MXU pass.  VPU broadcast-multiply + XLU lane reduce, written
    # straight into the (TB, 1) output column.
    w5 = w5_ref[...].astype(jnp.float32)                          # (1, 256)
    y = jnp.sum(h * w5, axis=-1, keepdims=True) + b5_ref[...]     # (TB, 1)
    o_ref[...] = jnp.maximum(y, 0.0).astype(o_ref.dtype)          # final ReLU


# -----------------------------------------------------------------------------
# Wrapper: tile the batch over the grid and call the kernel.
# -----------------------------------------------------------------------------
@jax.jit
def critic_forward(state, params):
    """state: [B, input_dim] -> value: [B, 1] float32."""
    # The kernel quantizes activations to bf16 before every matmul anyway, so
    # feed the input as bf16 (halves input DMA; free if the caller already
    # holds the state in bf16).
    x = state.astype(jnp.bfloat16)
    B, D = x.shape

    # ---- Batch-tile / grid policy ------------------------------------------
    #   * >=2 tiles when the batch is big enough to split, so both v7x
    #     TensorCores get work ("parallel" axis); one extra ~0.35us grid step
    #     on single-TC v5e/v6e.
    #   * Tile sized to the batch (no huge fixed-tile padding).
    #   * <=1024 rows per tile keeps per-core VMEM use modest (<~12 MiB).
    TB_CAP = 1024
    min_tiles = 2 if B >= 256 else 1
    num_tiles = max(min_tiles, pl.cdiv(B, TB_CAP))
    TB = _round_up(pl.cdiv(B, num_tiles), 16)      # bf16-friendly sublane count
    num_tiles = pl.cdiv(B, TB)
    B_pad = num_tiles * TB

    weight_args = []
    weight_specs = []
    for (w, b) in params:
        weight_args += [w, b]
        # Constant index_map: each weight/bias is DMA'd once per core and
        # stays VMEM-resident across batch tiles.
        weight_specs += [pl.BlockSpec(w.shape, lambda i: (0, 0)),
                         pl.BlockSpec(b.shape, lambda i: (0, 0))]

    mm_dims = [w.shape for (w, _) in params[:-1]]
    flops = 2 * B_pad * (sum(int(i) * int(o) for (i, o) in mm_dims)
                         + int(params[-1][0].shape[1]))
    bytes_accessed = (B * D * 2 + B * 4
                      + sum(int(w.size) * w.dtype.itemsize + int(b.size) * 4
                            for (w, b) in params))

    return pl.pallas_call(
        _critic_mlp_kernel,
        out_shape=jax.ShapeDtypeStruct((B, 1), jnp.float32),
        grid_spec=pltpu.PrefetchScalarGridSpec(
            num_scalar_prefetch=0,
            grid=(num_tiles,),
            in_specs=[pl.BlockSpec((TB, D), lambda i: (i, 0))] + weight_specs,
            out_specs=pl.BlockSpec((TB, 1), lambda i: (i, 0)),
        ),
        compiler_params=pltpu.CompilerParams(
            dimension_semantics=("parallel",),
            vmem_limit_bytes=32 * 1024 * 1024,
        ),
        cost_estimate=pl.CostEstimate(
            flops=flops, transcendentals=0, bytes_accessed=bytes_accessed),
    )(x, *weight_args)


# -----------------------------------------------------------------------------
# Parameter construction (PyTorch Linear default init:
# U(-1/sqrt(fan_in), 1/sqrt(fan_in)) for weight and bias), zero-padded to
# lane-aligned widths (multiples of 128; NOT 256 -- same MXU pass count,
# less HBM/VMEM) and cast to bf16 (weights only).  The final 256->1 layer is
# stored as a single bf16 row (1, 256) plus an f32 scalar bias.
# -----------------------------------------------------------------------------
def init_params(key, input_dim):
    layer_dims = [(input_dim, 600), (600, 600), (600, 300), (300, 256), (256, 1)]
    params = []
    prev_out_p = input_dim          # layer-1 input stays unpadded (matches state)
    for li, (fan_in, fan_out) in enumerate(layer_dims):
        key, kw, kb = jax.random.split(key, 3)
        bound = float(1.0 / (fan_in ** 0.5))
        w = jax.random.uniform(kw, (fan_in, fan_out), jnp.float32, -bound, bound)
        b = jax.random.uniform(kb, (fan_out,), jnp.float32, -bound, bound)

        if li == len(layer_dims) - 1:
            # Final 256 -> 1 layer: stored as a row vector for the in-kernel
            # VPU/XLU reduction.
            assert fan_out == 1 and fan_in == prev_out_p
            params.append((w.T.astype(jnp.bfloat16),       # (1, 256) bf16
                           b.reshape(1, 1)))                # (1, 1)   f32
        else:
            in_p = prev_out_p                       # matches previous padded width
            out_p = _round_up(fan_out, 128)         # lane-aligned output width
            w_p = jnp.zeros((in_p, out_p), jnp.float32).at[:fan_in, :fan_out].set(w)
            b_p = jnp.zeros((1, out_p), jnp.float32).at[0, :fan_out].set(b)
            params.append((w_p.astype(jnp.bfloat16), b_p))
            prev_out_p = out_p
    return params


# Pure-JAX reference (same bf16 weights / f32 accumulation) for correctness.
def reference_forward(state, params):
    h = state.astype(jnp.float32)
    for (w, b) in params[:-1]:
        y = jnp.dot(h.astype(w.dtype), w, preferred_element_type=jnp.float32)
        h = jnp.maximum(y + b, 0.0)
    w5, b5 = params[-1]
    y = jnp.sum(h * w5.astype(jnp.float32), axis=-1, keepdims=True) + b5
    return jnp.maximum(y, 0.0)


if __name__ == "__main__":
    key = jax.random.PRNGKey(0)
    k_param, k_x1, k_x2 = jax.random.split(key, 3)

    INPUT_DIM = 32   # input_dims = (32,)
    params = init_params(k_param, INPUT_DIM)

    # Case 1: small batch (single partial batch tile).
    state_small = jax.random.normal(k_x1, (8, INPUT_DIM), jnp.float32)
    out_small = jax.block_until_ready(critic_forward(state_small, params))
    ref_small = reference_forward(state_small, params)
    assert out_small.shape == (8, 1), out_small.shape
    assert jnp.allclose(out_small, ref_small, atol=1e-3, rtol=1e-3)

    # Case 2: larger, awkward batch (2 tiles of 304 rows, partial edge tile).
    state_big = jax.random.normal(k_x2, (600, INPUT_DIM), jnp.float32)
    out_big = jax.block_until_ready(critic_forward(state_big, params))
    ref_big = reference_forward(state_big, params)
    assert out_big.shape == (600, 1), out_big.shape
    assert jnp.allclose(out_big, ref_big, atol=1e-3, rtol=1e-3)

    print("KERNEL_OK")
</pallas_src>

<mosaic_0001>
module attributes {stable_mosaic.version = 11 : i64} {
  func.func @_critic_mlp_kernel(%arg0: i32, %arg1: memref<16x32xbf16, #tpu.memory_space<vmem>>, %arg2: memref<32x640xbf16, #tpu.memory_space<vmem>>, %arg3: memref<1x640xf32, #tpu.memory_space<vmem>>, %arg4: memref<640x640xbf16, #tpu.memory_space<vmem>>, %arg5: memref<1x640xf32, #tpu.memory_space<vmem>>, %arg6: memref<640x384xbf16, #tpu.memory_space<vmem>>, %arg7: memref<1x384xf32, #tpu.memory_space<vmem>>, %arg8: memref<384x256xbf16, #tpu.memory_space<vmem>>, %arg9: memref<1x256xf32, #tpu.memory_space<vmem>>, %arg10: memref<1x256xbf16, #tpu.memory_space<vmem>>, %arg11: memref<1x1xf32, #tpu.memory_space<vmem>>, %arg12: memref<16x1xf32, #tpu.memory_space<vmem>>) attributes {dimension_semantics = [#tpu.dimension_semantics<parallel>], iteration_bounds = array<i64: 1>, scalar_prefetch = 0 : i64, scratch_operands = 0 : i64, tpu.core_type = #tpu.core_type<tc>, window_params = [{transform_indices = @transform_0, window_bounds = array<i64: 16, 32>}, {pipeline_mode = #tpu.pipeline_mode<synchronous>, transform_indices = @transform_1, window_bounds = array<i64: 32, 640>}, {pipeline_mode = #tpu.pipeline_mode<synchronous>, transform_indices = @transform_2, window_bounds = array<i64: 1, 640>}, {pipeline_mode = #tpu.pipeline_mode<synchronous>, transform_indices = @transform_3, window_bounds = array<i64: 640, 640>}, {pipeline_mode = #tpu.pipeline_mode<synchronous>, transform_indices = @transform_4, window_bounds = array<i64: 1, 640>}, {pipeline_mode = #tpu.pipeline_mode<synchronous>, transform_indices = @transform_5, window_bounds = array<i64: 640, 384>}, {pipeline_mode = #tpu.pipeline_mode<synchronous>, transform_indices = @transform_6, window_bounds = array<i64: 1, 384>}, {pipeline_mode = #tpu.pipeline_mode<synchronous>, transform_indices = @transform_7, window_bounds = array<i64: 384, 256>}, {pipeline_mode = #tpu.pipeline_mode<synchronous>, transform_indices = @transform_8, window_bounds = array<i64: 1, 256>}, {pipeline_mode = #tpu.pipeline_mode<synchronous>, transform_indices = @transform_9, window_bounds = array<i64: 1, 256>}, {pipeline_mode = #tpu.pipeline_mode<synchronous>, transform_indices = @transform_10, window_bounds = array<i64: 1, 1>}, {transform_indices = @transform_11, window_bounds = array<i64: 16, 1>}]} {
    %c0 = arith.constant 0 : index
    %c0_0 = arith.constant 0 : index
    %0 = vector.load %arg1[%c0, %c0_0] : memref<16x32xbf16, #tpu.memory_space<vmem>>, vector<16x32xbf16>
    %c0_1 = arith.constant 0 : index
    %c0_2 = arith.constant 0 : index
    %1 = vector.load %arg2[%c0_1, %c0_2] : memref<32x640xbf16, #tpu.memory_space<vmem>>, vector<32x640xbf16>
    %cst = arith.constant dense<0.000000e+00> : vector<16x640xf32>
    %2 = tpu.matmul %0, %1, %cst {dimension_numbers = #tpu.dot_dimension_numbers<[1], [0], [0], [1], [0, 0, 1, 1], [], []>} : vector<16x32xbf16>, vector<32x640xbf16>, vector<16x640xf32> -> vector<16x640xf32>
    %c0_3 = arith.constant 0 : index
    %c0_4 = arith.constant 0 : index
    %3 = vector.load %arg3[%c0_3, %c0_4] : memref<1x640xf32, #tpu.memory_space<vmem>>, vector<1x640xf32>
    %4 = vector.broadcast %3 : vector<1x640xf32> to vector<16x640xf32>
    %5 = arith.addf %2, %4 : vector<16x640xf32>
    %cst_5 = arith.constant 0.000000e+00 : f32
    %6 = vector.broadcast %cst_5 : f32 to vector<16x640xf32>
    %7 = arith.maximumf %5, %6 : vector<16x640xf32>
    %8 = arith.truncf %7 : vector<16x640xf32> to vector<16x640xbf16>
    %c0_6 = arith.constant 0 : index
    %c0_7 = arith.constant 0 : index
    %9 = vector.load %arg4[%c0_6, %c0_7] : memref<640x640xbf16, #tpu.memory_space<vmem>>, vector<640x640xbf16>
    %cst_8 = arith.constant dense<0.000000e+00> : vector<16x640xf32>
    %10 = tpu.matmul %8, %9, %cst_8 {dimension_numbers = #tpu.dot_dimension_numbers<[1], [0], [0], [1], [0, 0, 1, 1], [], []>} : vector<16x640xbf16>, vector<640x640xbf16>, vector<16x640xf32> -> vector<16x640xf32>
    %c0_9 = arith.constant 0 : index
    %c0_10 = arith.constant 0 : index
    %11 = vector.load %arg5[%c0_9, %c0_10] : memref<1x640xf32, #tpu.memory_space<vmem>>, vector<1x640xf32>
    %12 = vector.broadcast %11 : vector<1x640xf32> to vector<16x640xf32>
    %13 = arith.addf %10, %12 : vector<16x640xf32>
    %cst_11 = arith.constant 0.000000e+00 : f32
    %14 = vector.broadcast %cst_11 : f32 to vector<16x640xf32>
    %15 = arith.maximumf %13, %14 : vector<16x640xf32>
    %16 = arith.truncf %15 : vector<16x640xf32> to vector<16x640xbf16>
    %c0_12 = arith.constant 0 : index
    %c0_13 = arith.constant 0 : index
    %17 = vector.load %arg6[%c0_12, %c0_13] : memref<640x384xbf16, #tpu.memory_space<vmem>>, vector<640x384xbf16>
    %cst_14 = arith.constant dense<0.000000e+00> : vector<16x384xf32>
    %18 = tpu.matmul %16, %17, %cst_14 {dimension_numbers = #tpu.dot_dimension_numbers<[1], [0], [0], [1], [0, 0, 1, 1], [], []>} : vector<16x640xbf16>, vector<640x384xbf16>, vector<16x384xf32> -> vector<16x384xf32>
    %c0_15 = arith.constant 0 : index
    %c0_16 = arith.constant 0 : index
    %19 = vector.load %arg7[%c0_15, %c0_16] : memref<1x384xf32, #tpu.memory_space<vmem>>, vector<1x384xf32>
    %20 = vector.broadcast %19 : vector<1x384xf32> to vector<16x384xf32>
    %21 = arith.addf %18, %20 : vector<16x384xf32>
    %cst_17 = arith.constant 0.000000e+00 : f32
    %22 = vector.broadcast %cst_17 : f32 to vector<16x384xf32>
    %23 = arith.maximumf %21, %22 : vector<16x384xf32>
    %24 = arith.truncf %23 : vector<16x384xf32> to vector<16x384xbf16>
    %c0_18 = arith.constant 0 : index
    %c0_19 = arith.constant 0 : index
    %25 = vector.load %arg8[%c0_18, %c0_19] : memref<384x256xbf16, #tpu.memory_space<vmem>>, vector<384x256xbf16>
    %cst_20 = arith.constant dense<0.000000e+00> : vector<16x256xf32>
    %26 = tpu.matmul %24, %25, %cst_20 {dimension_numbers = #tpu.dot_dimension_numbers<[1], [0], [0], [1], [0, 0, 1, 1], [], []>} : vector<16x384xbf16>, vector<384x256xbf16>, vector<16x256xf32> -> vector<16x256xf32>
    %c0_21 = arith.constant 0 : index
    %c0_22 = arith.constant 0 : index
    %27 = vector.load %arg9[%c0_21, %c0_22] : memref<1x256xf32, #tpu.memory_space<vmem>>, vector<1x256xf32>
    %28 = vector.broadcast %27 : vector<1x256xf32> to vector<16x256xf32>
    %29 = arith.addf %26, %28 : vector<16x256xf32>
    %cst_23 = arith.constant 0.000000e+00 : f32
    %30 = vector.broadcast %cst_23 : f32 to vector<16x256xf32>
    %31 = arith.maximumf %29, %30 : vector<16x256xf32>
    %c0_24 = arith.constant 0 : index
    %c0_25 = arith.constant 0 : index
    %32 = vector.load %arg10[%c0_24, %c0_25] : memref<1x256xbf16, #tpu.memory_space<vmem>>, vector<1x256xbf16>
    %33 = arith.extf %32 : vector<1x256xbf16> to vector<1x256xf32>
    %34 = vector.broadcast %33 : vector<1x256xf32> to vector<16x256xf32>
    %35 = arith.mulf %31, %34 : vector<16x256xf32>
    %cst_26 = arith.constant dense<0.000000e+00> : vector<16xf32>
    %36 = vector.multi_reduction <add>, %35, %cst_26 [1] : vector<16x256xf32> to vector<16xf32>
    %37 = vector.shape_cast %36 : vector<16xf32> to vector<16x1xf32>
    %c0_27 = arith.constant 0 : index
    %c0_28 = arith.constant 0 : index
    %38 = vector.load %arg11[%c0_27, %c0_28] : memref<1x1xf32, #tpu.memory_space<vmem>>, vector<1x1xf32>
    %39 = vector.broadcast %38 : vector<1x1xf32> to vector<16x1xf32>
    %40 = arith.addf %37, %39 : vector<16x1xf32>
    %cst_29 = arith.constant 0.000000e+00 : f32
    %41 = vector.broadcast %cst_29 : f32 to vector<16x1xf32>
    %42 = arith.maximumf %40, %41 : vector<16x1xf32>
    %c0_30 = arith.constant 0 : index
    %c0_31 = arith.constant 0 : index
    %43 = vector.load %arg12[%c0_30, %c0_31] : memref<16x1xf32, #tpu.memory_space<vmem>>, vector<16x1xf32>
    tpu.vector_store %arg12[%c0_30, %c0_31], %42 {strides = array<i32>} : memref<16x1xf32, #tpu.memory_space<vmem>>, vector<16x1xf32>,
    return
  }
  func.func @transform_0(%arg0: i32) -> (i32, i32) {
    %c0_i32 = arith.constant 0 : i32
    %c0_i32_0 = arith.constant 0 : i32
    return %arg0, %c0_i32 : i32, i32
  }
  func.func @transform_1(%arg0: i32) -> (i32, i32) {
    %c0_i32 = arith.constant 0 : i32
    %c0_i32_0 = arith.constant 0 : i32
    %c0_i32_1 = arith.constant 0 : i32
    return %c0_i32, %c0_i32_0 : i32, i32
  }
  func.func @transform_2(%arg0: i32) -> (i32, i32) {
    %c0_i32 = arith.constant 0 : i32
    %c0_i32_0 = arith.constant 0 : i32
    %c0_i32_1 = arith.constant 0 : i32
    return %c0_i32, %c0_i32_0 : i32, i32
  }
  func.func @transform_3(%arg0: i32) -> (i32, i32) {
    %c0_i32 = arith.constant 0 : i32
    %c0_i32_0 = arith.constant 0 : i32
    %c0_i32_1 = arith.constant 0 : i32
    return %c0_i32, %c0_i32_0 : i32, i32
  }
  func.func @transform_4(%arg0: i32) -> (i32, i32) {
    %c0_i32 = arith.constant 0 : i32
    %c0_i32_0 = arith.constant 0 : i32
    %c0_i32_1 = arith.constant 0 : i32
    return %c0_i32, %c0_i32_0 : i32, i32
  }
  func.func @transform_5(%arg0: i32) -> (i32, i32) {
    %c0_i32 = arith.constant 0 : i32
    %c0_i32_0 = arith.constant 0 : i32
    %c0_i32_1 = arith.constant 0 : i32
    return %c0_i32, %c0_i32_0 : i32, i32
  }
  func.func @transform_6(%arg0: i32) -> (i32, i32) {
    %c0_i32 = arith.constant 0 : i32
    %c0_i32_0 = arith.constant 0 : i32
    %c0_i32_1 = arith.constant 0 : i32
    return %c0_i32, %c0_i32_0 : i32, i32
  }
  func.func @transform_7(%arg0: i32) -> (i32, i32) {
    %c0_i32 = arith.constant 0 : i32
    %c0_i32_0 = arith.constant 0 : i32
    %c0_i32_1 = arith.constant 0 : i32
    return %c0_i32, %c0_i32_0 : i32, i32
  }
  func.func @transform_8(%arg0: i32) -> (i32, i32) {
    %c0_i32 = arith.constant 0 : i32
    %c0_i32_0 = arith.constant 0 : i32
    %c0_i32_1 = arith.constant 0 : i32
    return %c0_i32, %c0_i32_0 : i32, i32
  }
  func.func @transform_9(%arg0: i32) -> (i32, i32) {
    %c0_i32 = arith.constant 0 : i32
    %c0_i32_0 = arith.constant 0 : i32
    %c0_i32_1 = arith.constant 0 : i32
    return %c0_i32, %c0_i32_0 : i32, i32
  }
  func.func @transform_10(%arg0: i32) -> (i32, i32) {
    %c0_i32 = arith.constant 0 : i32
    %c0_i32_0 = arith.constant 0 : i32
    %c0_i32_1 = arith.constant 0 : i32
    return %c0_i32, %c0_i32_0 : i32, i32
  }
  func.func @transform_11(%arg0: i32) -> (i32, i32) {
    %c0_i32 = arith.constant 0 : i32
    %c0_i32_0 = arith.constant 0 : i32
    return %arg0, %c0_i32 : i32, i32
  }
}

</mosaic_0001>

<bundles_post_ra>
// kernel: critic_forward.1
= control target key start
LH: loop header
LB: loop body
LE: loop exit
PB: predicated region body
PF: predicated region fallthrough
CT: control target
= control target key end

     0   :  { %s5645_s0 = inlined_call_operand.vmem [shape: bf16[8,32], index: 0, kind: input, shape index: {}]   ;;  %s5646_s1 = inlined_call_operand.hbm [shape: bf16[32,640], index: 1, kind: input, shape index: {}]   ;;  %s5647_s2 = inlined_call_operand.vmem [shape: f32[1,640], index: 2, kind: input, shape index: {}]   ;;  %s5648_s3 = inlined_call_operand.hbm [shape: bf16[640,640], index: 3, kind: input, shape index: {}]   ;;  %s5649_s4 = inlined_call_operand.vmem [shape: f32[1,640], index: 4, kind: input, shape index: {}]   ;;  %s5650_s5 = inlined_call_operand.hbm [shape: bf16[640,384], index: 5, kind: input, shape index: {}]   ;;  %s5651_s6 = inlined_call_operand.vmem [shape: f32[1,384], index: 6, kind: input, shape index: {}]   ;;  %s5652_s7 = inlined_call_operand.hbm [shape: bf16[384,256], index: 7, kind: input, shape index: {}]   ;;  %s5653_s8 = inlined_call_operand.vmem [shape: f32[1,256], index: 8, kind: input, shape index: {}]   ;;  %s5654_s9 = inlined_call_operand.vmem [shape: bf16[1,256], index: 9, kind: input, shape index: {}]   ;;  %s5655_s10 = inlined_call_operand.<no memory space> [shape: f32[1,1], index: 10, kind: input, shape index: {}]   ;;  %s5656_s11 = inlined_call_operand.vmem [shape: f32[8,1], index: 11, kind: output, shape index: {}]  }
   0x1   :  { %v16_v0 = vstv %s5655_s10 }
   0x2   :  { %17 = vst [vmem:[#allocation2] sm:$0x1] %v16_v0 }
   0x3   :  { %18 = vsyncpa [#allocation4], 0 }
   0x4   :  { %19 = vsyncpa [#allocation6], 0 }
   0x5   :  { %20 = vsyncpa [#allocation9], 0  ;;  %s42_s21 = sshll.u32 %s5648_s3, 4  ;;  %s5429_s22 = smov [#allocation5]   ;;  %s43_s21 = int_to_ptr.hbm [resolvable:$true] %s42_s21 }
   0x6   :  { %s44_s23 = sshll.u32 %s5429_s22, 4  ;;  %s27_s26 = sshll.u32 %s5646_s1, 4  ;;  %s45_s23 = int_to_ptr.vmem [resolvable:$true] %s44_s23  ;;  %s28_s26 = int_to_ptr.hbm [resolvable:$true] %s27_s26 }
   0x7   :  { %s5430_s27 = smov 320   ;;  %s5431_s28 = smov 20  }
   0x8   :  { %50 = dma.hbm_to_vmem [thread:$0]  %s43_s21, 25600, %s45_s23, [#allocation6], %s5430_s27, %s5430_s27, %s5431_s28  }
   0x9   :  { %s5432_s10 = smov [#allocation3]   ;;  %s57_s13 = sshll.u32 %s5650_s5, 4  ;;  %s58_s13 = int_to_ptr.hbm [resolvable:$true] %s57_s13 }
   0xa   :  { %s29_s29 = sshll.u32 %s5432_s10, 4  ;;  %s5433_s3 = smov [#allocation7]   ;;  %s30_s29 = int_to_ptr.vmem [resolvable:$true] %s29_s29 }
   0xb   :  { %35 = dma.hbm_to_vmem [thread:$0]  %s28_s26, 1280, %s30_s29, [#allocation4], %s5430_s27, %s5430_s27, %s5431_s28  }
   0xc   :  { %s59_s14 = sshll.u32 %s5433_s3, 4  ;;  %s72_s1 = sshll.u32 %s5652_s7, 4  ;;  %s60_s14 = int_to_ptr.vmem [resolvable:$true] %s59_s14  ;;  %s73_s1 = int_to_ptr.hbm [resolvable:$true] %s72_s1 }
   0xd   :  { %s5434_s17 = smov 192   ;;  %s5435_s18 = smov 12  }
   0xe   :  { %65 = dma.hbm_to_vmem [thread:$0]  %s58_s13, 15360, %s60_s14, [#allocation6], %s5434_s17, %s5434_s17, %s5435_s18  }
   0xf   :  { %s5436_s19 = smov [#allocation8]   ;;  %s5437_s21 = smov 128  }
  0x10   :  { %s74_s20 = sshll.u32 %s5436_s19, 4  ;;  %s5438_s22 = smov 8   ;;  %s75_s20 = int_to_ptr.vmem [resolvable:$true] %s74_s20 }
  0x11   :  { %80 = dma.hbm_to_vmem [thread:$0]  %s73_s1, 6144, %s75_s20, [#allocation9], %s5437_s21, %s5437_s21, %s5438_s22  }
  0x12   :  { %5423 = dma.done.wait [#allocation4], 1280  }
  0x13   :  { %5424 = vsyncadd [#allocation4], 4294966016 }
  0x14   :  { %5425 = dma.done.wait [#allocation6], 40960  }
  0x15   :  { %5426 = vsyncadd [#allocation6], 4294926336 }
  0x16   :  { %5427 = dma.done.wait [#allocation9], 6144  }
  0x17   :  { %5428 = vsyncadd [#allocation9], 4294961152  ;;  %v3442_v1 = vld [vmem:[#allocation3 + $0x28] sm:$0xf]  ;;  %v4945_v2 = vld [vmem:[#allocation3 + $0x38] sm:$0xf0] }
  0x18   :  { %v4943_v3 = vld [vmem:[#allocation3 + $0x2c] sm:$0xf]  ;;  %v3443_v4 = vor.u32 %v4945_v2, %v3442_v1  ;;  %v3444_v5 = vld [vmem:[#allocation3 + $0x3c] sm:$0xf0]  ;;  %v3450_v6 = vld [vmem:[#allocation3 + $0x30] sm:$0xf] }
  0x19   :  { %v4946_v7 = vld [vmem:[#allocation3 + $0x40] sm:$0xf0]  ;;  %v3447_v8 = vor.u32 %v4943_v3, %v3444_v5  ;;  %v3422_v10 = vld [vmem:[#allocation3] sm:$0xf]  ;;  %v4940_v11 = vld [vmem:[#allocation3 + $0x10] sm:$0xf0] }
  0x1a   :  { %v3451_v9 = vor.u32 %v4946_v7, %v3450_v6  ;;  %v4938_v12 = vld [vmem:[#allocation3 + $0x4] sm:$0xf]  ;;  %197 = vmatpush.bf16.msra.mxu0 %v3443_v4  ;;  %v3423_v13 = vor.u32 %v4940_v11, %v3422_v10  ;;  %v3424_v14 = vld [vmem:[#allocation3 + $0x14] sm:$0xf0]  ;;  %v3430_v15 = vld [vmem:[#allocation3 + $0x8] sm:$0xf] }
  0x1b   :  { %v4941_v16 = vld [vmem:[#allocation3 + $0x18] sm:$0xf0]  ;;  %211 = vmatpush.bf16.msra.mxu3 %v3447_v8  ;;  %v3427_v17 = vor.u32 %v4938_v12, %v3424_v14  ;;  %vm187_vm0 = vcmask 261120   ;;  %v4944_v20 = vld [vmem:[#allocation3 + $0x34] sm:$0xf]  ;;  %vm3369_vm1 = vcmask 7168  }
  0x1c   :  { %225 = vmatpush.bf16.msra.mxu2 %v3451_v9  ;;  %v3431_v18 = vor.u32 %v4941_v16, %v3430_v15  ;;  %v5517_v19 = vld [vmem:[%s5645_s0] sm:$0xff]  ;;  %v3452_v21 = vld [vmem:[#allocation3 + $0x44] sm:$0xf0]  ;;  %v3458_v23 = vld [vmem:[#allocation3 + $0x38] sm:$0xf] }
  0x1d   :  { %v3455_v22 = vor.u32 %v4944_v20, %v3452_v21  ;;  %v4947_v24 = vld [vmem:[#allocation3 + $0x48] sm:$0xf0]  ;;  %v3432_v27 = vld [vmem:[#allocation3 + $0x1c] sm:$0xf0]  ;;  %v3438_v28 = vld [vmem:[#allocation3 + $0x10] sm:$0xf] }
  0x1e   :  { %v4939_v25 = vld [vmem:[#allocation3 + $0xc] sm:$0xf]  ;;  %v3459_v26 = vor.u32 %v4947_v24, %v3458_v23  ;;  %v4942_v29 = vld [vmem:[#allocation3 + $0x20] sm:$0xf0]  ;;  %198 = vmatpush.bf16.msra.mxu0 %v3423_v13  ;;  %v3607_v30 = vld [vmem:[#allocation5 + $0x118] sm:$0xf] }
  0x1f   :  { %v4985_v31 = vld [vmem:[#allocation5 + $0x128] sm:$0xf0]  ;;  %v3587_v32 = vld [vmem:[#allocation5 + $0xf0] sm:$0xf]  ;;  %212 = vmatpush.bf16.msra.mxu3 %v3427_v17  ;;  %v4980_v34 = vld [vmem:[#allocation5 + $0x100] sm:$0xf0]  ;;  %v3435_v37 = vor.u32 %v4939_v25, %v3432_v27  ;;  %v3439_v38 = vor.u32 %v4942_v29, %v3438_v28 }
  0x20   :  { %226 = vmatpush.bf16.msra.mxu2 %v3431_v18  ;;  %v3608_v33 = vor.u32 %v4985_v31, %v3607_v30  ;;  %v3767_v35 = vld [vmem:[#allocation5 + $0x258] sm:$0xf]  ;;  %v5025_v36 = vld [vmem:[#allocation5 + $0x268] sm:$0xf0]  ;;  %v3588_v42 = vor.u32 %v4980_v34, %v3587_v32  ;;  %v3567_v44 = vld [vmem:[#allocation5 + $0xc8] sm:$0xf] }
  0x21   :  { %v3768_v39 = vor.u32 %v5025_v36, %v3767_v35  ;;  %v3927_v40 = vld [vmem:[#allocation5 + $0x398] sm:$0xf]  ;;  %v5065_v41 = vld [vmem:[#allocation5 + $0x3a8] sm:$0xf0]  ;;  %3460 = vmatmul.msk.bf16.vlgmr.msra.gmra.mxu0 %vm187_vm0, %v5517_v19  ;;  %v3747_v45 = vld [vmem:[#allocation5 + $0x230] sm:$0xf] }
  0x22   :  { %253 = vmatpush.bf16.msrb.mxu0 %v3459_v26  ;;  %1568 = vmatpush.bf16.msra.mxu1 %v3608_v33  ;;  %v3928_v43 = vor.u32 %v5065_v41, %v3927_v40  ;;  %v5020_v46 = vld [vmem:[#allocation5 + $0x240] sm:$0xf0]  ;;  %v4975_v47 = vld [vmem:[#allocation5 + $0xd8] sm:$0xf0]  ;;  %v3907_v48 = vld [vmem:[#allocation5 + $0x370] sm:$0xf] }
  0x23   :  { %239 = vmatpush.bf16.msrb.mxu3 %v3455_v22  ;;  %3462 = vmatmul.msk.bf16.vlgmr.msra.gmra.mxu2 %vm187_vm0, %v5517_v19  ;;  %v5060_v49 = vld [vmem:[#allocation5 + $0x380] sm:$0xf0]  ;;  %v3748_v50 = vor.u32 %v5020_v46, %v3747_v45  ;;  %v3727_v51 = vld [vmem:[#allocation5 + $0x208] sm:$0xf]  ;;  %v5015_v52 = vld [vmem:[#allocation5 + $0x218] sm:$0xf0]  ;;  %v3568_v53 = vor.u32 %v4975_v47, %v3567_v44 }
  0x24   :  { %3461 = vmatmul.msk.bf16.vlgmr.msra.gmra.mxu3 %vm187_vm0, %v5517_v19  ;;  %1582 = vmatpush.bf16.msrb.mxu2 %v3768_v39  ;;  %v3908_v54 = vor.u32 %v5060_v49, %v3907_v48  ;;  %v3547_v55 = vld [vmem:[#allocation5 + $0xa0] sm:$0xf]  ;;  %v4970_v56 = vld [vmem:[#allocation5 + $0xb0] sm:$0xf0]  ;;  %v3887_v57 = vld [vmem:[#allocation5 + $0x348] sm:$0xf]  ;;  %v3728_v59 = vor.u32 %v5015_v52, %v3727_v51 }
  0x25   :  { %v5055_v58 = vld [vmem:[#allocation5 + $0x358] sm:$0xf0]  ;;  %v3707_v60 = vld [vmem:[#allocation5 + $0x1e0] sm:$0xf]  ;;  %v5010_v61 = vld [vmem:[#allocation5 + $0x1f0] sm:$0xf0]  ;;  %v3548_v63 = vor.u32 %v4970_v56, %v3547_v55 }
  0x26   :  { %254 = vmatpush.bf16.msrb.mxu0 %v3439_v38  ;;  %1569 = vmatpush.bf16.msra.mxu1 %v3588_v42  ;;  %v4087_v62 = vld [vmem:[#allocation5 + $0x4d8] sm:$0xf]  ;;  %v3888_v0 = vor.u32 %v5055_v58, %v3887_v57  ;;  %v5105_v1 = vld [vmem:[#allocation5 + $0x4e8] sm:$0xf0]  ;;  %v3708_v5 = vor.u32 %v5010_v61, %v3707_v60  ;;  %v3867_v6 = vld [vmem:[#allocation5 + $0x320] sm:$0xf] }
  0x27   :  { %240 = vmatpush.bf16.msrb.mxu3 %v3435_v37  ;;  %v3527_v2 = vld [vmem:[#allocation5 + $0x78] sm:$0xf]  ;;  %v4965_v3 = vld [vmem:[#allocation5 + $0x88] sm:$0xf0]  ;;  %v4088_v4 = vor.u32 %v5105_v1, %v4087_v62  ;;  %v4067_v7 = vld [vmem:[#allocation5 + $0x4b0] sm:$0xf] }
  0x28   :  { %1583 = vmatpush.bf16.msrb.mxu2 %v3748_v50  ;;  %v5100_v8 = vld [vmem:[#allocation5 + $0x4c0] sm:$0xf0]  ;;  %v5050_v9 = vld [vmem:[#allocation5 + $0x330] sm:$0xf0]  ;;  %v3687_v10 = vld [vmem:[#allocation5 + $0x1b8] sm:$0xf]  ;;  %v3528_v13 = vor.u32 %v4965_v3, %v3527_v2 }
  0x29   :  { %v5005_v11 = vld [vmem:[#allocation5 + $0x1c8] sm:$0xf0]  ;;  %v4068_v12 = vor.u32 %v5100_v8, %v4067_v7  ;;  %v3507_v14 = vld [vmem:[#allocation5 + $0x50] sm:$0xf]  ;;  %v4960_v15 = vld [vmem:[#allocation5 + $0x60] sm:$0xf0]  ;;  %v3868_v17 = vor.u32 %v5050_v9, %v3867_v6 }
  0x2a   :  { %1570 = vmatpush.bf16.msra.mxu1 %v3568_v53  ;;  %1610 = vmatpush.bf16.msra.mxu0 %v4088_v4  ;;  %v4047_v16 = vld [vmem:[#allocation5 + $0x488] sm:$0xf]  ;;  %v3688_v18 = vor.u32 %v5005_v11, %v3687_v10  ;;  %v3847_v20 = vld [vmem:[#allocation5 + $0x2f8] sm:$0xf]  ;;  %v5095_v21 = vld [vmem:[#allocation5 + $0x498] sm:$0xf0]  ;;  %v3508_v26 = vor.u32 %v4960_v15, %v3507_v14 }
  0x2b   :  { %1596 = vmatpush.bf16.msra.mxu3 %v3928_v43  ;;  %v5045_v22 = vld [vmem:[#allocation5 + $0x308] sm:$0xf0]  ;;  %v3667_v23 = vld [vmem:[#allocation5 + $0x190] sm:$0xf]  ;;  %v5000_v24 = vld [vmem:[#allocation5 + $0x1a0] sm:$0xf0]  ;;  %v4048_v25 = vor.u32 %v5095_v21, %v4047_v16 }
  0x2c   :  { %1584 = vmatpush.bf16.msrb.mxu2 %v3728_v59  ;;  %v4027_v27 = vld [vmem:[#allocation5 + $0x460] sm:$0xf]  ;;  %v5090_v28 = vld [vmem:[#allocation5 + $0x470] sm:$0xf0]  ;;  %v3487_v29 = vld [vmem:[#allocation5 + $0x28] sm:$0xf]  ;;  %v3848_v31 = vor.u32 %v5045_v22, %v3847_v20  ;;  %v3668_v32 = vor.u32 %v5000_v24, %v3667_v23 }
  0x2d   :  { %v4955_v30 = vld [vmem:[#allocation5 + $0x38] sm:$0xf0]  ;;  %v3827_v33 = vld [vmem:[#allocation5 + $0x2d0] sm:$0xf]  ;;  %v5040_v34 = vld [vmem:[#allocation5 + $0x2e0] sm:$0xf0]  ;;  %v4028_v37 = vor.u32 %v5090_v28, %v4027_v27 }
  0x2e   :  { %1571 = vmatpush.bf16.msra.mxu1 %v3548_v63  ;;  %1611 = vmatpush.bf16.msra.mxu0 %v4068_v12  ;;  %v3647_v35 = vld [vmem:[#allocation5 + $0x168] sm:$0xf]  ;;  %v4995_v36 = vld [vmem:[#allocation5 + $0x178] sm:$0xf0]  ;;  %v3488_v38 = vor.u32 %v4955_v30, %v3487_v29  ;;  %v3467_v39 = vld [vmem:[#allocation5] sm:$0xf]  ;;  %v3828_v44 = vor.u32 %v5040_v34, %v3827_v33 }
  0x2f   :  { %1597 = vmatpush.bf16.msra.mxu3 %v3908_v54  ;;  %v4007_v40 = vld [vmem:[#allocation5 + $0x438] sm:$0xf]  ;;  %v5085_v41 = vld [vmem:[#allocation5 + $0x448] sm:$0xf0]  ;;  %v4950_v42 = vld [vmem:[#allocation5 + $0x10] sm:$0xf0]  ;;  %v3648_v45 = vor.u32 %v4995_v36, %v3647_v35 }
  0x30   :  { %1585 = vmatpush.bf16.msrb.mxu2 %v3708_v5  ;;  %v4247_v43 = vld [vmem:[#allocation5 + $0x618] sm:$0xf]  ;;  %v3807_v46 = vld [vmem:[#allocation5 + $0x2a8] sm:$0xf]  ;;  %v5035_v47 = vld [vmem:[#allocation5 + $0x2b8] sm:$0xf0]  ;;  %v4008_v51 = vor.u32 %v5085_v41, %v4007_v40  ;;  %v3468_v52 = vor.u32 %v4950_v42, %v3467_v39 }
  0x31   :  { %3464 = vmatmul.msk.bf16.vlgmr.msrb.gmra.mxu0 %vm187_vm0, %v5517_v19  ;;  %v3627_v48 = vld [vmem:[#allocation5 + $0x140] sm:$0xf]  ;;  %v4990_v49 = vld [vmem:[#allocation5 + $0x150] sm:$0xf0]  ;;  %v4983_v50 = vld [vmem:[#allocation5 + $0x11c] sm:$0xf]  ;;  %v3808_v57 = vor.u32 %v5035_v47, %v3807_v46 }
  0x32   :  { %1572 = vmatpush.bf16.msra.mxu1 %v3528_v13  ;;  %1612 = vmatpush.bf16.msra.mxu0 %v4048_v25  ;;  %v3609_v53 = vld [vmem:[#allocation5 + $0x12c] sm:$0xf0]  ;;  %v5080_v55 = vld [vmem:[#allocation5 + $0x420] sm:$0xf0]  ;;  %v3628_v60 = vor.u32 %v4990_v49, %v3627_v48  ;;  %v3787_v61 = vld [vmem:[#allocation5 + $0x280] sm:$0xf] }
  0x33   :  { %1598 = vmatpush.bf16.msra.mxu3 %v3888_v0  ;;  %v3987_v54 = vld [vmem:[#allocation5 + $0x410] sm:$0xf]  ;;  %v5140_v59 = vld [vmem:[#allocation5 + $0x600] sm:$0xf0]  ;;  %v5030_v62 = vld [vmem:[#allocation5 + $0x290] sm:$0xf0]  ;;  %v3612_v63 = vor.u32 %v4983_v50, %v3609_v53 }
  0x34   :  { %3463 = vmatmul.msk.bf16.vlgmr.msrb.gmra.mxu3 %vm187_vm0, %v5517_v19  ;;  %1586 = vmatpush.bf16.msrb.mxu2 %v3688_v18  ;;  %v5145_v19 = vld [vmem:[#allocation5 + $0x628] sm:$0xf0]  ;;  %v4227_v58 = vld [vmem:[#allocation5 + $0x5f0] sm:$0xf]  ;;  %v5023_v0 = vld [vmem:[#allocation5 + $0x25c] sm:$0xf]  ;;  %v3988_v1 = vor.u32 %v5080_v55, %v3987_v54  ;;  %v3788_v6 = vor.u32 %v5030_v62, %v3787_v61 }
  0x35   :  { %v4248_v56 = vor.u32 %v5145_v19, %v4247_v43  ;;  %v3769_v2 = vld [vmem:[#allocation5 + $0x26c] sm:$0xf0]  ;;  %v4978_v3 = vld [vmem:[#allocation5 + $0xf4] sm:$0xf]  ;;  %v3589_v4 = vld [vmem:[#allocation5 + $0x104] sm:$0xf0]  ;;  %v4228_v5 = vor.u32 %v5140_v59, %v4227_v58 }
  0x36   :  { %1573 = vmatpush.bf16.msra.mxu1 %v3508_v26  ;;  %1613 = vmatpush.bf16.msra.mxu0 %v4028_v37  ;;  %v4207_v7 = vld [vmem:[#allocation5 + $0x5c8] sm:$0xf]  ;;  %v5135_v8 = vld [vmem:[#allocation5 + $0x5d8] sm:$0xf0]  ;;  %v3772_v9 = vor.u32 %v5023_v0, %v3769_v2  ;;  %v3592_v10 = vor.u32 %v4978_v3, %v3589_v4  ;;  %v5018_v11 = vld [vmem:[#allocation5 + $0x234] sm:$0xf] }
  0x37   :  { %1599 = vmatpush.bf16.msra.mxu3 %v3868_v17  ;;  %v3749_v12 = vld [vmem:[#allocation5 + $0x244] sm:$0xf0]  ;;  %v4208_v13 = vor.u32 %v5135_v8, %v4207_v7  ;;  %v4187_v14 = vld [vmem:[#allocation5 + $0x5a0] sm:$0xf]  ;;  %v5130_v15 = vld [vmem:[#allocation5 + $0x5b0] sm:$0xf0] }
  0x38   :  { %1587 = vmatpush.bf16.msrb.mxu2 %v3668_v32  ;;  %v3752_v16 = vor.u32 %v5018_v11, %v3749_v12  ;;  %v4188_v17 = vor.u32 %v5130_v15, %v4187_v14  ;;  %v4973_v18 = vld [vmem:[#allocation5 + $0xcc] sm:$0xf]  ;;  %v3569_v20 = vld [vmem:[#allocation5 + $0xdc] sm:$0xf0]  ;;  %v4167_v25 = vld [vmem:[#allocation5 + $0x578] sm:$0xf] }
  0x39   :  { %v5013_v21 = vld [vmem:[#allocation5 + $0x20c] sm:$0xf]  ;;  %v3572_v22 = vor.u32 %v4973_v18, %v3569_v20  ;;  %v3729_v23 = vld [vmem:[#allocation5 + $0x21c] sm:$0xf0]  ;;  %v3967_v28 = vld [vmem:[#allocation5 + $0x3e8] sm:$0xf] }
  0x3a   :  { %1574 = vmatpush.bf16.msra.mxu1 %v3488_v38  ;;  %1614 = vmatpush.bf16.msra.mxu0 %v4008_v51  ;;  %v3732_v24 = vor.u32 %v5013_v21, %v3729_v23  ;;  %v5125_v26 = vld [vmem:[#allocation5 + $0x588] sm:$0xf0]  ;;  %v5075_v29 = vld [vmem:[#allocation5 + $0x3f8] sm:$0xf0]  ;;  %v3549_v32 = vld [vmem:[#allocation5 + $0xb4] sm:$0xf0] }
  0x3b   :  { %1600 = vmatpush.bf16.msra.mxu3 %v3848_v31  ;;  %v4168_v27 = vor.u32 %v5125_v26, %v4167_v25  ;;  %v3968_v30 = vor.u32 %v5075_v29, %v3967_v28  ;;  %v4968_v31 = vld [vmem:[#allocation5 + $0xa4] sm:$0xf]  ;;  %v3709_v35 = vld [vmem:[#allocation5 + $0x1f4] sm:$0xf0]  ;;  %v4147_v37 = vld [vmem:[#allocation5 + $0x550] sm:$0xf] }
  0x3c   :  { %1588 = vmatpush.bf16.msrb.mxu2 %v3648_v45  ;;  %v5008_v33 = vld [vmem:[#allocation5 + $0x1e4] sm:$0xf]  ;;  %v3552_v34 = vor.u32 %v4968_v31, %v3549_v32  ;;  %v3947_v40 = vld [vmem:[#allocation5 + $0x3c0] sm:$0xf]  ;;  %v5070_v41 = vld [vmem:[#allocation5 + $0x3d0] sm:$0xf0] }
  0x3d   :  { %v3712_v36 = vor.u32 %v5008_v33, %v3709_v35  ;;  %v5120_v38 = vld [vmem:[#allocation5 + $0x560] sm:$0xf0]  ;;  %v3948_v42 = vor.u32 %v5070_v41, %v3947_v40  ;;  %v4963_v43 = vld [vmem:[#allocation5 + $0x7c] sm:$0xf]  ;;  %v3529_v19 = vld [vmem:[#allocation5 + $0x8c] sm:$0xf0] }
  0x3e   :  { %1575 = vmatpush.bf16.msra.mxu1 %v3468_v52  ;;  %1615 = vmatpush.bf16.msra.mxu0 %v3988_v1  ;;  %v4148_v39 = vor.u32 %v5120_v38, %v4147_v37  ;;  %v3532_v45 = vor.u32 %v4963_v43, %v3529_v19  ;;  %v3689_v46 = vld [vmem:[#allocation5 + $0x1cc] sm:$0xf0]  ;;  %v5063_v47 = vld [vmem:[#allocation5 + $0x39c] sm:$0xf]  ;;  %v4127_v51 = vld [vmem:[#allocation5 + $0x528] sm:$0xf] }
  0x3f   :  { %1601 = vmatpush.bf16.msra.mxu3 %v3828_v44  ;;  %v5003_v44 = vld [vmem:[#allocation5 + $0x1bc] sm:$0xf]  ;;  %v3929_v48 = vld [vmem:[#allocation5 + $0x3ac] sm:$0xf0]  ;;  %v4958_v54 = vld [vmem:[#allocation5 + $0x54] sm:$0xf] }
  0x40   :  { %1589 = vmatpush.bf16.msrb.mxu2 %v3628_v60  ;;  %v3692_v49 = vor.u32 %v5003_v44, %v3689_v46  ;;  %v3932_v50 = vor.u32 %v5063_v47, %v3929_v48  ;;  %v5115_v52 = vld [vmem:[#allocation5 + $0x538] sm:$0xf0]  ;;  %v3509_v55 = vld [vmem:[#allocation5 + $0x64] sm:$0xf0]  ;;  %v5058_v59 = vld [vmem:[#allocation5 + $0x374] sm:$0xf] }
  0x41   :  { %v4128_v53 = vor.u32 %v5115_v52, %v4127_v51  ;;  %v3669_v58 = vld [vmem:[#allocation5 + $0x1a4] sm:$0xf0]  ;;  %v4107_v62 = vld [vmem:[#allocation5 + $0x500] sm:$0xf]  ;;  %v4953_v2 = vld [vmem:[#allocation5 + $0x2c] sm:$0xf] }
  0x42   :  { %1624 = vmatpush.bf16.msrb.mxu1 %v4248_v56  ;;  %1616 = vmatpush.bf16.msra.mxu0 %v3968_v30  ;;  %v3512_v56 = vor.u32 %v4958_v54, %v3509_v55  ;;  %v3909_v61 = vld [vmem:[#allocation5 + $0x384] sm:$0xf0]  ;;  %v3489_v3 = vld [vmem:[#allocation5 + $0x3c] sm:$0xf0]  ;;  %v4993_v4 = vld [vmem:[#allocation5 + $0x16c] sm:$0xf] }
  0x43   :  { %1602 = vmatpush.bf16.msra.mxu3 %v3808_v57  ;;  %v4998_v57 = vld [vmem:[#allocation5 + $0x194] sm:$0xf]  ;;  %v3912_v0 = vor.u32 %v5058_v59, %v3909_v61  ;;  %v5053_v7 = vld [vmem:[#allocation5 + $0x34c] sm:$0xf]  ;;  %v3889_v8 = vld [vmem:[#allocation5 + $0x35c] sm:$0xf0] }
  0x44   :  { %1638 = vmatpush.bf16.msra.mxu2 %v3612_v63  ;;  %v3672_v60 = vor.u32 %v4998_v57, %v3669_v58  ;;  %v5110_v63 = vld [vmem:[#allocation5 + $0x510] sm:$0xf0]  ;;  %v4948_v11 = vld [vmem:[#allocation5 + $0x4] sm:$0xf]  ;;  %v3469_v12 = vld [vmem:[#allocation5 + $0x14] sm:$0xf0] }
  0x45   :  { %v4108_v1 = vor.u32 %v5110_v63, %v4107_v62  ;;  %v3472_v14 = vor.u32 %v4948_v11, %v3469_v12  ;;  %v3629_v15 = vld [vmem:[#allocation5 + $0x154] sm:$0xf0]  ;;  %v5043_v21 = vld [vmem:[#allocation5 + $0x2fc] sm:$0xf]  ;;  %v3829_v25 = vld [vmem:[#allocation5 + $0x2e4] sm:$0xf0] }
  0x46   :  { %1625 = vmatpush.bf16.msrb.mxu1 %v4228_v5  ;;  %1617 = vmatpush.bf16.msra.mxu0 %v3948_v42  ;;  %v3492_v5 = vor.u32 %v4953_v2, %v3489_v3  ;;  %v3809_v28 = vld [vmem:[#allocation5 + $0x2bc] sm:$0xf0]  ;;  %v5532_v29 = vld [vmem:[%s5647_s2] sm:$0x1f]  ;;  %v5028_v33 = vld [vmem:[#allocation5 + $0x284] sm:$0xf] }
  0x47   :  { %1603 = vmatpush.bf16.msra.mxu3 %v3788_v6  ;;  %v3649_v6 = vld [vmem:[#allocation5 + $0x17c] sm:$0xf0]  ;;  %v120_v32 = vperm.slane %v5532_v29, 0  ;;  %v5103_v42 = vld [vmem:[#allocation5 + $0x4dc] sm:$0xf]  ;;  %v121_v19 = vperm.slane %v5532_v29, 1 }
  0x48   :  { %1639 = vmatpush.bf16.msra.mxu2 %v3592_v10  ;;  %v3892_v10 = vor.u32 %v5053_v7, %v3889_v8  ;;  %v4089_v43 = vld [vmem:[#allocation5 + $0x4ec] sm:$0xf0]  ;;  %v5143_v54 = vld [vmem:[#allocation5 + $0x61c] sm:$0xf]  ;;  %v3615_v61 = vld [vmem:[#allocation5 + $0x120] sm:$0xf] }
  0x49   :  { %v4092_v47 = vor.u32 %v5103_v42, %v4089_v43  ;;  %v4249_v55 = vld [vmem:[#allocation5 + $0x62c] sm:$0xf0]  ;;  %v4986_v62 = vld [vmem:[#allocation5 + $0x130] sm:$0xf0]  ;;  %v124_v63 = vperm.slane %v5532_v29, 4 }
  0x4a   :  { %1626 = vmatpush.bf16.msrb.mxu1 %v4208_v13  ;;  %1666 = vmatpush.bf16.msrb.mxu0 %v3932_v50  ;;  %v4988_v13 = vld [vmem:[#allocation5 + $0x144] sm:$0xf]  ;;  %v4069_v50 = vld [vmem:[#allocation5 + $0x4c4] sm:$0xf0]  ;;  %v5138_v7 = vld [vmem:[#allocation5 + $0x5f4] sm:$0xf] }
  0x4b   :  { %1652 = vmatpush.bf16.msrb.mxu3 %v3772_v9  ;;  %v3652_v9 = vor.u32 %v4993_v4, %v3649_v6  ;;  %v3632_v18 = vor.u32 %v4988_v13, %v3629_v15  ;;  %v3616_v6 = vor.u32 %v4986_v62, %v3615_v61  ;;  %v4229_v11 = vld [vmem:[#allocation5 + $0x604] sm:$0xf0]  ;;  %v3595_v12 = vld [vmem:[#allocation5 + $0xf8] sm:$0xf]  ;;  %v4981_v13 = vld [vmem:[#allocation5 + $0x108] sm:$0xf0] }
  0x4c   :  { %1640 = vmatpush.bf16.msra.mxu2 %v3572_v22  ;;  %v3849_v22 = vld [vmem:[#allocation5 + $0x30c] sm:$0xf0]  ;;  %v5088_v15 = vld [vmem:[#allocation5 + $0x464] sm:$0xf]  ;;  %v5078_v43 = vld [vmem:[#allocation5 + $0x414] sm:$0xf] }
  0x4d   :  { %v3852_v23 = vor.u32 %v5043_v21, %v3849_v22  ;;  %v5133_v21 = vld [vmem:[#allocation5 + $0x5cc] sm:$0xf] }
  0x4e   :  { %1627 = vmatpush.bf16.msrb.mxu1 %v4188_v17  ;;  %1667 = vmatpush.bf16.msrb.mxu0 %v3912_v0  ;;  %v3869_v17 = vld [vmem:[#allocation5 + $0x334] sm:$0xf0]  ;;  %v5093_v0 = vld [vmem:[#allocation5 + $0x48c] sm:$0xf] }
  0x4f   :  { %1653 = vmatpush.bf16.msrb.mxu3 %v3752_v16  ;;  %v5048_v16 = vld [vmem:[#allocation5 + $0x324] sm:$0xf] }
  0x50   :  { %1641 = vmatpush.bf16.msra.mxu2 %v3552_v34  ;;  %v3872_v20 = vor.u32 %v5048_v16, %v3869_v17  ;;  %v3789_v34 = vld [vmem:[#allocation5 + $0x294] sm:$0xf0] }
  0x51   :  { %v3792_v35 = vor.u32 %v5028_v33, %v3789_v34  ;;  %v4029_v16 = vld [vmem:[#allocation5 + $0x474] sm:$0xf0] }
  0x52   :  { %1628 = vmatpush.bf16.msrb.mxu1 %v4168_v27  ;;  %1668 = vmatpush.bf16.msrb.mxu0 %v3892_v10  ;;  %v5033_v27 = vld [vmem:[#allocation5 + $0x2ac] sm:$0xf] }
  0x53   :  { %1654 = vmatpush.bf16.msrb.mxu3 %v3732_v24  ;;  %v5038_v24 = vld [vmem:[#allocation5 + $0x2d4] sm:$0xf]  ;;  %v3812_v31 = vor.u32 %v5033_v27, %v3809_v28 }
  0x54   :  { %1642 = vmatpush.bf16.msra.mxu2 %v3532_v45  ;;  %v3832_v26 = vor.u32 %v5038_v24, %v3829_v25  ;;  %v4209_v24 = vld [vmem:[#allocation5 + $0x5dc] sm:$0xf0]  ;;  %v3575_v25 = vld [vmem:[#allocation5 + $0xd0] sm:$0xf] }
  0x55   :  { %v4212_v34 = vor.u32 %v5133_v21, %v4209_v24  ;;  %v3735_v21 = vld [vmem:[#allocation5 + $0x210] sm:$0xf] }
  0x56   :  { %1629 = vmatpush.bf16.msrb.mxu1 %v4148_v39  ;;  %1669 = vmatpush.bf16.msrb.mxu0 %v3872_v20  ;;  %v122_v39 = vperm.slane %v5532_v29, 2  ;;  %v3596_v20 = vor.u32 %v4981_v13, %v3595_v12  ;;  %v5066_v12 = vld [vmem:[#allocation5 + $0x3b0] sm:$0xf0] }
  0x57   :  { %1655 = vmatpush.bf16.msrb.mxu3 %v3712_v36 }
  0x58   :  { %1643 = vmatpush.bf16.msra.mxu2 %v3512_v56 }
  0x5a   :  { %1630 = vmatpush.bf16.msrb.mxu1 %v4128_v53  ;;  %1670 = vmatpush.bf16.msrb.mxu0 %v3852_v23  ;;  %v4032_v23 = vor.u32 %v5088_v15, %v4029_v16  ;;  %v5113_v15 = vld [vmem:[#allocation5 + $0x52c] sm:$0xf]  ;;  %v4129_v16 = vld [vmem:[#allocation5 + $0x53c] sm:$0xf0] }
  0x5b   :  { %1656 = vmatpush.bf16.msrb.mxu3 %v3692_v49  ;;  %v5098_v49 = vld [vmem:[#allocation5 + $0x4b4] sm:$0xf]  ;;  %v4132_v24 = vor.u32 %v5113_v15, %v4129_v16  ;;  %v5091_v15 = vld [vmem:[#allocation5 + $0x478] sm:$0xf0]  ;;  %v4195_v16 = vld [vmem:[#allocation5 + $0x5a8] sm:$0xf] }
  0x5c   :  { %1644 = vmatpush.bf16.msra.mxu2 %v3492_v5  ;;  %v4252_v5 = vor.u32 %v5143_v54, %v4249_v55  ;;  %v5026_v54 = vld [vmem:[#allocation5 + $0x270] sm:$0xf0] }
  0x5e   :  { %1631 = vmatpush.bf16.msrb.mxu1 %v4108_v1  ;;  %1671 = vmatpush.bf16.msrb.mxu0 %v3832_v26  ;;  %v4049_v1 = vld [vmem:[#allocation5 + $0x49c] sm:$0xf0]  ;;  %v4976_v26 = vld [vmem:[#allocation5 + $0xe0] sm:$0xf0] }
  0x5f   :  { %1657 = vmatpush.bf16.msrb.mxu3 %v3672_v60  ;;  %v4072_v60 = vor.u32 %v5098_v49, %v4069_v50  ;;  %v4052_v10 = vor.u32 %v5093_v0, %v4049_v1  ;;  %v4169_v49 = vld [vmem:[#allocation5 + $0x58c] sm:$0xf0]  ;;  %v3535_v50 = vld [vmem:[#allocation5 + $0x80] sm:$0xf]  ;;  %v4149_v0 = vld [vmem:[#allocation5 + $0x564] sm:$0xf0] }
  0x60   :  { %1645 = vmatpush.bf16.msra.mxu2 %v3472_v14  ;;  %v3515_v1 = vld [vmem:[#allocation5 + $0x58] sm:$0xf] }
  0x62   :  { %1672 = vmatpush.bf16.msrb.mxu0 %v3812_v31  ;;  %v5083_v31 = vld [vmem:[#allocation5 + $0x43c] sm:$0xf] }
  0x63   :  { %1658 = vmatpush.bf16.msrb.mxu3 %v3652_v9 }
  0x66   :  { %1673 = vmatpush.bf16.msrb.mxu0 %v3792_v35  ;;  %v3576_v35 = vor.u32 %v4976_v26, %v3575_v25  ;;  %v3915_v25 = vld [vmem:[#allocation5 + $0x378] sm:$0xf]  ;;  %v5061_v26 = vld [vmem:[#allocation5 + $0x388] sm:$0xf0] }
  0x67   :  { %1659 = vmatpush.bf16.msrb.mxu3 %v3632_v18  ;;  %v4232_v18 = vor.u32 %v5138_v7, %v4229_v11  ;;  %v3949_v7 = vld [vmem:[#allocation5 + $0x3d4] sm:$0xf0]  ;;  %v3935_v11 = vld [vmem:[#allocation5 + $0x3a0] sm:$0xf] }
  0x9e   :  { %v200_v30 = vpop.f32.mrf.mxu0 }
  0x9f   :  { %v201_v36 = vadd.f32 %v200_v30, %v120_v32  ;;  %v123_v30 = vperm.slane %v5532_v29, 3 }
  0xa1   :  { %v261_v44 = vmax.f32 %v201_v36, 0.0  ;;  %v5128_v36 = vld [vmem:[#allocation5 + $0x5a4] sm:$0xf] }
  0xa6   :  { %v228_v38 = vpop.f32.mrf.mxu2  ;;  %v202_v40 = vpop.f32.mrf.mxu0 }
  0xa7   :  { %v214_v37 = vpop.f32.mrf.mxu3  ;;  %v203_v41 = vadd.f32 %v202_v40, %v120_v32  ;;  %v229_v46 = vadd.f32 %v228_v38, %v122_v39  ;;  %v4009_v32 = vld [vmem:[#allocation5 + $0x44c] sm:$0xf0]  ;;  %v3555_v38 = vld [vmem:[#allocation5 + $0xa8] sm:$0xf] }
  0xa8   :  { %v215_v51 = vadd.f32 %v214_v37, %v121_v19  ;;  %v4189_v37 = vld [vmem:[#allocation5 + $0x5b4] sm:$0xf0] }
  0xa9   :  { %v266_v45 = vmax.f32 %v203_v41, 0.0  ;;  %v263_v56 = vmax.f32 %v229_v46, 0.0  ;;  %v4012_v41 = vor.u32 %v5083_v31, %v4009_v32  ;;  %v4109_v31 = vld [vmem:[#allocation5 + $0x514] sm:$0xf0]  ;;  %v3475_v32 = vld [vmem:[#allocation5 + $0x8] sm:$0xf] }
  0xaa   :  { %v262_v2 = vmax.f32 %v215_v51, 0.0 }
  0xab   :  { %v5537_v48 = vpack.c.bf16 %v266_v45, %v261_v44  ;;  %v4192_v44 = vor.u32 %v5128_v36, %v4189_v37  ;;  %v4095_v36 = vld [vmem:[#allocation5 + $0x4e0] sm:$0xf]  ;;  %v3916_v37 = vor.u32 %v5061_v26, %v3915_v25  ;;  %v4991_v25 = vld [vmem:[#allocation5 + $0x158] sm:$0xf0] }
  0xac   :  { %v4015_v26 = vld [vmem:[#allocation5 + $0x440] sm:$0xf] }
  0xad   :  { %1576 = vmatmul.bf16.vlgmr.msra.gmra.mxu1 %v5537_v48 }
  0xae   :  { %v230_v53 = vpop.f32.mrf.mxu2  ;;  %1680 = vmatpush.bf16.msra.mxu1 %v4092_v47  ;;  %v256_v59 = vpop.f32.mrf.mxu0  ;;  %v5123_v47 = vld [vmem:[#allocation5 + $0x57c] sm:$0xf] }
  0xaf   :  { %v216_v52 = vpop.f32.mrf.mxu3  ;;  %v231_v58 = vadd.f32 %v230_v53, %v122_v39  ;;  %v257_v14 = vadd.f32 %v256_v59, %v124_v63  ;;  %v4971_v39 = vld [vmem:[#allocation5 + $0xb8] sm:$0xf0]  ;;  %v3775_v53 = vld [vmem:[#allocation5 + $0x260] sm:$0xf]  ;;  %v4172_v59 = vor.u32 %v5123_v47, %v4169_v49  ;;  %v5006_v49 = vld [vmem:[#allocation5 + $0x1d0] sm:$0xf0] }
  0xb0   :  { %v217_v57 = vadd.f32 %v216_v52, %v121_v19  ;;  %v3989_v19 = vld [vmem:[#allocation5 + $0x424] sm:$0xf0]  ;;  %v3556_v45 = vor.u32 %v4971_v39, %v3555_v38  ;;  %v4966_v52 = vld [vmem:[#allocation5 + $0x90] sm:$0xf0]  ;;  %v3776_v62 = vor.u32 %v5026_v54, %v3775_v53  ;;  %v4255_v39 = vld [vmem:[#allocation5 + $0x620] sm:$0xf] }
  0xb1   :  { %v268_v4 = vmax.f32 %v231_v58, 0.0  ;;  %v265_v27 = vmax.f32 %v257_v14, 0.0  ;;  %v3992_v51 = vor.u32 %v5078_v43, %v3989_v19  ;;  %v3969_v58 = vld [vmem:[#allocation5 + $0x3fc] sm:$0xf0]  ;;  %v3536_v61 = vor.u32 %v4966_v52, %v3535_v50  ;;  %v5106_v38 = vld [vmem:[#allocation5 + $0x4f0] sm:$0xf0] }
  0xb2   :  { %v267_v3 = vmax.f32 %v217_v57, 0.0  ;;  %1681 = vmatpush.bf16.msra.mxu1 %v4072_v60  ;;  %v5073_v57 = vld [vmem:[#allocation5 + $0x3ec] sm:$0xf]  ;;  %v3895_v43 = vld [vmem:[#allocation5 + $0x350] sm:$0xf] }
  0xb3   :  { %v5543_v9 = vpack.c.bf16 %v268_v4, %v263_v56  ;;  %v3755_v4 = vld [vmem:[#allocation5 + $0x238] sm:$0xf]  ;;  %v5056_v19 = vld [vmem:[#allocation5 + $0x360] sm:$0xf0]  ;;  %v3695_v47 = vld [vmem:[#allocation5 + $0x1c0] sm:$0xf] }
  0xb4   :  { %v5541_v8 = vpack.c.bf16 %v267_v3, %v262_v2  ;;  %v3972_v2 = vor.u32 %v5073_v57, %v3969_v58  ;;  %v4961_v3 = vld [vmem:[#allocation5 + $0x68] sm:$0xf0]  ;;  %v4075_v50 = vld [vmem:[#allocation5 + $0x4b8] sm:$0xf]  ;;  %v3696_v57 = vor.u32 %v5006_v49, %v3695_v47  ;;  %v5031_v47 = vld [vmem:[#allocation5 + $0x298] sm:$0xf0] }
  0xb5   :  { %1604 = vmatmul.bf16.vlgmr.msra.gmra.mxu3 %v5543_v9  ;;  %v3516_v13 = vor.u32 %v4961_v3, %v3515_v1  ;;  %v5101_v52 = vld [vmem:[#allocation5 + $0x4c8] sm:$0xf0]  ;;  %v4235_v53 = vld [vmem:[#allocation5 + $0x5f8] sm:$0xf]  ;;  %v5096_v1 = vld [vmem:[#allocation5 + $0x4a0] sm:$0xf0] }
  0xb6   :  { %1590 = vmatmul.bf16.vlgmr.msrb.gmra.mxu2 %v5541_v8  ;;  %1708 = vmatpush.bf16.msra.mxu3 %v3616_v6  ;;  %v258_v22 = vpop.f32.mrf.mxu0  ;;  %v5068_v6 = vld [vmem:[#allocation5 + $0x3c4] sm:$0xf]  ;;  %v5141_v54 = vld [vmem:[#allocation5 + $0x608] sm:$0xf0]  ;;  %v4076_v58 = vor.u32 %v5101_v52, %v4075_v50  ;;  %v3777_v50 = vld [vmem:[#allocation5 + $0x274] sm:$0xf0] }
  0xb7   :  { %1694 = vmatpush.bf16.msrb.mxu2 %v4252_v5  ;;  %v242_v17 = vpop.f32.mrf.mxu3  ;;  %1682 = vmatpush.bf16.msra.mxu1 %v4052_v10  ;;  %v259_v28 = vadd.f32 %v258_v22, %v124_v63  ;;  %v5118_v63 = vld [vmem:[#allocation5 + $0x554] sm:$0xf]  ;;  %v5021_v5 = vld [vmem:[#allocation5 + $0x248] sm:$0xf0]  ;;  %v5016_v22 = vld [vmem:[#allocation5 + $0x220] sm:$0xf0] }
  0xb8   :  { %v243_v42 = vadd.f32 %v242_v17, %v123_v30  ;;  %v4152_v10 = vor.u32 %v5118_v63, %v4149_v0  ;;  %v3756_v14 = vor.u32 %v5021_v5, %v3755_v4  ;;  %v3495_v17 = vld [vmem:[#allocation5 + $0x30] sm:$0xf]  ;;  %v5136_v3 = vld [vmem:[#allocation5 + $0x5e0] sm:$0xf0]  ;;  %v3855_v4 = vld [vmem:[#allocation5 + $0x300] sm:$0xf] }
  0xb9   :  { %v270_v33 = vmax.f32 %v259_v28, 0.0  ;;  %v4055_v63 = vld [vmem:[#allocation5 + $0x490] sm:$0xf]  ;;  %v5046_v5 = vld [vmem:[#allocation5 + $0x310] sm:$0xf0] }
  0xba   :  { %1709 = vmatpush.bf16.msra.mxu3 %v3596_v20  ;;  %v264_v55 = vmax.f32 %v243_v42, 0.0  ;;  %v4956_v20 = vld [vmem:[#allocation5 + $0x40] sm:$0xf0] }
  0xbb   :  { %1695 = vmatpush.bf16.msrb.mxu2 %v4232_v18  ;;  %1683 = vmatpush.bf16.msra.mxu1 %v4032_v23  ;;  %v5548_v40 = vpack.c.bf16 %v270_v33, %v265_v27  ;;  %v3952_v18 = vor.u32 %v5068_v6, %v3949_v7  ;;  %v3936_v23 = vor.u32 %v5066_v12, %v3935_v11  ;;  %v5108_v27 = vld [vmem:[#allocation5 + $0x504] sm:$0xf]  ;;  %v4951_v33 = vld [vmem:[#allocation5 + $0x18] sm:$0xf0]  ;;  %v3655_v11 = vld [vmem:[#allocation5 + $0x170] sm:$0xf] }
  0xbc   :  { %v3496_v28 = vor.u32 %v4956_v20, %v3495_v17  ;;  %v4112_v42 = vor.u32 %v5108_v27, %v4109_v31  ;;  %v4056_v7 = vor.u32 %v5096_v1, %v4055_v63  ;;  %v4996_v12 = vld [vmem:[#allocation5 + $0x180] sm:$0xf0]  ;;  %v5131_v17 = vld [vmem:[#allocation5 + $0x5b8] sm:$0xf0]  ;;  %v5041_v20 = vld [vmem:[#allocation5 + $0x2e8] sm:$0xf0] }
  0xbd   :  { %1632 = vmatmul.bf16.vlgmr.msrb.gmra.mxu1 %v5548_v40  ;;  %v5086_v27 = vld [vmem:[#allocation5 + $0x450] sm:$0xf0]  ;;  %v5024_v49 = vld [vmem:[#allocation5 + $0x264] sm:$0xf]  ;;  %v5019_v63 = vld [vmem:[#allocation5 + $0x23c] sm:$0xf] }
  0xbe   :  { %1710 = vmatpush.bf16.msra.mxu3 %v3576_v35  ;;  %v5011_v35 = vld [vmem:[#allocation5 + $0x1f8] sm:$0xf0]  ;;  %v5126_v31 = vld [vmem:[#allocation5 + $0x590] sm:$0xf0] }
  0xbf   :  { %1696 = vmatpush.bf16.msrb.mxu2 %v4212_v34  ;;  %v244_v29 = vpop.f32.mrf.mxu3  ;;  %1684 = vmatpush.bf16.msra.mxu1 %v4012_v41  ;;  %v3715_v34 = vld [vmem:[#allocation5 + $0x1e8] sm:$0xf]  ;;  %v5146_v41 = vld [vmem:[#allocation5 + $0x630] sm:$0xf0] }
  0xc0   :  { %v245_v46 = vadd.f32 %v244_v29, %v123_v30  ;;  %v3736_v30 = vor.u32 %v5016_v22, %v3735_v21  ;;  %v3476_v29 = vor.u32 %v4951_v33, %v3475_v32  ;;  %v3656_v21 = vor.u32 %v4996_v12, %v3655_v11  ;;  %v3635_v22 = vld [vmem:[#allocation5 + $0x148] sm:$0xf]  ;;  %v4984_v32 = vld [vmem:[#allocation5 + $0x124] sm:$0xf]  ;;  %v3617_v33 = vld [vmem:[#allocation5 + $0x134] sm:$0xf0] }
  0xc1   :  { %v3557_v11 = vld [vmem:[#allocation5 + $0xbc] sm:$0xf0] }
  0xc2   :  { %v269_v56 = vmax.f32 %v245_v46, 0.0  ;;  %1711 = vmatpush.bf16.msra.mxu3 %v3556_v45  ;;  %v4096_v45 = vor.u32 %v5106_v38, %v4095_v36  ;;  %v4256_v46 = vor.u32 %v5146_v41, %v4255_v39  ;;  %v3636_v36 = vor.u32 %v4991_v25, %v3635_v22  ;;  %v3995_v39 = vld [vmem:[#allocation5 + $0x418] sm:$0xf]  ;;  %v5081_v41 = vld [vmem:[#allocation5 + $0x428] sm:$0xf0] }
  0xc3   :  { %1697 = vmatpush.bf16.msrb.mxu2 %v4192_v44  ;;  %1685 = vmatpush.bf16.msra.mxu1 %v3992_v51  ;;  %v3716_v44 = vor.u32 %v5011_v35, %v3715_v34  ;;  %v3896_v51 = vor.u32 %v5056_v19, %v3895_v43  ;;  %v3815_v34 = vld [vmem:[#allocation5 + $0x2b0] sm:$0xf]  ;;  %v5036_v35 = vld [vmem:[#allocation5 + $0x2c0] sm:$0xf0]  ;;  %v4155_v19 = vld [vmem:[#allocation5 + $0x558] sm:$0xf] }
  0xc4   :  { %v5551_v60 = vpack.c.bf16 %v269_v56, %v264_v55  ;;  %v3875_v55 = vld [vmem:[#allocation5 + $0x328] sm:$0xf]  ;;  %v5051_v56 = vld [vmem:[#allocation5 + $0x338] sm:$0xf0]  ;;  %v3816_v43 = vor.u32 %v5036_v35, %v3815_v34  ;;  %v3537_v25 = vld [vmem:[#allocation5 + $0x94] sm:$0xf0] }
  0xc5   :  { %1660 = vmatmul.bf16.vlgmr.msrb.gmra.mxu3 %v5541_v8  ;;  %v3876_v0 = vor.u32 %v5051_v56, %v3875_v55  ;;  %v5076_v56 = vld [vmem:[#allocation5 + $0x400] sm:$0xf0]  ;;  %v3717_v34 = vld [vmem:[#allocation5 + $0x1fc] sm:$0xf0] }
  0xc6   :  { %1618 = vmatmul.bf16.vlgmr.msra.gmra.mxu0 %v5551_v60  ;;  %1646 = vmatmul.bf16.vlgmr.msra.gmra.mxu2 %v5537_v48 }
  0xc7   :  { %1698 = vmatpush.bf16.msrb.mxu2 %v4172_v59  ;;  %1712 = vmatpush.bf16.msra.mxu3 %v3536_v61  ;;  %v4236_v59 = vor.u32 %v5141_v54, %v4235_v53  ;;  %v3675_v61 = vld [vmem:[#allocation5 + $0x198] sm:$0xf]  ;;  %v3975_v53 = vld [vmem:[#allocation5 + $0x3f0] sm:$0xf] }
  0xc8   :  { %1722 = vmatpush.bf16.msra.mxu0 %v3776_v62  ;;  %1686 = vmatpush.bf16.msra.mxu1 %v3972_v2  ;;  %v5001_v62 = vld [vmem:[#allocation5 + $0x1a8] sm:$0xf0]  ;;  %v4215_v2 = vld [vmem:[#allocation5 + $0x5d0] sm:$0xf]  ;;  %v3976_v1 = vor.u32 %v5076_v56, %v3975_v53  ;;  %v4037_v56 = vld [vmem:[#allocation5 + $0x47c] sm:$0xf0] }
  0xc9   :  { %v3676_v6 = vor.u32 %v5001_v62, %v3675_v61  ;;  %v4974_v61 = vld [vmem:[#allocation5 + $0xd4] sm:$0xf]  ;;  %v3577_v62 = vld [vmem:[#allocation5 + $0xe4] sm:$0xf0]  ;;  %v5049_v53 = vld [vmem:[#allocation5 + $0x32c] sm:$0xf] }
  0xcb   :  { %1699 = vmatpush.bf16.msrb.mxu2 %v4152_v10  ;;  %1713 = vmatpush.bf16.msra.mxu3 %v3516_v13  ;;  %v4216_v10 = vor.u32 %v5136_v3, %v4215_v2  ;;  %v4035_v13 = vld [vmem:[#allocation5 + $0x468] sm:$0xf] }
  0xcc   :  { %1723 = vmatpush.bf16.msra.mxu0 %v3756_v14  ;;  %1687 = vmatpush.bf16.msra.mxu1 %v3952_v18  ;;  %v3856_v14 = vor.u32 %v5046_v5, %v3855_v4  ;;  %v3835_v18 = vld [vmem:[#allocation5 + $0x2d8] sm:$0xf]  ;;  %v3955_v3 = vld [vmem:[#allocation5 + $0x3c8] sm:$0xf]  ;;  %v5071_v4 = vld [vmem:[#allocation5 + $0x3d8] sm:$0xf0] }
  0xcd   :  { %v4115_v5 = vld [vmem:[#allocation5 + $0x508] sm:$0xf] }
  0xcf   :  { %1700 = vmatpush.bf16.msrb.mxu2 %v4132_v24  ;;  %1714 = vmatpush.bf16.msra.mxu3 %v3496_v28  ;;  %v4196_v24 = vor.u32 %v5131_v17, %v4195_v16  ;;  %v3836_v28 = vor.u32 %v5041_v20, %v3835_v18  ;;  %v4097_v16 = vld [vmem:[#allocation5 + $0x4f4] sm:$0xf0]  ;;  %v5014_v17 = vld [vmem:[#allocation5 + $0x214] sm:$0xf]  ;;  %v3737_v18 = vld [vmem:[#allocation5 + $0x224] sm:$0xf0]  ;;  %v3956_v20 = vor.u32 %v5071_v4, %v3955_v3 }
  0xd0   :  { %1736 = vmatpush.bf16.msrb.mxu1 %v3936_v23  ;;  %1724 = vmatpush.bf16.msra.mxu0 %v3736_v30  ;;  %v4036_v23 = vor.u32 %v5091_v15, %v4035_v13  ;;  %v4175_v30 = vld [vmem:[#allocation5 + $0x580] sm:$0xf]  ;;  %v5064_v13 = vld [vmem:[#allocation5 + $0x3a4] sm:$0xf]  ;;  %v3857_v3 = vld [vmem:[#allocation5 + $0x314] sm:$0xf0] }
  0xd1   :  { %1688 = vmatmul.bf16.vlgmr.msra.gmra.mxu1 %v5551_v60  ;;  %v4176_v38 = vor.u32 %v5126_v31, %v4175_v30  ;;  %v5104_v15 = vld [vmem:[#allocation5 + $0x4e4] sm:$0xf]  ;;  %v3917_v30 = vld [vmem:[#allocation5 + $0x38c] sm:$0xf0]  ;;  %v5099_v31 = vld [vmem:[#allocation5 + $0x4bc] sm:$0xf] }
  0xd2   :  { %v5084_v4 = vld [vmem:[#allocation5 + $0x444] sm:$0xf] }
  0xd3   :  { %1701 = vmatpush.bf16.msrb.mxu2 %v4112_v42  ;;  %1715 = vmatpush.bf16.msra.mxu3 %v3476_v29  ;;  %v3620_v42 = vor.u32 %v4984_v32, %v3617_v33  ;;  %v5121_v29 = vld [vmem:[#allocation5 + $0x568] sm:$0xf0]  ;;  %v4077_v32 = vld [vmem:[#allocation5 + $0x4cc] sm:$0xf0] }
  0xd4   :  { %1737 = vmatpush.bf16.msrb.mxu1 %v3916_v37  ;;  %1725 = vmatpush.bf16.msra.mxu0 %v3716_v44  ;;  %v4016_v37 = vor.u32 %v5086_v27, %v4015_v26  ;;  %v4979_v44 = vld [vmem:[#allocation5 + $0xfc] sm:$0xf]  ;;  %v4156_v52 = vor.u32 %v5121_v29, %v4155_v19  ;;  %v4100_v26 = vor.u32 %v5104_v15, %v4097_v16  ;;  %v5009_v33 = vld [vmem:[#allocation5 + $0x1ec] sm:$0xf]  ;;  %v5094_v19 = vld [vmem:[#allocation5 + $0x494] sm:$0xf] }
  0xd5   :  { %v3740_v27 = vor.u32 %v5014_v17, %v3737_v18  ;;  %v4057_v29 = vld [vmem:[#allocation5 + $0x4a4] sm:$0xf0]  ;;  %v5039_v16 = vld [vmem:[#allocation5 + $0x2dc] sm:$0xf]  ;;  %v3837_v17 = vld [vmem:[#allocation5 + $0x2ec] sm:$0xf0] }
  0xd6   :  { %1674 = vmatmul.bf16.vlgmr.msrb.gmra.mxu0 %v5543_v9  ;;  %1702 = vmatmul.bf16.vlgmr.msrb.gmra.mxu2 %v5548_v40  ;;  %v5079_v18 = vld [vmem:[#allocation5 + $0x41c] sm:$0xf] }
  0xd7   :  { %1750 = vmatpush.bf16.msra.mxu2 %v4096_v45  ;;  %1764 = vmatpush.bf16.msrb.mxu3 %v4256_v46  ;;  %v3597_v45 = vld [vmem:[#allocation5 + $0x10c] sm:$0xf0]  ;;  %v3795_v46 = vld [vmem:[#allocation5 + $0x288] sm:$0xf] }
  0xd8   :  { %1738 = vmatpush.bf16.msrb.mxu1 %v3896_v51  ;;  %1716 = vmatmul.bf16.vlgmr.msra.gmra.mxu3 %v5537_v48  ;;  %v3996_v51 = vor.u32 %v5081_v41, %v3995_v39  ;;  %v3600_v54 = vor.u32 %v4979_v44, %v3597_v45  ;;  %v3796_v55 = vor.u32 %v5031_v47, %v3795_v46  ;;  %v5004_v44 = vld [vmem:[#allocation5 + $0x1c4] sm:$0xf]  ;;  %v3697_v45 = vld [vmem:[#allocation5 + $0x1d4] sm:$0xf0] }
  0xd9   :  { %1726 = vmatpush.bf16.msra.mxu0 %v3696_v57  ;;  %v4135_v57 = vld [vmem:[#allocation5 + $0x530] sm:$0xf]  ;;  %v4080_v39 = vor.u32 %v5099_v31, %v4077_v32  ;;  %v3720_v41 = vor.u32 %v5009_v33, %v3717_v34  ;;  %v5034_v32 = vld [vmem:[#allocation5 + $0x2b4] sm:$0xf]  ;;  %v3817_v33 = vld [vmem:[#allocation5 + $0x2c4] sm:$0xf0] }
  0xda   :  { %v5074_v34 = vld [vmem:[#allocation5 + $0x3f4] sm:$0xf] }
  0xdb   :  { %1751 = vmatpush.bf16.msra.mxu2 %v4076_v58  ;;  %1765 = vmatpush.bf16.msrb.mxu3 %v4236_v59  ;;  %v5116_v58 = vld [vmem:[#allocation5 + $0x540] sm:$0xf0]  ;;  %v3780_v59 = vor.u32 %v5024_v49, %v3777_v50  ;;  %v4954_v49 = vld [vmem:[#allocation5 + $0x34] sm:$0xf]  ;;  %v3497_v50 = vld [vmem:[#allocation5 + $0x44] sm:$0xf0] }
  0xdc   :  { %1739 = vmatpush.bf16.msrb.mxu1 %v3876_v0  ;;  %v3757_v0 = vld [vmem:[#allocation5 + $0x24c] sm:$0xf0]  ;;  %v4136_v2 = vor.u32 %v5116_v58, %v4135_v57  ;;  %v4999_v57 = vld [vmem:[#allocation5 + $0x19c] sm:$0xf] }
  0xdd   :  { %1727 = vmatpush.bf16.msra.mxu0 %v3676_v6  ;;  %v3580_v6 = vor.u32 %v4974_v61, %v3577_v62  ;;  %v3760_v12 = vor.u32 %v5019_v63, %v3757_v0  ;;  %v3677_v58 = vld [vmem:[#allocation5 + $0x1ac] sm:$0xf0]  ;;  %v4949_v62 = vld [vmem:[#allocation5 + $0xc] sm:$0xf]  ;;  %v3477_v63 = vld [vmem:[#allocation5 + $0x1c] sm:$0xf0] }
  0xdf   :  { %1752 = vmatpush.bf16.msra.mxu2 %v4056_v7  ;;  %1766 = vmatpush.bf16.msrb.mxu3 %v4216_v10  ;;  %v5111_v7 = vld [vmem:[#allocation5 + $0x518] sm:$0xf0]  ;;  %v4969_v10 = vld [vmem:[#allocation5 + $0xac] sm:$0xf] }
  0xe0   :  { %1740 = vmatpush.bf16.msrb.mxu1 %v3856_v14  ;;  %v3937_v14 = vld [vmem:[#allocation5 + $0x3b4] sm:$0xf0]  ;;  %v3560_v22 = vor.u32 %v4969_v10, %v3557_v11  ;;  %v4994_v10 = vld [vmem:[#allocation5 + $0x174] sm:$0xf]  ;;  %v3657_v11 = vld [vmem:[#allocation5 + $0x184] sm:$0xf0] }
  0xe1   :  { %1728 = vmatpush.bf16.msra.mxu0 %v3656_v21  ;;  %v4116_v21 = vor.u32 %v5111_v7, %v4115_v5  ;;  %v4017_v5 = vld [vmem:[#allocation5 + $0x454] sm:$0xf0] }
  0xe2   :  { %v4257_v7 = vld [vmem:[#allocation5 + $0x634] sm:$0xf0] }
  0xe3   :  { %1753 = vmatpush.bf16.msra.mxu2 %v4036_v23  ;;  %1767 = vmatpush.bf16.msrb.mxu3 %v4196_v24  ;;  %v3940_v23 = vor.u32 %v5064_v13, %v3937_v14  ;;  %v4964_v24 = vld [vmem:[#allocation5 + $0x84] sm:$0xf]  ;;  %v4020_v14 = vor.u32 %v5084_v4, %v4017_v5  ;;  %v5022_v4 = vld [vmem:[#allocation5 + $0x250] sm:$0xf0]  ;;  %v3923_v5 = vld [vmem:[#allocation5 + $0x380] sm:$0xf] }
  0xe4   :  { %1741 = vmatpush.bf16.msrb.mxu1 %v3836_v28  ;;  %v5059_v28 = vld [vmem:[#allocation5 + $0x37c] sm:$0xf]  ;;  %v3540_v35 = vor.u32 %v4964_v24, %v3537_v25  ;;  %v4989_v24 = vld [vmem:[#allocation5 + $0x14c] sm:$0xf]  ;;  %v3637_v25 = vld [vmem:[#allocation5 + $0x15c] sm:$0xf0] }
  0xe5   :  { %1729 = vmatpush.bf16.msra.mxu0 %v3636_v36  ;;  %v3920_v36 = vor.u32 %v5059_v28, %v3917_v30  ;;  %v4987_v28 = vld [vmem:[#allocation5 + $0x138] sm:$0xf0] }
  0xe7   :  { %1754 = vmatpush.bf16.msra.mxu2 %v4016_v37  ;;  %1768 = vmatpush.bf16.msrb.mxu3 %v4176_v38  ;;  %v4959_v37 = vld [vmem:[#allocation5 + $0x5c] sm:$0xf]  ;;  %v3517_v38 = vld [vmem:[#allocation5 + $0x6c] sm:$0xf0] }
  0xe8   :  { %1742 = vmatpush.bf16.msrb.mxu1 %v3816_v43  ;;  %1730 = vmatmul.bf16.vlgmr.msra.gmra.mxu0 %v5541_v8  ;;  %v3897_v43 = vld [vmem:[#allocation5 + $0x364] sm:$0xf0]  ;;  %v3520_v46 = vor.u32 %v4959_v37, %v3517_v38  ;;  %v5134_v37 = vld [vmem:[#allocation5 + $0x5d4] sm:$0xf] }
  0xe9   :  { %1778 = vmatpush.bf16.msrb.mxu0 %v3620_v42  ;;  %v5054_v42 = vld [vmem:[#allocation5 + $0x354] sm:$0xf]  ;;  %v4217_v38 = vld [vmem:[#allocation5 + $0x5e4] sm:$0xf0] }
  0xea   :  { %v3900_v47 = vor.u32 %v5054_v42, %v3897_v43  ;;  %v3603_v42 = vld [vmem:[#allocation5 + $0x100] sm:$0xf]  ;;  %v4982_v43 = vld [vmem:[#allocation5 + $0x110] sm:$0xf0] }
  0xeb   :  { %1755 = vmatpush.bf16.msra.mxu2 %v3996_v51  ;;  %1769 = vmatpush.bf16.msrb.mxu3 %v4156_v52  ;;  %v4060_v51 = vor.u32 %v5094_v19, %v4057_v29  ;;  %v3700_v52 = vor.u32 %v5004_v44, %v3697_v45  ;;  %v5029_v19 = vld [vmem:[#allocation5 + $0x28c] sm:$0xf]  ;;  %v4220_v44 = vor.u32 %v5134_v37, %v4217_v38  ;;  %v3797_v45 = vld [vmem:[#allocation5 + $0x29c] sm:$0xf0] }
  0xec   :  { %1743 = vmatpush.bf16.msrb.mxu1 %v3796_v55  ;;  %v5089_v55 = vld [vmem:[#allocation5 + $0x46c] sm:$0xf] }
  0xed   :  { %1779 = vmatpush.bf16.msrb.mxu0 %v3600_v54  ;;  %v3877_v54 = vld [vmem:[#allocation5 + $0x33c] sm:$0xf0]  ;;  %v4040_v0 = vor.u32 %v5089_v55, %v4037_v56  ;;  %v5067_v55 = vld [vmem:[#allocation5 + $0x3b8] sm:$0xf0]  ;;  %v3800_v56 = vor.u32 %v5029_v19, %v3797_v45  ;;  %v5109_v38 = vld [vmem:[#allocation5 + $0x50c] sm:$0xf] }
  0xee   :  { %v3880_v61 = vor.u32 %v5049_v53, %v3877_v54  ;;  %v5027_v53 = vld [vmem:[#allocation5 + $0x278] sm:$0xf0]  ;;  %v3943_v54 = vld [vmem:[#allocation5 + $0x3a8] sm:$0xf] }
  0xef   :  { %1756 = vmatpush.bf16.msra.mxu2 %v3976_v1  ;;  %1770 = vmatpush.bf16.msrb.mxu3 %v4136_v2  ;;  %v3680_v1 = vor.u32 %v4999_v57, %v3677_v58  ;;  %v5044_v2 = vld [vmem:[#allocation5 + $0x304] sm:$0xf]  ;;  %v3583_v57 = vld [vmem:[#allocation5 + $0xd8] sm:$0xf]  ;;  %v4977_v58 = vld [vmem:[#allocation5 + $0xe8] sm:$0xf0] }
  0xf0   :  { %1792 = vmatpush.bf16.msra.mxu1 %v3780_v59  ;;  %v3500_v59 = vor.u32 %v4954_v49, %v3497_v50  ;;  %v3860_v13 = vor.u32 %v5044_v2, %v3857_v3  ;;  %v5129_v49 = vld [vmem:[#allocation5 + $0x5ac] sm:$0xf]  ;;  %v4197_v50 = vld [vmem:[#allocation5 + $0x5bc] sm:$0xf0]  ;;  %v3584_v3 = vor.u32 %v4977_v58, %v3583_v57  ;;  %v5007_v19 = vld [vmem:[#allocation5 + $0x1d8] sm:$0xf0] }
  0xf1   :  { %1780 = vmatpush.bf16.msrb.mxu0 %v3580_v6  ;;  %1744 = vmatmul.bf16.vlgmr.msrb.gmra.mxu1 %v5543_v9  ;;  %v5144_v6 = vld [vmem:[#allocation5 + $0x624] sm:$0xf]  ;;  %v3763_v2 = vld [vmem:[#allocation5 + $0x240] sm:$0xf]  ;;  %v5047_v45 = vld [vmem:[#allocation5 + $0x318] sm:$0xf0] }
  0xf2   :  { %v4260_v15 = vor.u32 %v5144_v6, %v4257_v7  ;;  %v5062_v6 = vld [vmem:[#allocation5 + $0x390] sm:$0xf0]  ;;  %v3563_v7 = vld [vmem:[#allocation5 + $0xb0] sm:$0xf]  ;;  %v3843_v58 = vld [vmem:[#allocation5 + $0x2e0] sm:$0xf] }
  0xf3   :  { %1757 = vmatpush.bf16.msra.mxu2 %v3956_v20  ;;  %1771 = vmatpush.bf16.msrb.mxu3 %v4116_v21  ;;  %v3660_v20 = vor.u32 %v4994_v10, %v3657_v11  ;;  %v3997_v21 = vld [vmem:[#allocation5 + $0x42c] sm:$0xf0]  ;;  %v4972_v10 = vld [vmem:[#allocation5 + $0xc0] sm:$0xf0] }
  0xf4   :  { %1793 = vmatpush.bf16.msra.mxu1 %v3760_v12  ;;  %v3480_v12 = vor.u32 %v4949_v62, %v3477_v63  ;;  %v4000_v30 = vor.u32 %v5079_v18, %v3997_v21  ;;  %v3944_v63 = vor.u32 %v5067_v55, %v3943_v54  ;;  %v5017_v18 = vld [vmem:[#allocation5 + $0x228] sm:$0xf0]  ;;  %v3683_v54 = vld [vmem:[#allocation5 + $0x1a0] sm:$0xf]  ;;  %v5002_v55 = vld [vmem:[#allocation5 + $0x1b0] sm:$0xf0] }
  0xf5   :  { %1781 = vmatpush.bf16.msrb.mxu0 %v3560_v22  ;;  %v5139_v22 = vld [vmem:[#allocation5 + $0x5fc] sm:$0xf]  ;;  %v5057_v21 = vld [vmem:[#allocation5 + $0x368] sm:$0xf0] }
  0xf6   :  { %1758 = vmatmul.bf16.vlgmr.msra.gmra.mxu2 %v5551_v60  ;;  %1772 = vmatmul.bf16.vlgmr.msrb.gmra.mxu3 %v5548_v40 }
  0xf7   :  { %1806 = vmatpush.bf16.msrb.mxu2 %v3940_v23  ;;  %1820 = vmatpush.bf16.msra.mxu3 %v4100_v26  ;;  %v4237_v23 = vld [vmem:[#allocation5 + $0x60c] sm:$0xf0]  ;;  %v3840_v26 = vor.u32 %v5039_v16, %v3837_v17  ;;  %v3743_v16 = vld [vmem:[#allocation5 + $0x218] sm:$0xf]  ;;  %v3564_v17 = vor.u32 %v4972_v10, %v3563_v7  ;;  %v4997_v10 = vld [vmem:[#allocation5 + $0x188] sm:$0xf0] }
  0xf8   :  { %1794 = vmatpush.bf16.msra.mxu1 %v3740_v27  ;;  %v3623_v27 = vld [vmem:[#allocation5 + $0x128] sm:$0xf]  ;;  %v4240_v31 = vor.u32 %v5139_v22, %v4237_v23  ;;  %v4967_v23 = vld [vmem:[#allocation5 + $0x98] sm:$0xf0] }
  0xf9   :  { %1782 = vmatpush.bf16.msrb.mxu0 %v3540_v35  ;;  %v3640_v35 = vor.u32 %v4989_v24, %v3637_v25  ;;  %v3543_v22 = vld [vmem:[#allocation5 + $0x88] sm:$0xf]  ;;  %v3744_v25 = vor.u32 %v5017_v18, %v3743_v16  ;;  %v4243_v16 = vld [vmem:[#allocation5 + $0x600] sm:$0xf] }
  0xfb   :  { %1807 = vmatpush.bf16.msrb.mxu2 %v3920_v36  ;;  %1821 = vmatpush.bf16.msra.mxu3 %v4080_v39  ;;  %v3977_v36 = vld [vmem:[#allocation5 + $0x404] sm:$0xf0]  ;;  %v3624_v39 = vor.u32 %v4987_v28, %v3623_v27  ;;  %v5114_v27 = vld [vmem:[#allocation5 + $0x534] sm:$0xf] }
  0xfc   :  { %1795 = vmatpush.bf16.msra.mxu1 %v3720_v41  ;;  %v3820_v41 = vor.u32 %v5034_v32, %v3817_v33  ;;  %v3980_v29 = vor.u32 %v5074_v34, %v3977_v36  ;;  %v4137_v28 = vld [vmem:[#allocation5 + $0x544] sm:$0xf0]  ;;  %v5012_v32 = vld [vmem:[#allocation5 + $0x200] sm:$0xf0]  ;;  %v3883_v33 = vld [vmem:[#allocation5 + $0x330] sm:$0xf] }
  0xfd   :  { %1783 = vmatpush.bf16.msrb.mxu0 %v3520_v46  ;;  %v5069_v46 = vld [vmem:[#allocation5 + $0x3cc] sm:$0xf]  ;;  %v5052_v34 = vld [vmem:[#allocation5 + $0x340] sm:$0xf0]  ;;  %v4962_v36 = vld [vmem:[#allocation5 + $0x70] sm:$0xf0]  ;;  %v4140_v37 = vor.u32 %v5114_v27, %v4137_v28 }
  0xfe   :  { %v5092_v27 = vld [vmem:[#allocation5 + $0x480] sm:$0xf0] }
  0xff   :  { %1808 = vmatpush.bf16.msrb.mxu2 %v3900_v47  ;;  %1822 = vmatpush.bf16.msra.mxu3 %v4060_v51  ;;  %v3957_v47 = vld [vmem:[#allocation5 + $0x3dc] sm:$0xf0]  ;;  %v3783_v51 = vld [vmem:[#allocation5 + $0x268] sm:$0xf] }
 0x100   :  { %1796 = vmatpush.bf16.msra.mxu1 %v3700_v52  ;;  %v3604_v52 = vor.u32 %v4982_v43, %v3603_v42  ;;  %v3784_v62 = vor.u32 %v5027_v53, %v3783_v51  ;;  %v4117_v42 = vld [vmem:[#allocation5 + $0x51c] sm:$0xf0]  ;;  %v3703_v43 = vld [vmem:[#allocation5 + $0x1c8] sm:$0xf] }
 0x101   :  { %1784 = vmatpush.bf16.msrb.mxu0 %v3500_v59  ;;  %v3960_v59 = vor.u32 %v5069_v46, %v3957_v47  ;;  %v4103_v46 = vld [vmem:[#allocation5 + $0x4e8] sm:$0xf]  ;;  %v5107_v47 = vld [vmem:[#allocation5 + $0x4f8] sm:$0xf0]  ;;  %v4120_v51 = vor.u32 %v5109_v38, %v4117_v42 }
 0x103   :  { %1809 = vmatpush.bf16.msrb.mxu2 %v3880_v61  ;;  %1823 = vmatpush.bf16.msra.mxu3 %v4040_v0  ;;  %v4200_v61 = vor.u32 %v5129_v49, %v4197_v50  ;;  %v5124_v0 = vld [vmem:[#allocation5 + $0x584] sm:$0xf]  ;;  %v3503_v49 = vld [vmem:[#allocation5 + $0x38] sm:$0xf]  ;;  %v4957_v50 = vld [vmem:[#allocation5 + $0x48] sm:$0xf0] }
 0x104   :  { %1797 = vmatpush.bf16.msra.mxu1 %v3680_v1  ;;  %v4177_v1 = vld [vmem:[#allocation5 + $0x594] sm:$0xf0]  ;;  %v3504_v57 = vor.u32 %v4957_v50, %v3503_v49  ;;  %v5191_v49 = vld [vmem:[#allocation7 + $0x158] sm:$0xf0] }
 0x105   :  { %1785 = vmatpush.bf16.msrb.mxu0 %v3480_v12  ;;  %v4180_v11 = vor.u32 %v5124_v0, %v4177_v1  ;;  %v3764_v12 = vor.u32 %v5022_v4, %v3763_v2  ;;  %v4952_v0 = vld [vmem:[#allocation5 + $0x20] sm:$0xf0]  ;;  %v4263_v1 = vld [vmem:[#allocation5 + $0x628] sm:$0xf]  ;;  %v5147_v2 = vld [vmem:[#allocation5 + $0x638] sm:$0xf0] }
 0x107   :  { %1810 = vmatpush.bf16.msrb.mxu2 %v3860_v13  ;;  %1824 = vmatpush.bf16.msra.mxu3 %v4020_v14  ;;  %v3924_v13 = vor.u32 %v5062_v6, %v3923_v5  ;;  %v5119_v14 = vld [vmem:[#allocation5 + $0x55c] sm:$0xf]  ;;  %v3663_v5 = vld [vmem:[#allocation5 + $0x178] sm:$0xf] }
 0x108   :  { %1798 = vmatpush.bf16.msra.mxu1 %v3660_v20  ;;  %1786 = vmatmul.bf16.vlgmr.msrb.gmra.mxu0 %v5537_v48  ;;  %v3903_v20 = vld [vmem:[#allocation5 + $0x358] sm:$0xf]  ;;  %v3664_v18 = vor.u32 %v4997_v10, %v3663_v5  ;;  %v4315_v5 = vld [vmem:[#allocation7 + $0x60] sm:$0xf]  ;;  %v5122_v10 = vld [vmem:[#allocation5 + $0x570] sm:$0xf0] }
 0x109   :  { %1834 = vmatpush.bf16.msra.mxu0 %v4260_v15  ;;  %v4157_v15 = vld [vmem:[#allocation5 + $0x56c] sm:$0xf0] }
 0x10a   :  { %v4160_v24 = vor.u32 %v5119_v14, %v4157_v15  ;;  %v4063_v14 = vld [vmem:[#allocation5 + $0x498] sm:$0xf]  ;;  %v5097_v15 = vld [vmem:[#allocation5 + $0x4a8] sm:$0xf0] }
 0x10b   :  { %1811 = vmatpush.bf16.msrb.mxu2 %v3840_v26  ;;  %1825 = vmatpush.bf16.msra.mxu3 %v4000_v30  ;;  %v3904_v26 = vor.u32 %v5057_v21, %v3903_v20  ;;  %v3723_v30 = vld [vmem:[#allocation5 + $0x1f0] sm:$0xf] }
 0x10c   :  { %1799 = vmatpush.bf16.msra.mxu1 %v3640_v35  ;;  %v3523_v35 = vld [vmem:[#allocation5 + $0x60] sm:$0xf]  ;;  %v3643_v21 = vld [vmem:[#allocation5 + $0x150] sm:$0xf] }
 0x10d   :  { %1835 = vmatpush.bf16.msra.mxu0 %v4240_v31  ;;  %v3544_v31 = vor.u32 %v4967_v23, %v3543_v22  ;;  %v4992_v22 = vld [vmem:[#allocation5 + $0x160] sm:$0xf0]  ;;  %v3803_v23 = vld [vmem:[#allocation5 + $0x290] sm:$0xf] }
 0x10f   :  { %1812 = vmatpush.bf16.msrb.mxu2 %v3820_v41  ;;  %1826 = vmatpush.bf16.msra.mxu3 %v3980_v29  ;;  %v3884_v41 = vor.u32 %v5052_v34, %v3883_v33  ;;  %v3524_v29 = vor.u32 %v4962_v36, %v3523_v35  ;;  %v5137_v33 = vld [vmem:[#allocation5 + $0x5e8] sm:$0xf0]  ;;  %v4447_v34 = vld [vmem:[#allocation7 + $0x168] sm:$0xf]  ;;  %v5194_v35 = vld [vmem:[#allocation7 + $0x170] sm:$0xf0]  ;;  %v3644_v36 = vor.u32 %v4992_v22, %v3643_v21 }
 0x110   :  { %1848 = vmatpush.bf16.msrb.mxu1 %v3624_v39  ;;  %v3724_v39 = vor.u32 %v5012_v32, %v3723_v30  ;;  %v4223_v30 = vld [vmem:[#allocation5 + $0x5d8] sm:$0xf]  ;;  %v5170_v32 = vld [vmem:[#allocation7 + $0xb0] sm:$0xf0]  ;;  %v5117_v21 = vld [vmem:[#allocation5 + $0x548] sm:$0xf0] }
 0x111   :  { %1836 = vmatpush.bf16.msra.mxu0 %v4220_v44  ;;  %1800 = vmatmul.bf16.vlgmr.msra.gmra.mxu1 %v5541_v8  ;;  %v3863_v44 = vld [vmem:[#allocation5 + $0x308] sm:$0xf] }
 0x112   :  { %v3864_v53 = vor.u32 %v5047_v45, %v3863_v44  ;;  %v5167_v44 = vld [vmem:[#allocation7 + $0x98] sm:$0xf0]  ;;  %v4448_v45 = vor.u32 %v5194_v35, %v4447_v34  ;;  %v4399_v22 = vld [vmem:[#allocation7 + $0x108] sm:$0xf]  ;;  %v4291_v34 = vld [vmem:[#allocation7 + $0x30] sm:$0xf] }
 0x113   :  { %1813 = vmatpush.bf16.msrb.mxu2 %v3800_v56  ;;  %1827 = vmatpush.bf16.msra.mxu3 %v3960_v59  ;;  %v4104_v56 = vor.u32 %v5107_v47, %v4103_v46  ;;  %v5042_v59 = vld [vmem:[#allocation5 + $0x2f0] sm:$0xf0]  ;;  %v5132_v46 = vld [vmem:[#allocation5 + $0x5c0] sm:$0xf0]  ;;  %v4435_v47 = vld [vmem:[#allocation7 + $0x150] sm:$0xf] }
 0x114   :  { %1849 = vmatpush.bf16.msrb.mxu1 %v3604_v52  ;;  %v3704_v52 = vor.u32 %v5007_v19, %v3703_v43  ;;  %v3844_v4 = vor.u32 %v5042_v59, %v3843_v58  ;;  %v4224_v43 = vor.u32 %v5137_v33, %v4223_v30  ;;  %v4203_v19 = vld [vmem:[#allocation5 + $0x5b0] sm:$0xf]  ;;  %v4436_v58 = vor.u32 %v5191_v49, %v4435_v47  ;;  %v5127_v59 = vld [vmem:[#allocation5 + $0x598] sm:$0xf0]  ;;  %v5152_v47 = vld [vmem:[#allocation7 + $0x20] sm:$0xf0] }
 0x115   :  { %1837 = vmatpush.bf16.msra.mxu0 %v4200_v61  ;;  %v4083_v61 = vld [vmem:[#allocation5 + $0x4c0] sm:$0xf]  ;;  %v4123_v33 = vld [vmem:[#allocation5 + $0x510] sm:$0xf]  ;;  %v5155_v35 = vld [vmem:[#allocation7 + $0x38] sm:$0xf0] }
 0x116   :  { %1814 = vmatmul.bf16.vlgmr.msrb.gmra.mxu2 %v5543_v9  ;;  %1828 = vmatmul.bf16.vlgmr.msra.gmra.mxu3 %v5551_v60 }
 0x117   :  { %1862 = vmatpush.bf16.msra.mxu2 %v3784_v62  ;;  %1876 = vmatpush.bf16.msrb.mxu3 %v3944_v63  ;;  %v5102_v62 = vld [vmem:[#allocation5 + $0x4d0] sm:$0xf0]  ;;  %v3483_v63 = vld [vmem:[#allocation5 + $0x10] sm:$0xf] }
 0x118   :  { %1850 = vmatpush.bf16.msrb.mxu1 %v3584_v3  ;;  %v3684_v3 = vor.u32 %v5002_v55, %v3683_v54  ;;  %v4084_v6 = vor.u32 %v5102_v62, %v4083_v61  ;;  %v3484_v7 = vor.u32 %v4952_v0, %v3483_v63  ;;  %v4204_v54 = vor.u32 %v5132_v46, %v4203_v19  ;;  %v4183_v55 = vld [vmem:[#allocation5 + $0x588] sm:$0xf]  ;;  %v4423_v61 = vld [vmem:[#allocation7 + $0x138] sm:$0xf]  ;;  %v5188_v62 = vld [vmem:[#allocation7 + $0x140] sm:$0xf0] }
 0x119   :  { %1838 = vmatpush.bf16.msra.mxu0 %v4180_v11  ;;  %v3823_v11 = vld [vmem:[#allocation5 + $0x2b8] sm:$0xf]  ;;  %v4531_v19 = vld [vmem:[#allocation7 + $0x210] sm:$0xf] }
 0x11a   :  { %v3983_v0 = vld [vmem:[#allocation5 + $0x3f8] sm:$0xf] }
 0x11b   :  { %1863 = vmatpush.bf16.msra.mxu2 %v3764_v12  ;;  %1877 = vmatpush.bf16.msrb.mxu3 %v3924_v13  ;;  %v5037_v12 = vld [vmem:[#allocation5 + $0x2c8] sm:$0xf0]  ;;  %v4264_v13 = vor.u32 %v5147_v2, %v4263_v1  ;;  %v4279_v46 = vld [vmem:[#allocation7 + $0x18] sm:$0xf] }
 0x11c   :  { %1851 = vmatpush.bf16.msrb.mxu1 %v3564_v17  ;;  %v5142_v17 = vld [vmem:[#allocation5 + $0x610] sm:$0xf0]  ;;  %v3824_v20 = vor.u32 %v5037_v12, %v3823_v11  ;;  %v5077_v1 = vld [vmem:[#allocation5 + $0x408] sm:$0xf0]  ;;  %v3963_v12 = vld [vmem:[#allocation5 + $0x3d0] sm:$0xf] }
 0x11d   :  { %1839 = vmatpush.bf16.msra.mxu0 %v4160_v24  ;;  %v4064_v24 = vor.u32 %v5097_v15, %v4063_v14  ;;  %v4244_v28 = vor.u32 %v5142_v17, %v4243_v16  ;;  %v5185_v11 = vld [vmem:[#allocation7 + $0x128] sm:$0xf0]  ;;  %v4143_v16 = vld [vmem:[#allocation5 + $0x538] sm:$0xf]  ;;  %v4303_v17 = vld [vmem:[#allocation7 + $0x48] sm:$0xf] }
 0x11f   :  { %1864 = vmatpush.bf16.msra.mxu2 %v3744_v25  ;;  %1878 = vmatpush.bf16.msrb.mxu3 %v3904_v26  ;;  %v5032_v25 = vld [vmem:[#allocation5 + $0x2a0] sm:$0xf0]  ;;  %v4043_v26 = vld [vmem:[#allocation5 + $0x470] sm:$0xf] }
 0x120   :  { %1852 = vmatpush.bf16.msrb.mxu1 %v3544_v31  ;;  %v4351_v31 = vld [vmem:[#allocation7 + $0xa8] sm:$0xf]  ;;  %v4044_v38 = vor.u32 %v5092_v27, %v4043_v26  ;;  %v5218_v26 = vld [vmem:[#allocation7 + $0x230] sm:$0xf0]  ;;  %v5577_v27 = vld [vmem:[%s5649_s4] sm:$0x1f] }
 0x121   :  { %1840 = vmatpush.bf16.msra.mxu0 %v4140_v37  ;;  %v3804_v37 = vor.u32 %v5032_v25, %v3803_v23  ;;  %v4352_v42 = vor.u32 %v5170_v32, %v4351_v31  ;;  %v5182_v23 = vld [vmem:[#allocation7 + $0x110] sm:$0xf0]  ;;  %v4543_v25 = vld [vmem:[#allocation7 + $0x228] sm:$0xf]  ;;  %v4144_v32 = vor.u32 %v5117_v21, %v4143_v16 }
 0x122   :  { %v5206_v16 = vld [vmem:[#allocation7 + $0x1d0] sm:$0xf0] }
 0x123   :  { %1865 = vmatpush.bf16.msra.mxu2 %v3724_v39  ;;  %1879 = vmatpush.bf16.msrb.mxu3 %v3884_v41  ;;  %v4023_v39 = vld [vmem:[#allocation5 + $0x448] sm:$0xf]  ;;  %v5087_v41 = vld [vmem:[#allocation5 + $0x458] sm:$0xf0] }
 0x124   :  { %1853 = vmatpush.bf16.msrb.mxu1 %v3524_v29  ;;  %v4339_v29 = vld [vmem:[#allocation7 + $0x90] sm:$0xf]  ;;  %v4024_v50 = vor.u32 %v5087_v41, %v4023_v39  ;;  %v5179_v41 = vld [vmem:[#allocation7 + $0xf8] sm:$0xf0] }
 0x125   :  { %1841 = vmatpush.bf16.msra.mxu0 %v4120_v51  ;;  %v4003_v51 = vld [vmem:[#allocation5 + $0x420] sm:$0xf]  ;;  %v4387_v39 = vld [vmem:[#allocation7 + $0xf0] sm:$0xf] }
 0x126   :  { %v4388_v49 = vor.u32 %v5179_v41, %v4387_v39 }
 0x127   :  { %1866 = vmatpush.bf16.msra.mxu2 %v3704_v52  ;;  %1880 = vmatpush.bf16.msrb.mxu3 %v3864_v53  ;;  %v5082_v52 = vld [vmem:[#allocation5 + $0x430] sm:$0xf0] }
 0x128   :  { %1854 = vmatpush.bf16.msrb.mxu1 %v3504_v57  ;;  %1842 = vmatmul.bf16.vlgmr.msra.gmra.mxu0 %v5548_v40  ;;  %v5164_v57 = vld [vmem:[#allocation7 + $0x80] sm:$0xf0]  ;;  %v4004_v63 = vor.u32 %v5082_v52, %v4003_v51  ;;  %v4375_v51 = vld [vmem:[#allocation7 + $0xd8] sm:$0xf] }
 0x129   :  { %1890 = vmatpush.bf16.msrb.mxu0 %v4104_v56  ;;  %v4327_v56 = vld [vmem:[#allocation7 + $0x78] sm:$0xf]  ;;  %v5176_v52 = vld [vmem:[#allocation7 + $0xe0] sm:$0xf0] }
 0x12a   :  { %v5570_v53 = vpop.f32.mrf.mxu1  ;;  %v4328_v2 = vor.u32 %v5164_v57, %v4327_v56  ;;  %v4280_v57 = vor.u32 %v5152_v47, %v4279_v46 }
 0x12b   :  { %1867 = vmatpush.bf16.msra.mxu2 %v3684_v3  ;;  %1881 = vmatpush.bf16.msrb.mxu3 %v3844_v4  ;;  %v4184_v3 = vor.u32 %v5127_v59, %v4183_v55  ;;  %v4163_v4 = vld [vmem:[#allocation5 + $0x560] sm:$0xf]  ;;  %v5212_v55 = vld [vmem:[#allocation7 + $0x200] sm:$0xf0] }
 0x12c   :  { %1855 = vmatpush.bf16.msrb.mxu1 %v3484_v7  ;;  %v4424_v7 = vor.u32 %v5188_v62, %v4423_v61  ;;  %v4164_v15 = vor.u32 %v5122_v10, %v4163_v4  ;;  %v4267_v61 = vld [vmem:[#allocation7] sm:$0xf]  ;;  %v5149_v62 = vld [vmem:[#allocation7 + $0x8] sm:$0xf0] }
 0x12d   :  { %1891 = vmatpush.bf16.msrb.mxu0 %v4084_v6  ;;  %v5161_v6 = vld [vmem:[#allocation7 + $0x68] sm:$0xf0] }
 0x12e   :  { %v4316_v14 = vor.u32 %v5161_v6, %v4315_v5  ;;  %v5169_v5 = vld [vmem:[#allocation7 + $0xac] sm:$0xf]  ;;  %v4353_v6 = vld [vmem:[#allocation7 + $0xb4] sm:$0xf0] }
 0x12f   :  { %1868 = vmatpush.bf16.msra.mxu2 %v3664_v18  ;;  %1882 = vmatpush.bf16.msrb.mxu3 %v3824_v20  ;;  %v5158_v18 = vld [vmem:[#allocation7 + $0x50] sm:$0xf0] }
 0x130   :  { %1904 = vmatpush.bf16.msra.mxu1 %v4264_v13  ;;  %v5072_v13 = vld [vmem:[#allocation5 + $0x3e0] sm:$0xf0]  ;;  %v4304_v31 = vor.u32 %v5158_v18, %v4303_v17  ;;  %v5166_v17 = vld [vmem:[#allocation7 + $0x94] sm:$0xf]  ;;  %v4341_v18 = vld [vmem:[#allocation7 + $0x9c] sm:$0xf0] }
 0x131   :  { %1892 = vmatpush.bf16.msrb.mxu0 %v4064_v24  ;;  %1856 = vmatmul.bf16.vlgmr.msrb.gmra.mxu1 %v5537_v48  ;;  %v4340_v48 = vor.u32 %v5167_v44, %v4339_v29  ;;  %v3964_v30 = vor.u32 %v5072_v13, %v3963_v12  ;;  %v5215_v29 = vld [vmem:[#allocation7 + $0x218] sm:$0xf0]  ;;  %v4292_v44 = vor.u32 %v5155_v35, %v4291_v34 }
 0x132   :  { %v1579_v24 = vpop.f32.mrf.mxu1  ;;  %v4356_v13 = vor.u32 %v5169_v5, %v4353_v6  ;;  %v5190_v5 = vld [vmem:[#allocation7 + $0x154] sm:$0xf]  ;;  %v4437_v6 = vld [vmem:[#allocation7 + $0x15c] sm:$0xf0] }
 0x133   :  { %1869 = vmatpush.bf16.msra.mxu2 %v3644_v36  ;;  %1883 = vmatpush.bf16.msrb.mxu3 %v3804_v37  ;;  %v4400_v36 = vor.u32 %v5182_v23, %v4399_v22  ;;  %v5112_v37 = vld [vmem:[#allocation5 + $0x520] sm:$0xf0]  ;;  %v4344_v23 = vor.u32 %v5166_v17, %v4341_v18  ;;  %v4281_v17 = vld [vmem:[#allocation7 + $0x24] sm:$0xf0] }
 0x134   :  { %1905 = vmatpush.bf16.msra.mxu1 %v4244_v28 }
 0x135   :  { %1893 = vmatpush.bf16.msrb.mxu0 %v4044_v38  ;;  %v4544_v38 = vor.u32 %v5218_v26, %v4543_v25 }
 0x136   :  { %1870 = vmatmul.bf16.vlgmr.msra.gmra.mxu2 %v5541_v8  ;;  %1884 = vmatmul.bf16.vlgmr.msrb.gmra.mxu3 %v5543_v9  ;;  %v4411_v8 = vld [vmem:[#allocation7 + $0x120] sm:$0xf]  ;;  %v3984_v9 = vor.u32 %v5077_v1, %v3983_v0 }
 0x137   :  { %2741 = vmatpush.bf16.msrb.mxu2 %v4352_v42  ;;  %2755 = vmatpush.bf16.msra.mxu3 %v4448_v45  ;;  %v4412_v20 = vor.u32 %v5185_v11, %v4411_v8  ;;  %v518_v42 = vperm.slane %v5577_v27, 0  ;;  %v4124_v45 = vor.u32 %v5112_v37, %v4123_v33  ;;  %v5200_v37 = vld [vmem:[#allocation7 + $0x1a0] sm:$0xf0] }
 0x138   :  { %1906 = vmatpush.bf16.msra.mxu1 %v4224_v43  ;;  %v1605_v43 = vpop.f32.mrf.mxu3 }
 0x139   :  { %1894 = vmatpush.bf16.msrb.mxu0 %v4024_v50  ;;  %v1591_v28 = vpop.f32.mrf.mxu2  ;;  %v4532_v50 = vor.u32 %v5215_v29, %v4531_v19  ;;  %v1580_v4 = vadd.f32 %v1579_v24, %v518_v42  ;;  %v4483_v24 = vld [vmem:[#allocation7 + $0x1b0] sm:$0xf]  ;;  %v519_v19 = vperm.slane %v5577_v27, 1 }
 0x13a   :  { %v1633_v59 = vpop.f32.mrf.mxu1 }
 0x13b   :  { %2742 = vmatpush.bf16.msrb.mxu2 %v4340_v48  ;;  %2756 = vmatpush.bf16.msra.mxu3 %v4436_v58  ;;  %v1578_v48 = vadd.f32 %v5570_v53, %v518_v42  ;;  %v4507_v53 = vld [vmem:[#allocation7 + $0x1e0] sm:$0xf]  ;;  %v5160_v42 = vld [vmem:[#allocation7 + $0x64] sm:$0xf] }
 0x13c   :  { %1907 = vmatpush.bf16.msra.mxu1 %v4204_v54  ;;  %v4519_v54 = vld [vmem:[#allocation7 + $0x1f8] sm:$0xf] }
 0x13d   :  { %1895 = vmatpush.bf16.msrb.mxu0 %v4004_v63  ;;  %v1592_v58 = vadd.f32 %v1591_v28, %v1578_v48  ;;  %v4376_v63 = vor.u32 %v5176_v52, %v4375_v51  ;;  %v4520_v1 = vor.u32 %v5212_v55, %v4519_v54  ;;  %v5242_v51 = vld [vmem:[#allocation7 + $0x2f0] sm:$0xf0]  ;;  %v5197_v52 = vld [vmem:[#allocation7 + $0x188] sm:$0xf0]  ;;  %v4305_v54 = vld [vmem:[#allocation7 + $0x54] sm:$0xf0] }
 0x13e   :  { %v5157_v48 = vld [vmem:[#allocation7 + $0x4c] sm:$0xf] }
 0x13f   :  { %2743 = vmatpush.bf16.msrb.mxu2 %v4328_v2  ;;  %2757 = vmatpush.bf16.msra.mxu3 %v4424_v7  ;;  %v4363_v2 = vld [vmem:[#allocation7 + $0xc0] sm:$0xf]  ;;  %v4268_v7 = vor.u32 %v5149_v62, %v4267_v61  ;;  %v1606_v10 = vadd.f32 %v1605_v43, %v1592_v58  ;;  %v4317_v43 = vld [vmem:[#allocation7 + $0x6c] sm:$0xf0]  ;;  %v4449_v58 = vld [vmem:[#allocation7 + $0x174] sm:$0xf0] }
 0x140   :  { %1908 = vmatpush.bf16.msra.mxu1 %v4184_v3  ;;  %v5173_v3 = vld [vmem:[#allocation7 + $0xc8] sm:$0xf0]  ;;  %v1607_v11 = vpop.f32.mrf.mxu3  ;;  %v4320_v47 = vor.u32 %v5160_v42, %v4317_v43  ;;  %v5230_v42 = vld [vmem:[#allocation7 + $0x290] sm:$0xf0] }
 0x141   :  { %1896 = vmatpush.bf16.msrb.mxu0 %v3984_v9  ;;  %v1593_v56 = vpop.f32.mrf.mxu2  ;;  %v4364_v9 = vor.u32 %v5173_v3, %v4363_v2  ;;  %v5154_v3 = vld [vmem:[#allocation7 + $0x34] sm:$0xf] }
 0x142   :  { %v1594_v8 = vadd.f32 %v1593_v56, %v1580_v4  ;;  %v1635_v26 = vpop.f32.mrf.mxu1 }
 0x143   :  { %2744 = vmatpush.bf16.msrb.mxu2 %v4316_v14  ;;  %2758 = vmatpush.bf16.msra.mxu3 %v4412_v20  ;;  %v1619_v0 = vpop.f32.mrf.mxu0  ;;  %v4495_v14 = vld [vmem:[#allocation7 + $0x1c8] sm:$0xf] }
 0x144   :  { %1909 = vmatpush.bf16.msra.mxu1 %v4164_v15  ;;  %v1620_v15 = vadd.f32 %v1619_v0, %v1606_v10  ;;  %v1608_v21 = vadd.f32 %v1607_v11, %v1594_v8  ;;  %v4496_v22 = vor.u32 %v5206_v16, %v4495_v14  ;;  %v4627_v0 = vld [vmem:[#allocation7 + $0x2d0] sm:$0xf]  ;;  %v5236_v14 = vld [vmem:[#allocation7 + $0x2c0] sm:$0xf0]  ;;  %v5151_v16 = vld [vmem:[#allocation7 + $0x1c] sm:$0xf] }
 0x145   :  { %1897 = vmatpush.bf16.msrb.mxu0 %v3964_v30  ;;  %v5203_v30 = vld [vmem:[#allocation7 + $0x1b8] sm:$0xf0] }
 0x146   :  { %v1634_v25 = vadd.f32 %v1633_v59, %v1620_v15  ;;  %v4484_v34 = vor.u32 %v5203_v30, %v4483_v24  ;;  %v4440_v15 = vor.u32 %v5190_v5, %v4437_v6  ;;  %v4603_v24 = vld [vmem:[#allocation7 + $0x2a0] sm:$0xf]  ;;  %v5148_v30 = vld [vmem:[#allocation7 + $0x4] sm:$0xf]  ;;  %v4545_v5 = vld [vmem:[#allocation7 + $0x234] sm:$0xf0] }
 0x147   :  { %2745 = vmatpush.bf16.msrb.mxu2 %v4304_v31  ;;  %2759 = vmatpush.bf16.msra.mxu3 %v4400_v36  ;;  %v5163_v31 = vld [vmem:[#allocation7 + $0x7c] sm:$0xf]  ;;  %v4471_v36 = vld [vmem:[#allocation7 + $0x198] sm:$0xf] }
 0x148   :  { %1910 = vmatpush.bf16.msra.mxu1 %v4144_v32  ;;  %1898 = vmatmul.bf16.vlgmr.msrb.gmra.mxu0 %v5551_v60  ;;  %v5209_v60 = vld [vmem:[#allocation7 + $0x1e8] sm:$0xf0]  ;;  %v4329_v32 = vld [vmem:[#allocation7 + $0x84] sm:$0xf0]  ;;  %v1661_v39 = vpop.f32.mrf.mxu3  ;;  %v4472_v46 = vor.u32 %v5200_v37, %v4471_v36  ;;  %v4413_v36 = vld [vmem:[#allocation7 + $0x12c] sm:$0xf0] }
 0x149   :  { %2769 = vmatpush.bf16.msra.mxu0 %v4544_v38  ;;  %v4508_v12 = vor.u32 %v5209_v60, %v4507_v53  ;;  %v1647_v20 = vpop.f32.mrf.mxu2  ;;  %v4332_v35 = vor.u32 %v5163_v31, %v4329_v32  ;;  %v1918_v38 = vmax.f32 %v1634_v25, 0.0  ;;  %v4293_v53 = vld [vmem:[#allocation7 + $0x3c] sm:$0xf0]  ;;  %v5233_v25 = vld [vmem:[#allocation7 + $0x2a8] sm:$0xf0] }
 0x14a   :  { %v1648_v56 = vadd.f32 %v1647_v20, %v519_v19  ;;  %v4269_v31 = vld [vmem:[#allocation7 + $0xc] sm:$0xf0]  ;;  %v4604_v32 = vor.u32 %v5233_v25, %v4603_v24 }
 0x14b   :  { %2746 = vmatpush.bf16.msrb.mxu2 %v4292_v44  ;;  %2760 = vmatpush.bf16.msra.mxu3 %v4388_v49  ;;  %v4459_v49 = vld [vmem:[#allocation7 + $0x180] sm:$0xf] }
 0x14c   :  { %1911 = vmatpush.bf16.msra.mxu1 %v4124_v45  ;;  %v4460_v62 = vor.u32 %v5197_v52, %v4459_v49  ;;  %v1662_v60 = vadd.f32 %v1661_v39, %v1648_v56  ;;  %v4272_v39 = vor.u32 %v5148_v30, %v4269_v31  ;;  %v4401_v49 = vld [vmem:[#allocation7 + $0x114] sm:$0xf0]  ;;  %v5227_v52 = vld [vmem:[#allocation7 + $0x278] sm:$0xf0]  ;;  %v4389_v56 = vld [vmem:[#allocation7 + $0xfc] sm:$0xf0] }
 0x14d   :  { %2770 = vmatpush.bf16.msra.mxu0 %v4532_v50  ;;  %v4639_v50 = vld [vmem:[#allocation7 + $0x2e8] sm:$0xf]  ;;  %v4723_v31 = vld [vmem:[#allocation7 + $0x390] sm:$0xf] }
 0x14e   :  { %v4640_v55 = vor.u32 %v5242_v51, %v4639_v50  ;;  %v1689_v59 = vpop.f32.mrf.mxu1  ;;  %v4579_v51 = vld [vmem:[#allocation7 + $0x270] sm:$0xf] }
 0x14f   :  { %1912 = vmatmul.bf16.vlgmr.msra.gmra.mxu1 %v5548_v40  ;;  %2747 = vmatpush.bf16.msrb.mxu2 %v4280_v57  ;;  %v1621_v40 = vpop.f32.mrf.mxu0  ;;  %v5193_v57 = vld [vmem:[#allocation7 + $0x16c] sm:$0xf] }
 0x150   :  { %2761 = vmatpush.bf16.msra.mxu3 %v4376_v63  ;;  %v1622_v28 = vadd.f32 %v1621_v40, %v1608_v21  ;;  %2783 = vmatpush.bf16.msrb.mxu1 %v4640_v55  ;;  %v4308_v63 = vor.u32 %v5157_v48, %v4305_v54  ;;  %v4452_v2 = vor.u32 %v5193_v57, %v4449_v58  ;;  %v5187_v21 = vld [vmem:[#allocation7 + $0x13c] sm:$0xf]  ;;  %v4425_v40 = vld [vmem:[#allocation7 + $0x144] sm:$0xf0]  ;;  %v5178_v55 = vld [vmem:[#allocation7 + $0xf4] sm:$0xf] }
 0x151   :  { %2771 = vmatpush.bf16.msra.mxu0 %v4520_v1  ;;  %v1649_v29 = vpop.f32.mrf.mxu2  ;;  %v5239_v1 = vld [vmem:[#allocation7 + $0x2d8] sm:$0xf0]  ;;  %v4580_v54 = vor.u32 %v5227_v52, %v4579_v51  ;;  %v4567_v57 = vld [vmem:[#allocation7 + $0x258] sm:$0xf]  ;;  %v5224_v58 = vld [vmem:[#allocation7 + $0x260] sm:$0xf0] }
 0x152   :  { %v1636_v33 = vadd.f32 %v1635_v26, %v1622_v28  ;;  %v1650_v61 = vadd.f32 %v1649_v29, %v519_v19  ;;  %v4628_v4 = vor.u32 %v5239_v1, %v4627_v0  ;;  %v4428_v28 = vor.u32 %v5187_v21, %v4425_v40  ;;  %v4359_v51 = vld [vmem:[#allocation7 + $0xb0] sm:$0xf] }
 0x153   :  { %2748 = vmatpush.bf16.msrb.mxu2 %v4268_v7  ;;  %v1663_v7 = vpop.f32.mrf.mxu3 }
 0x154   :  { %2762 = vmatpush.bf16.msra.mxu3 %v4364_v9  ;;  %v1923_v41 = vmax.f32 %v1636_v33, 0.0  ;;  %2784 = vmatpush.bf16.msrb.mxu1 %v4628_v4  ;;  %v1664_v8 = vadd.f32 %v1663_v7, %v1650_v61  ;;  %v4568_v61 = vor.u32 %v5224_v58, %v4567_v57  ;;  %v5172_v7 = vld [vmem:[#allocation7 + $0xc4] sm:$0xf] }
 0x155   :  { %2772 = vmatpush.bf16.msra.mxu0 %v4508_v12  ;;  %v4296_v12 = vor.u32 %v5154_v3, %v4293_v53  ;;  %v5221_v3 = vld [vmem:[#allocation7 + $0x248] sm:$0xf0] }
 0x156   :  { %v5584_v44 = vpack.c.bf16 %v1923_v41, %v1918_v38  ;;  %v1691_v26 = vpop.f32.mrf.mxu1  ;;  %v4591_v41 = vld [vmem:[#allocation7 + $0x288] sm:$0xf] }
 0x157   :  { %v1675_v45 = vpop.f32.mrf.mxu0  ;;  %v4592_v19 = vor.u32 %v5230_v42, %v4591_v41  ;;  %v4711_v42 = vld [vmem:[#allocation7 + $0x378] sm:$0xf] }
 0x158   :  { %2811 = vmatpush.bf16.msrb.mxu3 %v4356_v13  ;;  %2749 = vmatmul.bf16.vlgmr.msrb.gmra.mxu2 %v5584_v44  ;;  %v1676_v11 = vadd.f32 %v1675_v45, %v1662_v60  ;;  %v4615_v13 = vld [vmem:[#allocation7 + $0x2b8] sm:$0xf]  ;;  %v5217_v60 = vld [vmem:[#allocation7 + $0x22c] sm:$0xf] }
 0x159   :  { %2773 = vmatpush.bf16.msra.mxu0 %v4496_v22  ;;  %v1703_v10 = vpop.f32.mrf.mxu2  ;;  %v4616_v18 = vor.u32 %v5236_v14, %v4615_v13  ;;  %v4533_v13 = vld [vmem:[#allocation7 + $0x21c] sm:$0xf0] }
 0x15a   :  { %v1690_v22 = vadd.f32 %v1689_v59, %v1676_v11  ;;  %v4392_v59 = vor.u32 %v5178_v55, %v4389_v56  ;;  %v520_v11 = vperm.slane %v5577_v27, 2  ;;  %v4699_v55 = vld [vmem:[#allocation7 + $0x360] sm:$0xf]  ;;  %v5257_v56 = vld [vmem:[#allocation7 + $0x368] sm:$0xf0] }
 0x15b   :  { %2785 = vmatpush.bf16.msrb.mxu1 %v4616_v18  ;;  %v1717_v45 = vpop.f32.mrf.mxu3  ;;  %v4735_v18 = vld [vmem:[#allocation7 + $0x3a8] sm:$0xf]  ;;  %v4700_v57 = vor.u32 %v5257_v56, %v4699_v55  ;;  %v5156_v55 = vld [vmem:[#allocation7 + $0x40] sm:$0xf0] }
 0x15c   :  { %2812 = vmatpush.bf16.msrb.mxu3 %v4344_v23  ;;  %v4284_v23 = vor.u32 %v5151_v16, %v4281_v17  ;;  %v1704_v33 = vadd.f32 %v1703_v10, %v1690_v22  ;;  %v4365_v10 = vld [vmem:[#allocation7 + $0xcc] sm:$0xf0]  ;;  %v5211_v22 = vld [vmem:[#allocation7 + $0x1fc] sm:$0xf] }
 0x15d   :  { %2774 = vmatpush.bf16.msra.mxu0 %v4484_v34 }
 0x15e   :  { %v1919_v29 = vmax.f32 %v1704_v33, 0.0 }
 0x15f   :  { %v1677_v9 = vpop.f32.mrf.mxu0  ;;  %2786 = vmatpush.bf16.msrb.mxu1 %v4604_v32  ;;  %v5263_v32 = vld [vmem:[#allocation7 + $0x398] sm:$0xf0] }
 0x160   :  { %2813 = vmatpush.bf16.msrb.mxu3 %v4332_v35  ;;  %v1678_v20 = vadd.f32 %v1677_v9, %v1664_v8  ;;  %v5184_v35 = vld [vmem:[#allocation7 + $0x124] sm:$0xf]  ;;  %v4548_v8 = vor.u32 %v5217_v60, %v4545_v5  ;;  %v4368_v9 = vor.u32 %v5172_v7, %v4365_v10  ;;  %v4687_v5 = vld [vmem:[#allocation7 + $0x348] sm:$0xf]  ;;  %v5199_v10 = vld [vmem:[#allocation7 + $0x19c] sm:$0xf] }
 0x161   :  { %2775 = vmatpush.bf16.msra.mxu0 %v4472_v46  ;;  %v1705_v37 = vpop.f32.mrf.mxu2  ;;  %v4416_v43 = vor.u32 %v5184_v35, %v4413_v36  ;;  %v4724_v35 = vor.u32 %v5263_v32, %v4723_v31  ;;  %v5208_v36 = vld [vmem:[#allocation7 + $0x1e4] sm:$0xf]  ;;  %v4663_v32 = vld [vmem:[#allocation7 + $0x318] sm:$0xf] }
 0x162   :  { %v1692_v34 = vadd.f32 %v1691_v26, %v1678_v20  ;;  %v5266_v20 = vld [vmem:[#allocation7 + $0x3b0] sm:$0xf0] }
 0x163   :  { %2787 = vmatpush.bf16.msrb.mxu1 %v4592_v19  ;;  %v1719_v0 = vpop.f32.mrf.mxu3  ;;  %v4736_v40 = vor.u32 %v5266_v20, %v4735_v18  ;;  %v5251_v18 = vld [vmem:[#allocation7 + $0x338] sm:$0xf0] }
 0x164   :  { %2814 = vmatpush.bf16.msrb.mxu3 %v4320_v47  ;;  %v1706_v38 = vadd.f32 %v1705_v37, %v1692_v34  ;;  %v5181_v47 = vld [vmem:[#allocation7 + $0x10c] sm:$0xf]  ;;  %v1720_v26 = vadd.f32 %v1719_v0, %v520_v11  ;;  %v4509_v37 = vld [vmem:[#allocation7 + $0x1ec] sm:$0xf0] }
 0x165   :  { %2776 = vmatpush.bf16.msra.mxu0 %v4460_v62  ;;  %v4404_v48 = vor.u32 %v5181_v47, %v4401_v49  ;;  %v5175_v62 = vld [vmem:[#allocation7 + $0xdc] sm:$0xf]  ;;  %2797 = vmatpush.bf16.msra.mxu2 %v4736_v40  ;;  %v4497_v47 = vld [vmem:[#allocation7 + $0x1d4] sm:$0xf0]  ;;  %v4461_v40 = vld [vmem:[#allocation7 + $0x18c] sm:$0xf0] }
 0x166   :  { %v1924_v46 = vmax.f32 %v1706_v38, 0.0  ;;  %v4512_v38 = vor.u32 %v5208_v36, %v4509_v37  ;;  %v4701_v36 = vld [vmem:[#allocation7 + $0x36c] sm:$0xf0] }
 0x167   :  { %2788 = vmatpush.bf16.msrb.mxu1 %v4580_v54  ;;  %v1731_v1 = vpop.f32.mrf.mxu0  ;;  %v5171_v54 = vld [vmem:[#allocation7 + $0xb8] sm:$0xf0] }
 0x168   :  { %2815 = vmatpush.bf16.msrb.mxu3 %v4308_v63  ;;  %v5587_v50 = vpack.c.bf16 %v1924_v46, %v1919_v29  ;;  %v4377_v63 = vld [vmem:[#allocation7 + $0xe4] sm:$0xf0]  ;;  %v5205_v46 = vld [vmem:[#allocation7 + $0x1cc] sm:$0xf] }
 0x169   :  { %2825 = vmatpush.bf16.msrb.mxu0 %v4452_v2  ;;  %v4555_v2 = vld [vmem:[#allocation7 + $0x240] sm:$0xf]  ;;  %v4380_v53 = vor.u32 %v5175_v62, %v4377_v63  ;;  %2798 = vmatpush.bf16.msra.mxu2 %v4724_v35  ;;  %v4500_v52 = vor.u32 %v5205_v46, %v4497_v47  ;;  %v4360_v63 = vor.u32 %v5171_v54, %v4359_v51  ;;  %v5256_v35 = vld [vmem:[#allocation7 + $0x364] sm:$0xf]  ;;  %v4641_v46 = vld [vmem:[#allocation7 + $0x2f4] sm:$0xf0] }
 0x16a   :  { %2763 = vmatmul.bf16.vlgmr.msra.gmra.mxu3 %v5587_v50  ;;  %v4556_v4 = vor.u32 %v5221_v3, %v4555_v2  ;;  %v4485_v62 = vld [vmem:[#allocation7 + $0x1bc] sm:$0xf0]  ;;  %v4737_v2 = vld [vmem:[#allocation7 + $0x3b4] sm:$0xf0]  ;;  %v5253_v47 = vld [vmem:[#allocation7 + $0x34c] sm:$0xf] }
 0x16b   :  { %2789 = vmatpush.bf16.msrb.mxu1 %v4568_v61  ;;  %v5202_v61 = vld [vmem:[#allocation7 + $0x1b4] sm:$0xf]  ;;  %v4299_v54 = vld [vmem:[#allocation7 + $0x38] sm:$0xf] }
 0x16c   :  { %2816 = vmatpush.bf16.msrb.mxu3 %v4296_v12  ;;  %v5214_v12 = vld [vmem:[#allocation7 + $0x214] sm:$0xf]  ;;  %v4488_v0 = vor.u32 %v5202_v61, %v4485_v62  ;;  %v4629_v61 = vld [vmem:[#allocation7 + $0x2dc] sm:$0xf0] }
 0x16d   :  { %2826 = vmatpush.bf16.msrb.mxu0 %v4440_v15  ;;  %v4536_v14 = vor.u32 %v5214_v12, %v4533_v13  ;;  %v1718_v15 = vadd.f32 %v1717_v45, %v520_v11  ;;  %v5262_v11 = vld [vmem:[#allocation7 + $0x394] sm:$0xf]  ;;  %v4725_v13 = vld [vmem:[#allocation7 + $0x39c] sm:$0xf0] }
 0x16e   :  { %v1745_v6 = vpop.f32.mrf.mxu1  ;;  %v5250_v62 = vld [vmem:[#allocation7 + $0x334] sm:$0xf] }
 0x16f   :  { %2790 = vmatpush.bf16.msrb.mxu1 %v4556_v4  ;;  %v1732_v21 = vadd.f32 %v1731_v1, %v1718_v15  ;;  %v1733_v24 = vpop.f32.mrf.mxu0  ;;  %v5265_v1 = vld [vmem:[#allocation7 + $0x3ac] sm:$0xf]  ;;  %v5168_v4 = vld [vmem:[#allocation7 + $0xa0] sm:$0xf0] }
 0x170   :  { %2817 = vmatpush.bf16.msrb.mxu3 %v4284_v23  ;;  %v4521_v23 = vld [vmem:[#allocation7 + $0x204] sm:$0xf0]  ;;  %v1734_v33 = vadd.f32 %v1733_v24, %v1720_v26  ;;  %v4740_v60 = vor.u32 %v5265_v1, %v4737_v2  ;;  %v5165_v15 = vld [vmem:[#allocation7 + $0x88] sm:$0xf0]  ;;  %v4677_v1 = vld [vmem:[#allocation7 + $0x33c] sm:$0xf0] }
 0x171   :  { %2827 = vmatpush.bf16.msrb.mxu0 %v4428_v28  ;;  %v4524_v25 = vor.u32 %v5211_v22, %v4521_v23  ;;  %v1746_v28 = vadd.f32 %v1745_v6, %v1732_v21  ;;  %v5254_v6 = vld [vmem:[#allocation7 + $0x350] sm:$0xf0]  ;;  %v5196_v21 = vld [vmem:[#allocation7 + $0x184] sm:$0xf]  ;;  %v5259_v22 = vld [vmem:[#allocation7 + $0x37c] sm:$0xf] }
 0x172   :  { %v4688_v7 = vor.u32 %v5254_v6, %v4687_v5  ;;  %v4713_v26 = vld [vmem:[#allocation7 + $0x384] sm:$0xf0]  ;;  %v4287_v2 = vld [vmem:[#allocation7 + $0x20] sm:$0xf]  ;;  %v5235_v6 = vld [vmem:[#allocation7 + $0x2bc] sm:$0xf] }
 0x173   :  { %2839 = vmatpush.bf16.msra.mxu1 %v4548_v8  ;;  %v4473_v8 = vld [vmem:[#allocation7 + $0x1a4] sm:$0xf0]  ;;  %v4716_v31 = vor.u32 %v5259_v22, %v4713_v26  ;;  %v5232_v22 = vld [vmem:[#allocation7 + $0x2a4] sm:$0xf] }
 0x174   :  { %2818 = vmatpush.bf16.msrb.mxu3 %v4272_v39  ;;  %v4476_v12 = vor.u32 %v5199_v10, %v4473_v8  ;;  %v5247_v10 = vld [vmem:[#allocation7 + $0x31c] sm:$0xf] }
 0x175   :  { %2828 = vmatpush.bf16.msrb.mxu0 %v4416_v43  ;;  %v5260_v43 = vld [vmem:[#allocation7 + $0x380] sm:$0xf0] }
 0x176   :  { %v1747_v30 = vpop.f32.mrf.mxu1  ;;  %v4712_v45 = vor.u32 %v5260_v43, %v4711_v42  ;;  %v4651_v43 = vld [vmem:[#allocation7 + $0x300] sm:$0xf] }
 0x177   :  { %2840 = vmatpush.bf16.msra.mxu1 %v4536_v14  ;;  %v1748_v39 = vadd.f32 %v1747_v30, %v1734_v33  ;;  %v4335_v14 = vld [vmem:[#allocation7 + $0x80] sm:$0xf]  ;;  %v5162_v30 = vld [vmem:[#allocation7 + $0x70] sm:$0xf0]  ;;  %v5248_v33 = vld [vmem:[#allocation7 + $0x320] sm:$0xf0] }
 0x178   :  { %2799 = vmatpush.bf16.msra.mxu2 %v4712_v45  ;;  %2867 = vmatpush.bf16.msra.mxu3 %v4740_v60  ;;  %v4336_v24 = vor.u32 %v5165_v15, %v4335_v14  ;;  %v5241_v45 = vld [vmem:[#allocation7 + $0x2ec] sm:$0xf] }
 0x179   :  { %2829 = vmatpush.bf16.msrb.mxu0 %v4404_v48  ;;  %v1759_v16 = vpop.f32.mrf.mxu2  ;;  %v1773_v17 = vpop.f32.mrf.mxu3 }
 0x17a   :  { %2819 = vmatmul.bf16.vlgmr.msrb.gmra.mxu3 %v5584_v44  ;;  %v1760_v34 = vadd.f32 %v1759_v16, %v1746_v28  ;;  %v4728_v16 = vor.u32 %v5262_v11, %v4725_v13  ;;  %v4323_v28 = vld [vmem:[#allocation7 + $0x68] sm:$0xf] }
 0x17b   :  { %2841 = vmatpush.bf16.msra.mxu1 %v4524_v25  ;;  %v4464_v25 = vor.u32 %v5196_v21, %v4461_v40  ;;  %v4324_v37 = vor.u32 %v5162_v30, %v4323_v28  ;;  %v4665_v13 = vld [vmem:[#allocation7 + $0x324] sm:$0xf0]  ;;  %v4653_v30 = vld [vmem:[#allocation7 + $0x30c] sm:$0xf0] }
 0x17c   :  { %v1774_v19 = vadd.f32 %v1773_v17, %v1760_v34  ;;  %2800 = vmatpush.bf16.msra.mxu2 %v4700_v57  ;;  %v4675_v17 = vld [vmem:[#allocation7 + $0x330] sm:$0xf]  ;;  %2868 = vmatpush.bf16.msra.mxu3 %v4728_v16  ;;  %v4664_v34 = vor.u32 %v5248_v33, %v4663_v32  ;;  %v521_v57 = vperm.slane %v5577_v27, 3  ;;  %v5150_v16 = vld [vmem:[#allocation7 + $0x10] sm:$0xf0] }
 0x17d   :  { %2830 = vmatpush.bf16.msrb.mxu0 %v4392_v59  ;;  %v4676_v20 = vor.u32 %v5251_v18, %v4675_v17  ;;  %v4743_v17 = vld [vmem:[#allocation7 + $0x3b0] sm:$0xf]  ;;  %v5267_v18 = vld [vmem:[#allocation7 + $0x3b8] sm:$0xf0] }
 0x17e   :  { %v1920_v58 = vmax.f32 %v1774_v19, 0.0  ;;  %v5245_v19 = vld [vmem:[#allocation7 + $0x308] sm:$0xf0]  ;;  %v4647_v33 = vld [vmem:[#allocation7 + $0x2f0] sm:$0xf] }
 0x17f   :  { %2842 = vmatpush.bf16.msra.mxu1 %v4512_v38  ;;  %v4704_v38 = vor.u32 %v5256_v35, %v4701_v36  ;;  %v4744_v35 = vor.u32 %v5267_v18, %v4743_v17  ;;  %v5243_v36 = vld [vmem:[#allocation7 + $0x2f8] sm:$0xf0]  ;;  %v4431_v17 = vld [vmem:[#allocation7 + $0x140] sm:$0xf]  ;;  %v4695_v18 = vld [vmem:[#allocation7 + $0x350] sm:$0xf] }
 0x180   :  { %2801 = vmatpush.bf16.msra.mxu2 %v4688_v7  ;;  %2869 = vmatpush.bf16.msra.mxu3 %v4716_v31  ;;  %v4617_v7 = vld [vmem:[#allocation7 + $0x2c4] sm:$0xf0] }
 0x181   :  { %2831 = vmatpush.bf16.msrb.mxu0 %v4380_v53  ;;  %v1761_v41 = vpop.f32.mrf.mxu2  ;;  %v1775_v49 = vpop.f32.mrf.mxu3  ;;  %v4347_v53 = vld [vmem:[#allocation7 + $0x98] sm:$0xf] }
 0x182   :  { %v1762_v29 = vadd.f32 %v1761_v41, %v1748_v39  ;;  %v4311_v39 = vld [vmem:[#allocation7 + $0x50] sm:$0xf]  ;;  %v5159_v41 = vld [vmem:[#allocation7 + $0x58] sm:$0xf0] }
 0x183   :  { %2843 = vmatpush.bf16.msra.mxu1 %v4500_v52  ;;  %v4312_v51 = vor.u32 %v5159_v41, %v4311_v39  ;;  %v4644_v52 = vor.u32 %v5241_v45, %v4641_v46  ;;  %v4648_v39 = vor.u32 %v5243_v36, %v4647_v33  ;;  %v4635_v45 = vld [vmem:[#allocation7 + $0x2d8] sm:$0xf] }
 0x184   :  { %v1776_v48 = vadd.f32 %v1775_v49, %v1762_v29  ;;  %2802 = vmatpush.bf16.msra.mxu2 %v4676_v20  ;;  %2870 = vmatpush.bf16.msra.mxu3 %v4704_v38  ;;  %v4652_v29 = vor.u32 %v5245_v19, %v4651_v43  ;;  %v4668_v20 = vor.u32 %v5247_v10, %v4665_v13  ;;  %v5264_v38 = vld [vmem:[#allocation7 + $0x3a0] sm:$0xf0]  ;;  %v4593_v43 = vld [vmem:[#allocation7 + $0x294] sm:$0xf0]  ;;  %v5234_v13 = vld [vmem:[#allocation7 + $0x2b0] sm:$0xf0] }
 0x185   :  { %2832 = vmatpush.bf16.msrb.mxu0 %v4368_v9  ;;  %v4348_v9 = vor.u32 %v5168_v4, %v4347_v53  ;;  %v1787_v23 = vpop.f32.mrf.mxu0  ;;  %v5153_v53 = vld [vmem:[#allocation7 + $0x28] sm:$0xf0]  ;;  %v4680_v4 = vor.u32 %v5250_v62, %v4677_v1  ;;  %v4587_v36 = vld [vmem:[#allocation7 + $0x278] sm:$0xf] }
 0x186   :  { %v1925_v59 = vmax.f32 %v1776_v48, 0.0  ;;  %v4689_v48 = vld [vmem:[#allocation7 + $0x354] sm:$0xf0]  ;;  %v1788_v5 = vadd.f32 %v1787_v23, %v521_v57  ;;  %v4288_v11 = vor.u32 %v5153_v53, %v4287_v2  ;;  %v4605_v23 = vld [vmem:[#allocation7 + $0x2ac] sm:$0xf0] }
 0x187   :  { %2844 = vmatpush.bf16.msra.mxu1 %v4488_v0  ;;  %v4692_v56 = vor.u32 %v5253_v47, %v4689_v48  ;;  %v4608_v28 = vor.u32 %v5232_v22, %v4605_v23  ;;  %v5237_v53 = vld [vmem:[#allocation7 + $0x2c8] sm:$0xf0]  ;;  %v5220_v22 = vld [vmem:[#allocation7 + $0x244] sm:$0xf]  ;;  %v4557_v23 = vld [vmem:[#allocation7 + $0x24c] sm:$0xf0] }
 0x188   :  { %v5592_v3 = vpack.c.bf16 %v1925_v59, %v1920_v58  ;;  %2803 = vmatpush.bf16.msra.mxu2 %v4664_v34  ;;  %v5238_v59 = vld [vmem:[#allocation7 + $0x2d4] sm:$0xf] }
 0x189   :  { %2871 = vmatpush.bf16.msra.mxu3 %v4692_v56  ;;  %v4632_v0 = vor.u32 %v5238_v59, %v4629_v61  ;;  %v5226_v56 = vld [vmem:[#allocation7 + $0x274] sm:$0xf]  ;;  %v4455_v59 = vld [vmem:[#allocation7 + $0x170] sm:$0xf]  ;;  %v5195_v61 = vld [vmem:[#allocation7 + $0x178] sm:$0xf0] }
 0x18a   :  { %2777 = vmatmul.bf16.vlgmr.msra.gmra.mxu0 %v5592_v3 }
 0x18b   :  { %2881 = vmatpush.bf16.msra.mxu0 %v4360_v63  ;;  %2845 = vmatpush.bf16.msra.mxu1 %v4476_v12  ;;  %v4300_v63 = vor.u32 %v5156_v55, %v4299_v54  ;;  %v4620_v12 = vor.u32 %v5235_v6, %v4617_v7  ;;  %v5261_v54 = vld [vmem:[#allocation7 + $0x388] sm:$0xf0]  ;;  %v5258_v6 = vld [vmem:[#allocation7 + $0x370] sm:$0xf0] }
 0x18c   :  { %2804 = vmatpush.bf16.msra.mxu2 %v4652_v29 }
 0x18d   :  { %v1789_v58 = vpop.f32.mrf.mxu0  ;;  %2872 = vmatpush.bf16.msra.mxu3 %v4680_v4  ;;  %v4456_v4 = vor.u32 %v5195_v61, %v4455_v59  ;;  %v5180_v59 = vld [vmem:[#allocation7 + $0x100] sm:$0xf0] }
 0x18e   :  { %v1801_v42 = vpop.f32.mrf.mxu1  ;;  %v1790_v15 = vadd.f32 %v1789_v58, %v521_v57  ;;  %v4581_v57 = vld [vmem:[#allocation7 + $0x27c] sm:$0xf0] }
 0x18f   :  { %2882 = vmatpush.bf16.msra.mxu0 %v4348_v9  ;;  %2846 = vmatpush.bf16.msra.mxu1 %v4464_v25  ;;  %v4275_v9 = vld [vmem:[#allocation7 + $0x8] sm:$0xf]  ;;  %v1802_v14 = vadd.f32 %v1801_v42, %v1788_v5  ;;  %v5229_v42 = vld [vmem:[#allocation7 + $0x28c] sm:$0xf]  ;;  %v4584_v62 = vor.u32 %v5226_v56, %v4581_v57  ;;  %v5246_v56 = vld [vmem:[#allocation7 + $0x310] sm:$0xf0] }
 0x190   :  { %2853 = vmatpush.bf16.msrb.mxu2 %v4644_v52  ;;  %v4276_v31 = vor.u32 %v5150_v16, %v4275_v9  ;;  %v4596_v29 = vor.u32 %v5229_v42, %v4593_v43  ;;  %v5240_v52 = vld [vmem:[#allocation7 + $0x2e0] sm:$0xf0]  ;;  %v4707_v5 = vld [vmem:[#allocation7 + $0x368] sm:$0xf]  ;;  %v4671_v43 = vld [vmem:[#allocation7 + $0x320] sm:$0xf] }
 0x191   :  { %2873 = vmatpush.bf16.msra.mxu3 %v4668_v20  ;;  %v4636_v55 = vor.u32 %v5240_v52, %v4635_v45  ;;  %v5255_v20 = vld [vmem:[#allocation7 + $0x358] sm:$0xf0] }
 0x192   :  { %v5183_v45 = vld [vmem:[#allocation7 + $0x118] sm:$0xf0] }
 0x193   :  { %2883 = vmatpush.bf16.msra.mxu0 %v4336_v24  ;;  %v5244_v24 = vld [vmem:[#allocation7 + $0x304] sm:$0xf] }
 0x194   :  { %2854 = vmatpush.bf16.msrb.mxu2 %v4632_v0  ;;  %v4656_v32 = vor.u32 %v5244_v24, %v4653_v30  ;;  %v4560_v24 = vor.u32 %v5220_v22, %v4557_v23  ;;  %v4551_v22 = vld [vmem:[#allocation7 + $0x230] sm:$0xf]  ;;  %v5219_v23 = vld [vmem:[#allocation7 + $0x238] sm:$0xf0] }
 0x196   :  { %v1803_v8 = vpop.f32.mrf.mxu1  ;;  %2874 = vmatpush.bf16.msra.mxu3 %v4656_v32  ;;  %v5252_v32 = vld [vmem:[#allocation7 + $0x340] sm:$0xf0] }
 0x197   :  { %2884 = vmatpush.bf16.msra.mxu0 %v4324_v37  ;;  %v1804_v25 = vadd.f32 %v1803_v8, %v1790_v15  ;;  %v4731_v37 = vld [vmem:[#allocation7 + $0x398] sm:$0xf]  ;;  %v5192_v8 = vld [vmem:[#allocation7 + $0x160] sm:$0xf0] }
 0x198   :  { %2855 = vmatpush.bf16.msrb.mxu2 %v4620_v12  ;;  %v4611_v12 = vld [vmem:[#allocation7 + $0x2a8] sm:$0xf] }
 0x199   :  { %v1815_v49 = vpop.f32.mrf.mxu2  ;;  %v1829_v60 = vpop.f32.mrf.mxu3  ;;  %v4612_v15 = vor.u32 %v5234_v13, %v4611_v12 }
 0x19a   :  { %2833 = vmatmul.bf16.vlgmr.msrb.gmra.mxu0 %v5587_v50  ;;  %v1816_v26 = vadd.f32 %v1815_v49, %v1802_v14  ;;  %2923 = vmatpush.bf16.msrb.mxu3 %v4648_v39  ;;  %v4732_v49 = vor.u32 %v5264_v38, %v4731_v37  ;;  %v4708_v14 = vor.u32 %v5258_v6, %v4707_v5  ;;  %v5228_v37 = vld [vmem:[#allocation7 + $0x280] sm:$0xf0] }
 0x19b   :  { %2885 = vmatpush.bf16.msra.mxu0 %v4312_v51  ;;  %v4719_v51 = vld [vmem:[#allocation7 + $0x380] sm:$0xf] }
 0x19c   :  { %2856 = vmatpush.bf16.msrb.mxu2 %v4608_v28  ;;  %v1830_v41 = vadd.f32 %v1829_v60, %v1816_v26  ;;  %v4720_v2 = vor.u32 %v5261_v54, %v4719_v51  ;;  %v4443_v60 = vld [vmem:[#allocation7 + $0x158] sm:$0xf]  ;;  %v4696_v26 = vor.u32 %v5255_v20, %v4695_v18  ;;  %v5231_v28 = vld [vmem:[#allocation7 + $0x298] sm:$0xf0] }
 0x19d   :  { %v4444_v16 = vor.u32 %v5192_v8, %v4443_v60  ;;  %v5177_v60 = vld [vmem:[#allocation7 + $0xe8] sm:$0xf0] }
 0x19e   :  { %2924 = vmatpush.bf16.msrb.mxu3 %v4636_v55  ;;  %v4659_v55 = vld [vmem:[#allocation7 + $0x308] sm:$0xf] }
 0x19f   :  { %2886 = vmatpush.bf16.msra.mxu0 %v4300_v63  ;;  %v4623_v63 = vld [vmem:[#allocation7 + $0x2c0] sm:$0xf] }
 0x1a0   :  { %2857 = vmatpush.bf16.msrb.mxu2 %v4596_v29  ;;  %v4624_v7 = vor.u32 %v5237_v53, %v4623_v63  ;;  %v4407_v29 = vld [vmem:[#allocation7 + $0x110] sm:$0xf]  ;;  %v5222_v63 = vld [vmem:[#allocation7 + $0x250] sm:$0xf0] }
 0x1a1   :  { %v1817_v21 = vpop.f32.mrf.mxu2  ;;  %v1831_v19 = vpop.f32.mrf.mxu3  ;;  %v4408_v54 = vor.u32 %v5183_v45, %v4407_v29  ;;  %v4479_v29 = vld [vmem:[#allocation7 + $0x1a0] sm:$0xf]  ;;  %v5201_v45 = vld [vmem:[#allocation7 + $0x1a8] sm:$0xf0] }
 0x1a2   :  { %v1818_v34 = vadd.f32 %v1817_v21, %v1804_v25  ;;  %2925 = vmatpush.bf16.msrb.mxu3 %v4624_v7  ;;  %v4599_v25 = vld [vmem:[#allocation7 + $0x290] sm:$0xf] }
 0x1a3   :  { %2887 = vmatpush.bf16.msra.mxu0 %v4288_v11  ;;  %v4569_v11 = vld [vmem:[#allocation7 + $0x264] sm:$0xf0]  ;;  %v4600_v33 = vor.u32 %v5231_v28, %v4599_v25 }
 0x1a4   :  { %v1832_v46 = vadd.f32 %v1831_v19, %v1818_v34  ;;  %2858 = vmatpush.bf16.msrb.mxu2 %v4584_v62  ;;  %v4419_v34 = vld [vmem:[#allocation7 + $0x128] sm:$0xf]  ;;  %v5249_v19 = vld [vmem:[#allocation7 + $0x328] sm:$0xf0] }
 0x1a5   :  { %v1843_v40 = vpop.f32.mrf.mxu0  ;;  %v4672_v51 = vor.u32 %v5249_v19, %v4671_v43  ;;  %v4563_v62 = vld [vmem:[#allocation7 + $0x248] sm:$0xf]  ;;  %v5204_v43 = vld [vmem:[#allocation7 + $0x1c0] sm:$0xf0] }
 0x1a6   :  { %v1844_v47 = vadd.f32 %v1843_v40, %v1830_v41  ;;  %v5189_v40 = vld [vmem:[#allocation7 + $0x148] sm:$0xf0]  ;;  %2926 = vmatpush.bf16.msrb.mxu3 %v4612_v15  ;;  %v4588_v41 = vor.u32 %v5228_v37, %v4587_v36  ;;  %v4515_v36 = vld [vmem:[#allocation7 + $0x1e8] sm:$0xf]  ;;  %v5210_v37 = vld [vmem:[#allocation7 + $0x1f0] sm:$0xf0] }
 0x1a7   :  { %2888 = vmatpush.bf16.msra.mxu0 %v4276_v31  ;;  %v4432_v30 = vor.u32 %v5189_v40, %v4431_v17  ;;  %v4683_v31 = vld [vmem:[#allocation7 + $0x338] sm:$0xf] }
 0x1a8   :  { %v1921_v0 = vmax.f32 %v1844_v47, 0.0  ;;  %v4684_v39 = vor.u32 %v5252_v32, %v4683_v31  ;;  %v5225_v47 = vld [vmem:[#allocation7 + $0x268] sm:$0xf0]  ;;  %v5216_v31 = vld [vmem:[#allocation7 + $0x220] sm:$0xf0] }
 0x1aa   :  { %2889 = vmatmul.bf16.vlgmr.msra.gmra.mxu0 %v5584_v44  ;;  %v5223_v44 = vld [vmem:[#allocation7 + $0x25c] sm:$0xf]  ;;  %2927 = vmatpush.bf16.msrb.mxu3 %v4600_v33  ;;  %v4527_v33 = vld [vmem:[#allocation7 + $0x200] sm:$0xf] }
 0x1ab   :  { %2937 = vmatpush.bf16.msrb.mxu0 %v4744_v35  ;;  %v4572_v9 = vor.u32 %v5223_v44, %v4569_v11  ;;  %v5186_v35 = vld [vmem:[#allocation7 + $0x130] sm:$0xf0]  ;;  %v4371_v11 = vld [vmem:[#allocation7 + $0xc8] sm:$0xf] }
 0x1ac   :  { %v4420_v42 = vor.u32 %v5186_v35, %v4419_v34  ;;  %v5213_v34 = vld [vmem:[#allocation7 + $0x208] sm:$0xf0] }
 0x1ad   :  { %v1845_v48 = vpop.f32.mrf.mxu0  ;;  %2859 = vmatpush.bf16.msrb.mxu2 %v4572_v9  ;;  %v5174_v9 = vld [vmem:[#allocation7 + $0xd0] sm:$0xf0]  ;;  %v4528_v35 = vor.u32 %v5213_v34, %v4527_v33  ;;  %v5269_v33 = vld [vmem:[#allocation8 + $0x4] sm:$0xf0] }
 0x1ae   :  { %v1846_v58 = vadd.f32 %v1845_v48, %v1832_v46  ;;  %v1857_v21 = vpop.f32.mrf.mxu1  ;;  %2928 = vmatpush.bf16.msrb.mxu3 %v4588_v41  ;;  %v4575_v46 = vld [vmem:[#allocation7 + $0x260] sm:$0xf]  ;;  %v522_v48 = vperm.slane %v5577_v27, 4  ;;  %v4372_v17 = vor.u32 %v5174_v9, %v4371_v11  ;;  %v5207_v41 = vld [vmem:[#allocation7 + $0x1d8] sm:$0xf0] }
 0x1af   :  { %2938 = vmatpush.bf16.msrb.mxu0 %v4732_v49  ;;  %v4576_v52 = vor.u32 %v5225_v47, %v4575_v46  ;;  %v4480_v46 = vor.u32 %v5201_v45, %v4479_v29  ;;  %v4467_v47 = vld [vmem:[#allocation7 + $0x188] sm:$0xf]  ;;  %v4789_v11 = vld [vmem:[#allocation8 + $0x58] sm:$0xf0]  ;;  %v4861_v29 = vld [vmem:[#allocation8 + $0xe8] sm:$0xf0] }
 0x1b0   :  { %v1926_v1 = vmax.f32 %v1846_v58, 0.0  ;;  %v4395_v58 = vld [vmem:[#allocation7 + $0xf8] sm:$0xf]  ;;  %v4835_v45 = vld [vmem:[#allocation8 + $0xb0] sm:$0xf] }
 0x1b1   :  { %2860 = vmatpush.bf16.msrb.mxu2 %v4560_v24  ;;  %v4396_v53 = vor.u32 %v5180_v59, %v4395_v58  ;;  %v5279_v58 = vld [vmem:[#allocation8 + $0x54] sm:$0xf0] }
 0x1b2   :  { %v5598_v10 = vpack.c.bf16 %v1926_v1, %v1921_v0  ;;  %2929 = vmatpush.bf16.msrb.mxu3 %v4576_v52  ;;  %v4660_v0 = vor.u32 %v5246_v56, %v4659_v55  ;;  %v4564_v1 = vor.u32 %v5222_v63, %v4563_v62  ;;  %v4803_v52 = vld [vmem:[#allocation8 + $0x70] sm:$0xf]  ;;  %v4795_v55 = vld [vmem:[#allocation8 + $0x60] sm:$0xf]  ;;  %v5281_v56 = vld [vmem:[#allocation8 + $0x64] sm:$0xf0] }
 0x1b3   :  { %2939 = vmatpush.bf16.msrb.mxu0 %v4720_v2  ;;  %v1858_v2 = vadd.f32 %v1857_v21, %v522_v48  ;;  %v4805_v62 = vld [vmem:[#allocation8 + $0x78] sm:$0xf0] }
 0x1b4   :  { %2791 = vmatmul.bf16.vlgmr.msrb.gmra.mxu1 %v5598_v10 }
 0x1b5   :  { %2895 = vmatpush.bf16.msrb.mxu1 %v4456_v4  ;;  %v4383_v4 = vld [vmem:[#allocation7 + $0xe0] sm:$0xf] }
 0x1b6   :  { %v1859_v49 = vpop.f32.mrf.mxu1  ;;  %2930 = vmatpush.bf16.msrb.mxu3 %v4564_v1  ;;  %v4384_v44 = vor.u32 %v5177_v60, %v4383_v4  ;;  %v5277_v1 = vld [vmem:[#allocation8 + $0x44] sm:$0xf0]  ;;  %v5275_v4 = vld [vmem:[#allocation8 + $0x34] sm:$0xf0] }
 0x1b7   :  { %2940 = vmatpush.bf16.msrb.mxu0 %v4708_v14  ;;  %v1860_v5 = vadd.f32 %v1859_v49, %v522_v48  ;;  %v5198_v49 = vld [vmem:[#allocation7 + $0x190] sm:$0xf0]  ;;  %v5283_v48 = vld [vmem:[#allocation8 + $0x74] sm:$0xf0] }
 0x1b9   :  { %2896 = vmatpush.bf16.msrb.mxu1 %v4444_v16  ;;  %v1871_v38 = vpop.f32.mrf.mxu2  ;;  %v1885_v57 = vpop.f32.mrf.mxu3 }
 0x1ba   :  { %v1872_v6 = vadd.f32 %v1871_v38, %v1858_v2  ;;  %v4516_v38 = vor.u32 %v5210_v37, %v4515_v36  ;;  %v5280_v2 = vld [vmem:[#allocation8 + $0x64] sm:$0xf]  ;;  %v4869_v36 = vld [vmem:[#allocation8 + $0xf8] sm:$0xf0] }
 0x1bb   :  { %2941 = vmatpush.bf16.msrb.mxu0 %v4696_v26  ;;  %v4552_v26 = vor.u32 %v5219_v23, %v4551_v22  ;;  %v5271_v22 = vld [vmem:[#allocation8 + $0x14] sm:$0xf0] }
 0x1bc   :  { %v1886_v12 = vadd.f32 %v1885_v57, %v1872_v6  ;;  %v4796_v57 = vor.u32 %v5281_v56, %v4795_v55  ;;  %v4867_v6 = vld [vmem:[#allocation8 + $0xf0] sm:$0xf]  ;;  %v5294_v56 = vld [vmem:[#allocation8 + $0xd4] sm:$0xf] }
 0x1bd   :  { %2897 = vmatpush.bf16.msrb.mxu1 %v4432_v30  ;;  %v4539_v30 = vld [vmem:[#allocation7 + $0x218] sm:$0xf] }
 0x1be   :  { %v4540_v32 = vor.u32 %v5216_v31, %v4539_v30  ;;  %v4773_v30 = vld [vmem:[#allocation8 + $0x38] sm:$0xf0] }
 0x1bf   :  { %2942 = vmatpush.bf16.msrb.mxu0 %v4684_v39  ;;  %v4503_v39 = vld [vmem:[#allocation7 + $0x1d0] sm:$0xf] }
 0x1c1   :  { %2898 = vmatpush.bf16.msrb.mxu1 %v4420_v42  ;;  %v1873_v27 = vpop.f32.mrf.mxu2  ;;  %v1887_v13 = vpop.f32.mrf.mxu3  ;;  %v4491_v42 = vld [vmem:[#allocation7 + $0x1b8] sm:$0xf] }
 0x1c2   :  { %v1874_v8 = vadd.f32 %v1873_v27, %v1860_v5  ;;  %v4492_v19 = vor.u32 %v5204_v43, %v4491_v42  ;;  %v4771_v27 = vld [vmem:[#allocation8 + $0x30] sm:$0xf]  ;;  %v4765_v42 = vld [vmem:[#allocation8 + $0x28] sm:$0xf0]  ;;  %v5296_v43 = vld [vmem:[#allocation8 + $0xe4] sm:$0xf] }
 0x1c3   :  { %2943 = vmatpush.bf16.msrb.mxu0 %v4672_v51  ;;  %v4468_v51 = vor.u32 %v5198_v49, %v4467_v47  ;;  %v4772_v5 = vor.u32 %v5275_v4, %v4771_v27  ;;  %v4864_v47 = vor.u32 %v5296_v43, %v4861_v29  ;;  %v4819_v27 = vld [vmem:[#allocation8 + $0x90] sm:$0xf]  ;;  %v5287_v4 = vld [vmem:[#allocation8 + $0x94] sm:$0xf0] }
 0x1c4   :  { %2847 = vmatmul.bf16.vlgmr.msra.gmra.mxu1 %v5592_v3  ;;  %v1888_v15 = vadd.f32 %v1887_v13, %v1874_v8  ;;  %v5273_v13 = vld [vmem:[#allocation8 + $0x24] sm:$0xf0] }
 0x1c5   :  { %v1899_v61 = vpop.f32.mrf.mxu0  ;;  %2899 = vmatpush.bf16.msrb.mxu1 %v4408_v54  ;;  %v4804_v54 = vor.u32 %v5283_v48, %v4803_v52  ;;  %v5270_v48 = vld [vmem:[#allocation8 + $0x14] sm:$0xf] }
 0x1c6   :  { %v1900_v16 = vadd.f32 %v1899_v61, %v1886_v12  ;;  %v5282_v61 = vld [vmem:[#allocation8 + $0x74] sm:$0xf]  ;;  %v4763_v12 = vld [vmem:[#allocation8 + $0x20] sm:$0xf] }
 0x1c7   :  { %2944 = vmatpush.bf16.msrb.mxu0 %v4660_v0  ;;  %v4808_v63 = vor.u32 %v5282_v61, %v4805_v62  ;;  %v4779_v0 = vld [vmem:[#allocation8 + $0x40] sm:$0xf]  ;;  %v5268_v62 = vld [vmem:[#allocation8 + $0x4] sm:$0xf] }
 0x1c9   :  { %2900 = vmatpush.bf16.msrb.mxu1 %v4396_v53  ;;  %v4780_v53 = vor.u32 %v5277_v1, %v4779_v0  ;;  %v5292_v1 = vld [vmem:[#allocation8 + $0xc4] sm:$0xf] }
 0x1cb   :  { %3296 = vmatpush.bf16.msra.mxu0 %v4808_v63  ;;  %v4749_v63 = vld [vmem:[#allocation8 + $0x8] sm:$0xf0] }
 0x1cc   :  { %v1913_v7 = vpop.f32.mrf.mxu1  ;;  %v4752_v0 = vor.u32 %v5268_v62, %v4749_v63 }
 0x1cd   :  { %v1901_v14 = vpop.f32.mrf.mxu0  ;;  %2901 = vmatpush.bf16.msrb.mxu1 %v4384_v44  ;;  %v1914_v18 = vadd.f32 %v1913_v7, %v1900_v16  ;;  %v5299_v7 = vld [vmem:[#allocation8 + $0xf4] sm:$0xf0]  ;;  %v5278_v44 = vld [vmem:[#allocation8 + $0x54] sm:$0xf]  ;;  %v5297_v16 = vld [vmem:[#allocation8 + $0xe4] sm:$0xf0] }
 0x1ce   :  { %v1902_v20 = vadd.f32 %v1901_v14, %v1888_v15  ;;  %v4868_v8 = vor.u32 %v5299_v7, %v4867_v6  ;;  %v4792_v9 = vor.u32 %v5278_v44, %v4789_v11  ;;  %v4764_v14 = vor.u32 %v5273_v13, %v4763_v12  ;;  %v4859_v15 = vld [vmem:[#allocation8 + $0xe0] sm:$0xf]  ;;  %v5290_v7 = vld [vmem:[#allocation8 + $0xb4] sm:$0xf]  ;;  %v5285_v12 = vld [vmem:[#allocation8 + $0x84] sm:$0xf0] }
 0x1cf   :  { %v1922_v24 = vmax.f32 %v1914_v18, 0.0  ;;  %v5276_v18 = vld [vmem:[#allocation8 + $0x44] sm:$0xf] }
 0x1d1   :  { %2902 = vmatpush.bf16.msrb.mxu1 %v4372_v17  ;;  %v4860_v17 = vor.u32 %v5297_v16, %v4859_v15  ;;  %v5315_v15 = vld [vmem:[#allocation8 + $0x174] sm:$0xf0]  ;;  %v5314_v16 = vld [vmem:[#allocation8 + $0x174] sm:$0xf] }
 0x1d4   :  { %v1915_v21 = vpop.f32.mrf.mxu1  ;;  %2903 = vmatmul.bf16.vlgmr.msrb.gmra.mxu1 %v5587_v50  ;;  %v4504_v50 = vor.u32 %v5207_v41, %v4503_v39  ;;  %v5293_v39 = vld [vmem:[#allocation8 + $0xc4] sm:$0xf0] }
 0x1d5   :  { %v1916_v40 = vadd.f32 %v1915_v21, %v1902_v20  ;;  %3254 = vmatpush.bf16.msra.mxu1 %v4804_v54  ;;  %v4781_v20 = vld [vmem:[#allocation8 + $0x48] sm:$0xf0]  ;;  %v4755_v21 = vld [vmem:[#allocation8 + $0x10] sm:$0xf]  ;;  %v4757_v54 = vld [vmem:[#allocation8 + $0x18] sm:$0xf0] }
 0x1d6   :  { %v4756_v23 = vor.u32 %v5271_v22, %v4755_v21  ;;  %v4760_v55 = vor.u32 %v5270_v48, %v4757_v54  ;;  %v5288_v21 = vld [vmem:[#allocation8 + $0xa4] sm:$0xf]  ;;  %v5620_v22 = vld [vmem:[%s5651_s6] sm:$0x7]  ;;  %v4907_v48 = vld [vmem:[#allocation8 + $0x140] sm:$0xf] }
 0x1d7   :  { %v1927_v25 = vmax.f32 %v1916_v40, 0.0  ;;  %v4784_v40 = vor.u32 %v5276_v18, %v4781_v20  ;;  %v4933_v18 = vld [vmem:[#allocation8 + $0x178] sm:$0xf0]  ;;  %v5309_v54 = vld [vmem:[#allocation8 + $0x144] sm:$0xf0] }
 0x1d8   :  { %v4936_v20 = vor.u32 %v5314_v16, %v4933_v18  ;;  %v2096_v18 = vperm.slane %v5620_v22, 1 }
 0x1d9   :  { %v1932_v28 = vpack.c.bf16 %v1927_v25, %v1922_v24  ;;  %3255 = vmatpush.bf16.msra.mxu1 %v4796_v57  ;;  %v4851_v24 = vld [vmem:[#allocation8 + $0xd0] sm:$0xf]  ;;  %v5295_v25 = vld [vmem:[#allocation8 + $0xd4] sm:$0xf0] }
 0x1db   :  { %2805 = vmatmul.bf16.vlgmr.msra.gmra.mxu2 %v1932_v28  ;;  %2875 = vmatmul.bf16.vlgmr.msra.gmra.mxu3 %v1932_v28 }
 0x1dc   :  { %2945 = vmatmul.bf16.vlgmr.msrb.gmra.mxu0 %v1932_v28  ;;  %2909 = vmatpush.bf16.msra.mxu2 %v4552_v26  ;;  %v4852_v26 = vor.u32 %v5295_v25, %v4851_v24  ;;  %v5274_v28 = vld [vmem:[#allocation8 + $0x34] sm:$0xf]  ;;  %v4923_v24 = vld [vmem:[#allocation8 + $0x160] sm:$0xf]  ;;  %v5313_v25 = vld [vmem:[#allocation8 + $0x164] sm:$0xf0] }
 0x1dd   :  { %v4776_v31 = vor.u32 %v5274_v28, %v4773_v30  ;;  %v4924_v30 = vor.u32 %v5313_v25, %v4923_v24  ;;  %v5302_v24 = vld [vmem:[#allocation8 + $0x114] sm:$0xf]  ;;  %v4885_v25 = vld [vmem:[#allocation8 + $0x118] sm:$0xf0] }
 0x1e0   :  { %2910 = vmatpush.bf16.msra.mxu2 %v4540_v32  ;;  %v4747_v32 = vld [vmem:[#allocation8] sm:$0xf] }
 0x1e1   :  { %v4748_v34 = vor.u32 %v5269_v33, %v4747_v32  ;;  %v5286_v33 = vld [vmem:[#allocation8 + $0x94] sm:$0xf] }
 0x1e4   :  { %2911 = vmatpush.bf16.msra.mxu2 %v4528_v35  ;;  %v5298_v35 = vld [vmem:[#allocation8 + $0xf4] sm:$0xf] }
 0x1e5   :  { %v4872_v37 = vor.u32 %v5298_v35, %v4869_v36  ;;  %v2095_v35 = vperm.slane %v5620_v22, 0 }
 0x1e8   :  { %2912 = vmatpush.bf16.msra.mxu2 %v4516_v38  ;;  %v4843_v38 = vld [vmem:[#allocation8 + $0xc0] sm:$0xf] }
 0x1e9   :  { %v4844_v41 = vor.u32 %v5293_v39, %v4843_v38  ;;  %v4915_v39 = vld [vmem:[#allocation8 + $0x150] sm:$0xf] }
 0x1eb   :  { %2861 = vmatmul.bf16.vlgmr.msrb.gmra.mxu2 %v5598_v10  ;;  %2931 = vmatmul.bf16.vlgmr.msrb.gmra.mxu3 %v5598_v10  ;;  %v4787_v10 = vld [vmem:[#allocation8 + $0x50] sm:$0xf] }
 0x1ec   :  { %2913 = vmatpush.bf16.msra.mxu2 %v4504_v50  ;;  %v4788_v59 = vor.u32 %v5279_v58, %v4787_v10  ;;  %v5272_v50 = vld [vmem:[#allocation8 + $0x24] sm:$0xf]  ;;  %v4853_v10 = vld [vmem:[#allocation8 + $0xd8] sm:$0xf0]  ;;  %v4827_v58 = vld [vmem:[#allocation8 + $0xa0] sm:$0xf] }
 0x1ed   :  { %v4856_v57 = vor.u32 %v5294_v56, %v4853_v10  ;;  %v4908_v10 = vor.u32 %v5309_v54, %v4907_v48 }
 0x1ee   :  { %3256 = vmatpush.bf16.msra.mxu1 %v4788_v59  ;;  %v5289_v59 = vld [vmem:[#allocation8 + $0xa4] sm:$0xf0] }
 0x1ef   :  { %v4828_v61 = vor.u32 %v5289_v59, %v4827_v58 }
 0x1f0   :  { %2914 = vmatpush.bf16.msra.mxu2 %v4492_v19  ;;  %v4768_v19 = vor.u32 %v5272_v50, %v4765_v42  ;;  %v5310_v50 = vld [vmem:[#allocation8 + $0x154] sm:$0xf] }
 0x1f2   :  { %3257 = vmatpush.bf16.msra.mxu1 %v4780_v53  ;;  %v2750_v53 = vpop.f32.mrf.mxu2 }
 0x1f4   :  { %2915 = vmatpush.bf16.msra.mxu2 %v4480_v46  ;;  %v5291_v46 = vld [vmem:[#allocation8 + $0xb4] sm:$0xf0] }
 0x1f5   :  { %v4836_v49 = vor.u32 %v5291_v46, %v4835_v45  ;;  %v5284_v45 = vld [vmem:[#allocation8 + $0x84] sm:$0xf]  ;;  %v4813_v46 = vld [vmem:[#allocation8 + $0x88] sm:$0xf0] }
 0x1f6   :  { %3258 = vmatpush.bf16.msra.mxu1 %v4772_v5 }
 0x1f8   :  { %2916 = vmatpush.bf16.msra.mxu2 %v4468_v51  ;;  %v5607_v51 = vpop.f32.mrf.mxu3 }
 0x1fa   :  { %3259 = vmatpush.bf16.msra.mxu1 %v4764_v14  ;;  %v4931_v14 = vld [vmem:[#allocation8 + $0x170] sm:$0xf]  ;;  %v2752_v28 = vpop.f32.mrf.mxu2 }
 0x1fb   :  { %2917 = vmatmul.bf16.vlgmr.msra.gmra.mxu2 %v5592_v3  ;;  %v4797_v3 = vld [vmem:[#allocation8 + $0x68] sm:$0xf0]  ;;  %v2753_v58 = vadd.f32 %v2752_v28, %v2095_v35  ;;  %v4888_v28 = vor.u32 %v5302_v24, %v4885_v25 }
 0x1fc   :  { %v4800_v60 = vor.u32 %v5280_v2, %v4797_v3  ;;  %3268 = vmatpush.bf16.msrb.mxu2 %v4868_v8  ;;  %v4845_v2 = vld [vmem:[#allocation8 + $0xc8] sm:$0xf0]  ;;  %v4837_v8 = vld [vmem:[#allocation8 + $0xb8] sm:$0xf0] }
 0x1fd   :  { %v4848_v3 = vor.u32 %v5292_v1, %v4845_v2  ;;  %v4840_v11 = vor.u32 %v5290_v7, %v4837_v8  ;;  %v5307_v1 = vld [vmem:[#allocation8 + $0x134] sm:$0xf0] }
 0x1fe   :  { %3297 = vmatpush.bf16.msra.mxu0 %v4800_v60  ;;  %3260 = vmatpush.bf16.msra.mxu1 %v4756_v23  ;;  %v4820_v60 = vor.u32 %v5287_v4, %v4819_v27  ;;  %v4901_v27 = vld [vmem:[#allocation8 + $0x138] sm:$0xf0] }
 0x200   :  { %3269 = vmatpush.bf16.msrb.mxu2 %v4860_v17  ;;  %v5611_v5 = vpop.f32.mrf.mxu3  ;;  %v4932_v17 = vor.u32 %v5315_v15, %v4931_v14  ;;  %v4893_v15 = vld [vmem:[#allocation8 + $0x128] sm:$0xf0] }
 0x201   :  { %v2767_v62 = vadd.f32 %v5611_v5, %v2753_v58  ;;  %v4891_v5 = vld [vmem:[#allocation8 + $0x120] sm:$0xf] }
 0x202   :  { %3298 = vmatpush.bf16.msra.mxu0 %v4792_v9  ;;  %3261 = vmatpush.bf16.msra.mxu1 %v4748_v34  ;;  %v4811_v9 = vld [vmem:[#allocation8 + $0x80] sm:$0xf]  ;;  %v4821_v34 = vld [vmem:[#allocation8 + $0x98] sm:$0xf0] }
 0x203   :  { %v4812_v13 = vor.u32 %v5285_v12, %v4811_v9  ;;  %3282 = vmatpush.bf16.msra.mxu3 %v4932_v17  ;;  %v5304_v12 = vld [vmem:[#allocation8 + $0x124] sm:$0xf] }
 0x204   :  { %3270 = vmatpush.bf16.msrb.mxu2 %v4852_v26  ;;  %v5312_v26 = vld [vmem:[#allocation8 + $0x164] sm:$0xf]  ;;  %v4896_v17 = vor.u32 %v5304_v12, %v4893_v15  ;;  %v3008_v15 = vld [vmem:[%s5653_s8] sm:$0x3] }
 0x206   :  { %3299 = vmatpush.bf16.msra.mxu0 %v4784_v40  ;;  %3310 = vmatpush.bf16.msrb.mxu1 %v4872_v37  ;;  %v4829_v40 = vld [vmem:[#allocation8 + $0xa8] sm:$0xf0]  ;;  %v4824_v37 = vor.u32 %v5286_v33, %v4821_v34  ;;  %v5301_v33 = vld [vmem:[#allocation8 + $0x104] sm:$0xf0]  ;;  %v5300_v34 = vld [vmem:[#allocation8 + $0x104] sm:$0xf] }
 0x207   :  { %v5609_v52 = vpop.f32.mrf.mxu0  ;;  %v4832_v23 = vor.u32 %v5288_v21, %v4829_v40  ;;  %3283 = vmatpush.bf16.msra.mxu3 %v4924_v30  ;;  %v5303_v21 = vld [vmem:[#allocation8 + $0x114] sm:$0xf0] }
 0x208   :  { %3271 = vmatpush.bf16.msrb.mxu2 %v4844_v41  ;;  %v5623_v36 = vpop.f32.mrf.mxu3  ;;  %v5311_v41 = vld [vmem:[#allocation8 + $0x154] sm:$0xf0] }
 0x209   :  { %v4916_v43 = vor.u32 %v5311_v41, %v4915_v39  ;;  %v2821_v30 = vadd.f32 %v5623_v36, %v2096_v18  ;;  %v4877_v41 = vld [vmem:[#allocation8 + $0x108] sm:$0xf0] }
 0x20a   :  { %3300 = vmatpush.bf16.msra.mxu0 %v4776_v31  ;;  %3311 = vmatpush.bf16.msrb.mxu1 %v4864_v47  ;;  %v4925_v31 = vld [vmem:[#allocation8 + $0x168] sm:$0xf0]  ;;  %v4816_v47 = vor.u32 %v5284_v45, %v4813_v46 }
 0x20b   :  { %v4928_v32 = vor.u32 %v5312_v26, %v4925_v31  ;;  %3284 = vmatpush.bf16.msra.mxu3 %v4916_v43 }
 0x20c   :  { %3272 = vmatpush.bf16.msrb.mxu2 %v4836_v49  ;;  %v2751_v49 = vadd.f32 %v2750_v53, %v2095_v35 }
 0x20e   :  { %3301 = vmatpush.bf16.msra.mxu0 %v4768_v19  ;;  %3312 = vmatpush.bf16.msrb.mxu1 %v4856_v57  ;;  %v4917_v19 = vld [vmem:[#allocation8 + $0x158] sm:$0xf0]  ;;  %v4909_v57 = vld [vmem:[#allocation8 + $0x148] sm:$0xf0]  ;;  %v2765_v59 = vadd.f32 %v5607_v51, %v2751_v49 }
 0x20f   :  { %v5613_v6 = vpop.f32.mrf.mxu0  ;;  %v4920_v29 = vor.u32 %v5310_v50, %v4917_v19  ;;  %3285 = vmatpush.bf16.msra.mxu3 %v4908_v10 }
 0x210   :  { %3273 = vmatpush.bf16.msrb.mxu2 %v4828_v61  ;;  %v2779_v63 = vadd.f32 %v5609_v52, %v2765_v59  ;;  %v2822_v2 = vpop.f32.mrf.mxu3  ;;  %v2781_v4 = vadd.f32 %v5613_v6, %v2767_v62  ;;  %v5305_v52 = vld [vmem:[#allocation8 + $0x124] sm:$0xf0] }
 0x211   :  { %v4892_v14 = vor.u32 %v5305_v52, %v4891_v5  ;;  %v2823_v43 = vadd.f32 %v2822_v2, %v2096_v18 }
 0x212   :  { %3302 = vmatpush.bf16.msra.mxu0 %v4760_v55  ;;  %3313 = vmatpush.bf16.msrb.mxu1 %v4848_v3  ;;  %v5308_v55 = vld [vmem:[#allocation8 + $0x144] sm:$0xf]  ;;  %v5306_v3 = vld [vmem:[#allocation8 + $0x134] sm:$0xf] }
 0x213   :  { %v4912_v61 = vor.u32 %v5308_v55, %v4909_v57  ;;  %v4904_v8 = vor.u32 %v5306_v3, %v4901_v27 }
 0x214   :  { %3274 = vmatpush.bf16.msrb.mxu2 %v4820_v60 }
 0x216   :  { %3303 = vmatpush.bf16.msra.mxu0 %v4752_v0  ;;  %3314 = vmatpush.bf16.msrb.mxu1 %v4840_v11  ;;  %v4899_v0 = vld [vmem:[#allocation8 + $0x130] sm:$0xf] }
 0x217   :  { %v5625_v38 = vpop.f32.mrf.mxu0  ;;  %v4900_v53 = vor.u32 %v5307_v1, %v4899_v0 }
 0x218   :  { %3275 = vmatpush.bf16.msrb.mxu2 %v4812_v13  ;;  %v2835_v50 = vadd.f32 %v5625_v38, %v2821_v30 }
 0x219   :  { %3286 = vmatpush.bf16.msra.mxu3 %v4900_v53 }
 0x21a   :  { %3315 = vmatpush.bf16.msrb.mxu1 %v4832_v23 }
 0x21c   :  { %3324 = vmatpush.bf16.msra.mxu2 %v4936_v20 }
 0x21d   :  { %3287 = vmatpush.bf16.msra.mxu3 %v4892_v14 }
 0x21e   :  { %3316 = vmatpush.bf16.msrb.mxu1 %v4824_v37 }
 0x21f   :  { %v2836_v60 = vpop.f32.mrf.mxu0 }
 0x220   :  { %3325 = vmatpush.bf16.msra.mxu2 %v4928_v32  ;;  %v4875_v32 = vld [vmem:[#allocation8 + $0x100] sm:$0xf] }
 0x221   :  { %v4876_v39 = vor.u32 %v5301_v33, %v4875_v32 }
 0x222   :  { %3317 = vmatpush.bf16.msrb.mxu1 %v4816_v47 }
 0x224   :  { %3326 = vmatpush.bf16.msra.mxu2 %v4920_v29  ;;  %v2837_v29 = vadd.f32 %v2836_v60, %v2823_v43 }
 0x227   :  { %v2890_v31 = vpop.f32.mrf.mxu0 }
 0x228   :  { %3327 = vmatpush.bf16.msra.mxu2 %v4912_v61 }
 0x22c   :  { %3328 = vmatpush.bf16.msra.mxu2 %v4904_v8 }
 0x22f   :  { %v2892_v54 = vpop.f32.mrf.mxu0 }
 0x230   :  { %3329 = vmatpush.bf16.msra.mxu2 %v4896_v17 }
 0x231   :  { %v5615_v44 = vpop.f32.mrf.mxu1 }
 0x232   :  { %v2793_v7 = vadd.f32 %v5615_v44, %v2779_v63  ;;  %v4883_v44 = vld [vmem:[#allocation8 + $0x110] sm:$0xf] }
 0x233   :  { %v4884_v23 = vor.u32 %v5303_v21, %v4883_v44 }
 0x234   :  { %3330 = vmatpush.bf16.msra.mxu2 %v4888_v28 }
 0x235   :  { %3288 = vmatpush.bf16.msra.mxu3 %v4884_v23 }
 0x239   :  { %v2794_v42 = vpop.f32.mrf.mxu1  ;;  %3289 = vmatpush.bf16.msra.mxu3 %v4876_v39 }
 0x23a   :  { %v2795_v11 = vadd.f32 %v2794_v42, %v2781_v4  ;;  %v4880_v42 = vor.u32 %v5300_v34, %v4877_v41 }
 0x23c   :  { %3331 = vmatpush.bf16.msra.mxu2 %v4880_v42 }
 0x241   :  { %v2848_v51 = vpop.f32.mrf.mxu1 }
 0x242   :  { %v2849_v19 = vadd.f32 %v2848_v51, %v2835_v50 }
 0x249   :  { %v2850_v35 = vpop.f32.mrf.mxu1 }
 0x24a   :  { %v2851_v46 = vadd.f32 %v2850_v35, %v2837_v29 }
 0x251   :  { %v2904_v55 = vpop.f32.mrf.mxu1 }
 0x259   :  { %v2946_v0 = vpop.f32.mrf.mxu0  ;;  %v2906_v2 = vpop.f32.mrf.mxu1 }
 0x25e   :  { %v2806_v56 = vpop.f32.mrf.mxu2  ;;  %v2876_v40 = vpop.f32.mrf.mxu3 }
 0x25f   :  { %v2807_v9 = vadd.f32 %v2806_v56, %v2793_v7  ;;  %v2097_v56 = vperm.slane %v5620_v22, 2 }
 0x261   :  { %v2951_v6 = vmax.f32 %v2807_v9, 0.0  ;;  %v2891_v38 = vadd.f32 %v2890_v31, %v2097_v56  ;;  %v2893_v53 = vadd.f32 %v2892_v54, %v2097_v56  ;;  %v2948_v51 = vpop.f32.mrf.mxu0 }
 0x263   :  { %v2905_v63 = vadd.f32 %v2904_v55, %v2891_v38  ;;  %v2907_v3 = vadd.f32 %v2906_v2, %v2893_v53  ;;  %v5326_v38 = vld [vmem:[#allocation2] ss:$0 sm:$0xff] }
 0x266   :  { %v2808_v13 = vpop.f32.mrf.mxu2  ;;  %v2878_v45 = vpop.f32.mrf.mxu3 }
 0x267   :  { %v2809_v16 = vadd.f32 %v2808_v13, %v2795_v11 }
 0x269   :  { %v2954_v20 = vmax.f32 %v2809_v16, 0.0  ;;  %v3342_v16 = vld [vmem:[%s5654_s9] sm:$0x3] }
 0x26a   :  { %v3343_v44 = vunpack.c.l.bf16 %v3342_v16 }
 0x26b   :  { %v2957_v26 = vpack.c.bf16 %v2954_v20, %v2951_v6  ;;  %v3010_v6 = vperm.slane %v3008_v15, 0  ;;  %v3011_v20 = vperm.slane %v3008_v15, 1 }
 0x26c   :  { %v3345_v24 = vperm.slane %v3343_v44, 0  ;;  %v3346_v25 = vperm.slane %v3343_v44, 2 }
 0x26d   :  { %3262 = vmatmul.bf16.vlgmr.msra.gmra.mxu1 %v2957_v26  ;;  %3304 = vmatmul.bf16.vlgmr.msra.gmra.mxu0 %v2957_v26 }
 0x26e   :  { %v2862_v37 = vpop.f32.mrf.mxu2  ;;  %v2932_v61 = vpop.f32.mrf.mxu3  ;;  %v3349_v34 = vperm.slane %v3345_v24, 0  ;;  %v3350_v35 = vperm.slane %v3346_v25, 0 }
 0x26f   :  { %v2863_v36 = vadd.f32 %v2862_v37, %v2849_v19 }
 0x271   :  { %v2877_v49 = vadd.f32 %v2876_v40, %v2863_v36 }
 0x273   :  { %v2952_v57 = vmax.f32 %v2877_v49, 0.0 }
 0x276   :  { %v2864_v47 = vpop.f32.mrf.mxu2  ;;  %v2934_v7 = vpop.f32.mrf.mxu3 }
 0x277   :  { %v2865_v48 = vadd.f32 %v2864_v47, %v2851_v46 }
 0x279   :  { %v2879_v10 = vadd.f32 %v2878_v45, %v2865_v48 }
 0x27b   :  { %v2955_v58 = vmax.f32 %v2879_v10, 0.0 }
 0x27d   :  { %v2958_v59 = vpack.c.bf16 %v2955_v58, %v2952_v57 }
 0x27e   :  { %v2918_v62 = vpop.f32.mrf.mxu2 }
 0x27f   :  { %3276 = vmatmul.bf16.vlgmr.msrb.gmra.mxu2 %v2958_v59  ;;  %3318 = vmatmul.bf16.vlgmr.msrb.gmra.mxu1 %v2958_v59  ;;  %v2919_v1 = vadd.f32 %v2918_v62, %v2905_v63 }
 0x281   :  { %v2933_v27 = vadd.f32 %v2932_v61, %v2919_v1 }
 0x283   :  { %v2947_v22 = vadd.f32 %v2946_v0, %v2933_v27 }
 0x285   :  { %v2953_v9 = vmax.f32 %v2947_v22, 0.0 }
 0x286   :  { %v2920_v4 = vpop.f32.mrf.mxu2 }
 0x287   :  { %v2921_v60 = vadd.f32 %v2920_v4, %v2907_v3 }
 0x289   :  { %v2935_v8 = vadd.f32 %v2934_v7, %v2921_v60 }
 0x28b   :  { %v2949_v11 = vadd.f32 %v2948_v51, %v2935_v8 }
 0x28d   :  { %v2956_v5 = vmax.f32 %v2949_v11, 0.0 }
 0x28f   :  { %v2959_v52 = vpack.c.bf16 %v2956_v5, %v2953_v9 }
 0x291   :  { %3290 = vmatmul.bf16.vlgmr.msra.gmra.mxu3 %v2959_v52  ;;  %3332 = vmatmul.bf16.vlgmr.msra.gmra.mxu2 %v2959_v52 }
 0x2ea   :  { %v3263_v12 = vpop.f32.mrf.mxu1  ;;  %v3305_v17 = vpop.f32.mrf.mxu0 }
 0x2eb   :  { %v3264_v40 = vadd.f32 %v3263_v12, %v3010_v6  ;;  %v3306_v23 = vadd.f32 %v3305_v17, %v3011_v20 }
 0x2f2   :  { %v3265_v14 = vpop.f32.mrf.mxu1  ;;  %v3307_v37 = vpop.f32.mrf.mxu0 }
 0x2f3   :  { %v3266_v42 = vadd.f32 %v3265_v14, %v3010_v6  ;;  %v3308_v43 = vadd.f32 %v3307_v37, %v3011_v20 }
 0x2fc   :  { %v3319_v21 = vpop.f32.mrf.mxu1 }
 0x2fd   :  { %v3320_v26 = vadd.f32 %v3319_v21, %v3306_v23 }
 0x302   :  { %v3277_v13 = vpop.f32.mrf.mxu2 }
 0x303   :  { %v3278_v28 = vadd.f32 %v3277_v13, %v3264_v40 }
 0x304   :  { %v3321_v50 = vpop.f32.mrf.mxu1 }
 0x305   :  { %v3322_v36 = vadd.f32 %v3321_v50, %v3308_v43 }
 0x30a   :  { %v3279_v18 = vpop.f32.mrf.mxu2 }
 0x30b   :  { %v3280_v45 = vadd.f32 %v3279_v18, %v3266_v42 }
 0x314   :  { %v3291_v30 = vpop.f32.mrf.mxu3  ;;  %v3333_v31 = vpop.f32.mrf.mxu2 }
 0x315   :  { %v3292_v32 = vadd.f32 %v3291_v30, %v3278_v28  ;;  %v3334_v33 = vadd.f32 %v3333_v31, %v3320_v26 }
 0x317   :  { %v3338_v39 = vmax.f32 %v3292_v32, 0.0  ;;  %v3339_v41 = vmax.f32 %v3334_v33, 0.0 }
 0x319   :  { %v3351_v19 = vmul.f32 %v3349_v34, %v3338_v39  ;;  %v3352_v29 = vmul.f32 %v3350_v35, %v3339_v41 }
 0x31b   :  { %v3355_v46 = vadd.f32 %v3352_v29, %v3351_v19 }
 0x31c   :  { %v3293_v47 = vpop.f32.mrf.mxu3  ;;  %v3335_v49 = vpop.f32.mrf.mxu2 }
 0x31d   :  { %v3294_v48 = vadd.f32 %v3293_v47, %v3280_v45  ;;  %v3336_v54 = vadd.f32 %v3335_v49, %v3322_v36  ;;  %3356 = vadd.xlane.f32.xlu0 %v3355_v46 }
 0x31f   :  { %v3340_v55 = vmax.f32 %v3294_v48, 0.0  ;;  %v3341_v56 = vmax.f32 %v3336_v54, 0.0 }
 0x321   :  { %v3353_v10 = vmul.f32 %v3349_v34, %v3340_v55  ;;  %v3354_v57 = vmul.f32 %v3350_v35, %v3341_v56 }
 0x323   :  { %v3358_v58 = vadd.f32 %v3354_v57, %v3353_v10 }
 0x325   :  { %3359 = vadd.xlane.f32.xlu0 %v3358_v58 }
 0x390   :  { %v3357_v59 = vpop.xlane.xlu0 %3356 }
 0x391   :  { %v3365_v61 = vadd.f32 %v5326_v38, %v3357_v59 }
 0x393   :  { %v3367_v62 = vmax.f32 %v3365_v61, 0.0 }
 0x395   :  { %3370 = vst.msk [vmem:[#allocation10] sm:$0xff] %vm3369_vm1, %v3367_v62 }
 0x398   :  { %v3360_v63 = vpop.xlane.xlu0 %3359 }
 0x39c   :  { %v3402_v0 = vld [vmem:[#allocation10] sm:$0xff] }
 0x39d   :  { %3403 = vst [vmem:[%s5656_s11] sm:$0xff] %v3402_v0 }
 0x39e   :  { %3409 = vsyncpa [#allocation4], 1 }
 0x39f   :  { %3410 = vsyncpa [#allocation6], 1 }
 0x3a0   :  { %3411 = vsyncpa [#allocation9], 1 }

</bundles_post_ra>
